<compile_context>
chip_gen: v6e
topology: v6e:2x2x1
jax: 0.10.0
libtpu: 0.0.40
codegen_flags: <defaults>
</compile_context>

<pallas_src>
import functools
import math

import jax
import jax.numpy as jnp
from jax.experimental import pallas as pl
from jax.experimental.pallas import tpu as pltpu


def _decoder_kernel(num_heads, eps, Bc, S, Sm, D,
                    tgt_ref, mem_ref,
                    sa_qkv_w_ref, sa_qkv_b_ref, sa_ow_ref, sa_ob_ref,
                    ca_q_w_ref, ca_q_b_ref, ca_kv_w_ref, ca_kv_b_ref,
                    ca_ow_ref, ca_ob_ref,
                    ln_w_ref, ln_b_ref,
                    w1_ref, b1_ref, w2_ref, b2_ref,
                    out_ref, act_ref):
    layer = pl.program_id(1)
    n_layers = pl.num_programs(1)
    dh = D // num_heads
    f32, bf16 = jnp.float32, jnp.bfloat16

    # Layer 0 seeds the f32 resident activation scratch from tgt (bf16 input);
    # later layers read/write the scratch which stays in VMEM for the whole
    # chunk (no HBM writeback, no rounding through the output dtype).
    @pl.when(layer == 0)
    def _():
        act_ref[...] = tgt_ref[...].reshape(Bc * S, D).astype(f32)

    x = act_ref[...]                                  # (R,  D) f32
    mem = mem_ref[...].reshape(Bc * Sm, D)            # (Rm, D) bf16 (MXU operand)

    def layernorm(v, gamma, beta):
        mu = jnp.mean(v, axis=-1, keepdims=True)
        var = jnp.mean((v - mu) ** 2, axis=-1, keepdims=True)
        return (v - mu) * jax.lax.rsqrt(var + eps) * gamma + beta

    def attend(q, k, v, sq, skv):
        # q: (Bc*sq, D) f32 (scale already folded into Wq), k/v: (Bc*skv, D).
        # Heads live in 32-lane column groups; stack them along the cheap
        # leading axis so softmax and both contractions run ONCE, batched
        # over Bc*num_heads, instead of a per-head unrolled loop.
        def stack(t, s):
            parts = [t[:, h * dh:(h + 1) * dh] for h in range(num_heads)]
            return jnp.concatenate(parts, axis=0).reshape(
                num_heads * Bc, s, dh)
        qs = stack(q, sq).astype(bf16)
        ks = stack(k, skv).astype(bf16)
        vs = stack(v, skv).astype(bf16)
        s = jnp.einsum('bqd,bkd->bqk', qs, ks, preferred_element_type=f32)
        s = s - jnp.max(s, axis=-1, keepdims=True)
        p = jnp.exp(s)
        p = p * pl.reciprocal(jnp.sum(p, axis=-1, keepdims=True), approx=True)
        ctx = jnp.einsum('bqk,bkd->bqd', p.astype(bf16), vs,
                         preferred_element_type=f32)
        ctx = ctx.reshape(num_heads, Bc * sq, dh)
        return jnp.concatenate([ctx[h] for h in range(num_heads)], axis=-1)

    ln_w = ln_w_ref[...]                              # (3, D) f32
    ln_b = ln_b_ref[...]                              # (3, D) f32

    # ---- self-attention (fused QKV projection) ----
    x_b = x.astype(bf16)
    qkv = jnp.dot(x_b, sa_qkv_w_ref[...],
                  preferred_element_type=f32) + sa_qkv_b_ref[...]
    attn = attend(qkv[:, :D], qkv[:, D:2 * D], qkv[:, 2 * D:], S, S)
    sa = jnp.dot(attn.astype(bf16), sa_ow_ref[...],
                 preferred_element_type=f32) + sa_ob_ref[...]
    x = layernorm(x + sa, ln_w[0:1], ln_b[0:1])

    # ---- cross-attention (fused K/V projection from memory) ----
    x_b = x.astype(bf16)
    q = jnp.dot(x_b, ca_q_w_ref[...],
                preferred_element_type=f32) + ca_q_b_ref[...]
    kv = jnp.dot(mem, ca_kv_w_ref[...],
                 preferred_element_type=f32) + ca_kv_b_ref[...]
    attn = attend(q, kv[:, :D], kv[:, D:], S, Sm)
    ca = jnp.dot(attn.astype(bf16), ca_ow_ref[...],
                 preferred_element_type=f32) + ca_ob_ref[...]
    x = layernorm(x + ca, ln_w[1:2], ln_b[1:2])

    # ---- feed-forward ----
    ff = jnp.dot(x.astype(bf16), w1_ref[...],
                 preferred_element_type=f32) + b1_ref[...]
    ff = jnp.maximum(ff, 0.0)
    ff = jnp.dot(ff.astype(bf16), w2_ref[...],
                 preferred_element_type=f32) + b2_ref[...]
    x = layernorm(x + ff, ln_w[2:3], ln_b[2:3])

    act_ref[...] = x

    @pl.when(layer == n_layers - 1)
    def _():
        out_ref[...] = x.reshape(Bc, S, D).astype(out_ref.dtype)


def _pick_batch_chunks(B, S):
    """Split the batch across cores only on multi-TensorCore chips (v7x-like)
    and only when each chunk still has enough rows (>=128) to feed the MXU.
    On single-TC v5e/v6e, splitting just re-DMAs every layer's weights and
    halves MXU row occupancy for zero parallelism gain."""
    multi_tc = False
    try:
        kind = jax.devices()[0].device_kind.lower()
        multi_tc = ("v7" in kind) or ("7x" in kind)
    except Exception:
        multi_tc = False
    if multi_tc and B % 2 == 0 and (B // 2) * S >= 128:
        return 2
    return 1


def transformer_decoder(tgt_sbd, mem_sbd, layer_params, num_heads, eps=1e-5):
    """TransformerDecoder.forward. I/O layout (S, B, D) like PyTorch."""
    S, B, D = tgt_sbd.shape
    Sm = mem_sbd.shape[0]
    L = len(layer_params)
    assert D % num_heads == 0, "d_model must be divisible by num_heads"
    assert D % 128 == 0, "d_model must be a multiple of 128 (lane-dense)"
    Dff = layer_params[0]["w1"].shape[1]
    assert Dff % 128 == 0, "dim_feedforward must be a multiple of 128"

    # Activations enter as bf16 (they are only ever MXU operands inside the
    # kernel); internal accumulation is f32 in a VMEM scratch.
    x = jnp.transpose(tgt_sbd, (1, 0, 2)).astype(jnp.bfloat16)   # (B, S,  D)
    m = jnp.transpose(mem_sbd, (1, 0, 2)).astype(jnp.bfloat16)   # (B, Sm, D)

    # Fold 1/sqrt(dh) into the query projections once, on the host.
    scale = 1.0 / math.sqrt(D // num_heads)

    def fold(lp):
        lp = dict(lp)
        w = lp["sa_qkv_w"].astype(jnp.float32).at[:, :D].multiply(scale)
        lp["sa_qkv_w"] = w.astype(jnp.bfloat16)
        lp["sa_qkv_b"] = lp["sa_qkv_b"].at[:, :D].multiply(scale)
        lp["ca_q_w"] = (lp["ca_q_w"].astype(jnp.float32)
                        * scale).astype(jnp.bfloat16)
        lp["ca_q_b"] = lp["ca_q_b"] * scale
        return lp

    layer_params = [fold(lp) for lp in layer_params]
    # Stack per-layer weights along a leading L axis -> one pallas_call for
    # the whole decoder; the layer axis is a sequential ("arbitrary") grid axis.
    p = {k: jnp.stack([lp[k] for lp in layer_params]) for k in layer_params[0]}

    nb = _pick_batch_chunks(B, S)
    Bc = B // nb

    def batched(shape):
        return pl.BlockSpec(shape, lambda b, l: (b, 0, 0))

    def per_layer(shape):
        nd = len(shape)
        return pl.BlockSpec((None,) + shape,              # squeezed layer dim
                            lambda b, l, _nd=nd: (l,) + (0,) * _nd)

    kernel = functools.partial(_decoder_kernel, num_heads, eps, Bc, S, Sm, D)

    in_specs = [
        batched((Bc, S, D)),                   # tgt (bf16)
        batched((Bc, Sm, D)),                  # memory (bf16)
        per_layer((D, 3 * D)), per_layer((1, 3 * D)),     # self-attn QKV
        per_layer((D, D)), per_layer((1, D)),             # self-attn out proj
        per_layer((D, D)), per_layer((1, D)),             # cross-attn Q
        per_layer((D, 2 * D)), per_layer((1, 2 * D)),     # cross-attn KV
        per_layer((D, D)), per_layer((1, D)),             # cross-attn out proj
        per_layer((3, D)), per_layer((3, D)),             # layernorms
        per_layer((D, Dff)), per_layer((1, Dff)),         # FFN 1
        per_layer((Dff, D)), per_layer((1, D)),           # FFN 2
    ]

    # VMEM budget: double-buffered weight streams + resident activation blocks
    # (+ generous tile-padding / internal-scratch margin), clamped well below
    # v7x's 64 MiB physical VMEM.
    w_bytes = 2 * (D * 3 * D + D * D + D * D + D * 2 * D + D * D
                   + D * Dff + Dff * D)
    b_bytes = 4 * (3 * D + D + D + 2 * D + D + 2 * 3 * D + Dff + D)
    act_bytes = 2 * Bc * (S + Sm) * D + 4 * Bc * S * D * 2
    vmem_est = 2 * (w_bytes + b_bytes + act_bytes) + (8 << 20)
    vmem_limit = int(min(max(vmem_est, 32 << 20), 48 << 20))

    out = pl.pallas_call(
        kernel,
        out_shape=jax.ShapeDtypeStruct((B, S, D), tgt_sbd.dtype),
        grid=(nb, L),
        in_specs=in_specs,
        out_specs=pl.BlockSpec((Bc, S, D), lambda b, l: (b, 0, 0)),
        scratch_shapes=[pltpu.VMEM((Bc * S, D), jnp.float32)],
        compiler_params=pltpu.CompilerParams(
            dimension_semantics=("parallel", "arbitrary"),
            vmem_limit_bytes=vmem_limit),
    )(x, m,
      p["sa_qkv_w"], p["sa_qkv_b"], p["sa_ow"], p["sa_ob"],
      p["ca_q_w"], p["ca_q_b"], p["ca_kv_w"], p["ca_kv_b"],
      p["ca_ow"], p["ca_ob"],
      p["ln_w"], p["ln_b"],
      p["w1"], p["b1"], p["w2"], p["b2"])

    return jnp.transpose(out, (1, 0, 2))       # -> (S, B, D)


def init_layer_params(key, d_model, dim_feedforward):
    ks = jax.random.split(key, 7)
    s = 0.02
    f32, bf16 = jnp.float32, jnp.bfloat16
    D, Dff = d_model, dim_feedforward

    def w(k, shape):
        # Matmul weights stored bf16 (MXU operands), already transposed so
        # that y = x @ W; biases / LN params stay f32.
        return (s * jax.random.normal(k, shape, f32)).astype(bf16)

    return {
        "sa_qkv_w": w(ks[0], (D, 3 * D)),        # [Wq | Wk | Wv]
        "sa_qkv_b": jnp.zeros((1, 3 * D), f32),
        "sa_ow": w(ks[1], (D, D)),
        "sa_ob": jnp.zeros((1, D), f32),
        "ca_q_w": w(ks[2], (D, D)),
        "ca_q_b": jnp.zeros((1, D), f32),
        "ca_kv_w": w(ks[3], (D, 2 * D)),          # [Wk | Wv]
        "ca_kv_b": jnp.zeros((1, 2 * D), f32),
        "ca_ow": w(ks[4], (D, D)),
        "ca_ob": jnp.zeros((1, D), f32),
        "ln_w": jnp.ones((3, D), f32),
        "ln_b": jnp.zeros((3, D), f32),
        "w1": w(ks[5], (D, Dff)),
        "b1": jnp.zeros((1, Dff), f32),
        "w2": w(ks[6], (Dff, D)),
        "b2": jnp.zeros((1, D), f32),
    }


if __name__ == "__main__":
    # Small shapes: seq=8, batch=2, d_model=128 (lane-dense), heads=4,
    # ffn=256, memory seq=8, 2 layers.
    S, B, D, H, DFF, SM, L = 8, 2, 128, 4, 256, 8, 2
    key = jax.random.PRNGKey(0)
    k_tgt, k_mem, k_par = jax.random.split(key, 3)
    tgt = jax.random.normal(k_tgt, (S, B, D), jnp.float32)       # (S,  B, D)
    memory = jax.random.normal(k_mem, (SM, B, D), jnp.float32)   # (Sm, B, D)
    params = [init_layer_params(k, D, DFF) for k in jax.random.split(k_par, L)]

    out = transformer_decoder(tgt, memory, params, H)
    out = jax.block_until_ready(out)
    assert out.shape == (S, B, D) and out.dtype == jnp.float32
    assert bool(jnp.all(jnp.isfinite(out)))
    print("KERNEL_OK")
</pallas_src>

<mosaic_0001>
module attributes {stable_mosaic.version = 11 : i64} {
  func.func @_decoder_kernel(%arg0: i32, %arg1: i32, %arg2: memref<2x8x128xbf16, #tpu.memory_space<vmem>>, %arg3: memref<2x8x128xbf16, #tpu.memory_space<vmem>>, %arg4: memref<1x128x384xbf16, #tpu.memory_space<vmem>>, %arg5: memref<1x1x384xf32, #tpu.memory_space<vmem>>, %arg6: memref<1x128x128xbf16, #tpu.memory_space<vmem>>, %arg7: memref<1x1x128xf32, #tpu.memory_space<vmem>>, %arg8: memref<1x128x128xbf16, #tpu.memory_space<vmem>>, %arg9: memref<1x1x128xf32, #tpu.memory_space<vmem>>, %arg10: memref<1x128x256xbf16, #tpu.memory_space<vmem>>, %arg11: memref<1x1x256xf32, #tpu.memory_space<vmem>>, %arg12: memref<1x128x128xbf16, #tpu.memory_space<vmem>>, %arg13: memref<1x1x128xf32, #tpu.memory_space<vmem>>, %arg14: memref<1x3x128xf32, #tpu.memory_space<vmem>>, %arg15: memref<1x3x128xf32, #tpu.memory_space<vmem>>, %arg16: memref<1x128x256xbf16, #tpu.memory_space<vmem>>, %arg17: memref<1x1x256xf32, #tpu.memory_space<vmem>>, %arg18: memref<1x256x128xbf16, #tpu.memory_space<vmem>>, %arg19: memref<1x1x128xf32, #tpu.memory_space<vmem>>, %arg20: memref<2x8x128xf32, #tpu.memory_space<vmem>>, %arg21: memref<16x128xf32, #tpu.memory_space<vmem>>) attributes {dimension_semantics = [#tpu.dimension_semantics<parallel>, #tpu.dimension_semantics<arbitrary>], iteration_bounds = array<i64: 1, 2>, scalar_prefetch = 0 : i64, scratch_operands = 1 : i64, tpu.core_type = #tpu.core_type<tc>, window_params = [{transform_indices = @transform_0, window_bounds = array<i64: 2, 8, 128>}, {transform_indices = @transform_1, window_bounds = array<i64: 2, 8, 128>}, {transform_indices = @transform_2, window_bounds = array<i64: 1, 128, 384>}, {transform_indices = @transform_3, window_bounds = array<i64: 1, 1, 384>}, {transform_indices = @transform_4, window_bounds = array<i64: 1, 128, 128>}, {transform_indices = @transform_5, window_bounds = array<i64: 1, 1, 128>}, {transform_indices = @transform_6, window_bounds = array<i64: 1, 128, 128>}, {transform_indices = @transform_7, window_bounds = array<i64: 1, 1, 128>}, {transform_indices = @transform_8, window_bounds = array<i64: 1, 128, 256>}, {transform_indices = @transform_9, window_bounds = array<i64: 1, 1, 256>}, {transform_indices = @transform_10, window_bounds = array<i64: 1, 128, 128>}, {transform_indices = @transform_11, window_bounds = array<i64: 1, 1, 128>}, {transform_indices = @transform_12, window_bounds = array<i64: 1, 3, 128>}, {transform_indices = @transform_13, window_bounds = array<i64: 1, 3, 128>}, {transform_indices = @transform_14, window_bounds = array<i64: 1, 128, 256>}, {transform_indices = @transform_15, window_bounds = array<i64: 1, 1, 256>}, {transform_indices = @transform_16, window_bounds = array<i64: 1, 256, 128>}, {transform_indices = @transform_17, window_bounds = array<i64: 1, 1, 128>}, {transform_indices = @transform_18, window_bounds = array<i64: 2, 8, 128>}]} {
    %c0_i32 = arith.constant 0 : i32
    %0 = arith.cmpi eq, %arg1, %c0_i32 : i32
    %1 = arith.extui %0 : i1 to i32
    %c0_i32_0 = arith.constant 0 : i32
    %2 = arith.cmpi ne, %1, %c0_i32_0 : i32
    scf.if %2 {
      %c0_86 = arith.constant 0 : index
      %c0_87 = arith.constant 0 : index
      %c0_88 = arith.constant 0 : index
      %239 = vector.load %arg2[%c0_86, %c0_87, %c0_88] : memref<2x8x128xbf16, #tpu.memory_space<vmem>>, vector<2x8x128xbf16>
      %240 = vector.shape_cast %239 : vector<2x8x128xbf16> to vector<16x128xbf16>
      %241 = arith.extf %240 : vector<16x128xbf16> to vector<16x128xf32>
      %c0_89 = arith.constant 0 : index
      %c0_90 = arith.constant 0 : index
      %242 = vector.load %arg21[%c0_89, %c0_90] : memref<16x128xf32, #tpu.memory_space<vmem>>, vector<16x128xf32>
      tpu.vector_store %arg21[%c0_89, %c0_90], %241 {strides = array<i32>} : memref<16x128xf32, #tpu.memory_space<vmem>>, vector<16x128xf32>,
    } else {
    }
    %c0 = arith.constant 0 : index
    %c0_1 = arith.constant 0 : index
    %3 = vector.load %arg21[%c0, %c0_1] : memref<16x128xf32, #tpu.memory_space<vmem>>, vector<16x128xf32>
    %c0_2 = arith.constant 0 : index
    %c0_3 = arith.constant 0 : index
    %c0_4 = arith.constant 0 : index
    %4 = vector.load %arg3[%c0_2, %c0_3, %c0_4] : memref<2x8x128xbf16, #tpu.memory_space<vmem>>, vector<2x8x128xbf16>
    %5 = vector.shape_cast %4 : vector<2x8x128xbf16> to vector<16x128xbf16>
    %c0_5 = arith.constant 0 : index
    %c0_6 = arith.constant 0 : index
    %c0_7 = arith.constant 0 : index
    %6 = vector.load %arg14[%c0_5, %c0_6, %c0_7] : memref<1x3x128xf32, #tpu.memory_space<vmem>>, vector<1x3x128xf32>
    %7 = vector.shape_cast %6 : vector<1x3x128xf32> to vector<3x128xf32>
    %c0_8 = arith.constant 0 : index
    %c0_9 = arith.constant 0 : index
    %c0_10 = arith.constant 0 : index
    %8 = vector.load %arg15[%c0_8, %c0_9, %c0_10] : memref<1x3x128xf32, #tpu.memory_space<vmem>>, vector<1x3x128xf32>
    %9 = vector.shape_cast %8 : vector<1x3x128xf32> to vector<3x128xf32>
    %10 = arith.truncf %3 : vector<16x128xf32> to vector<16x128xbf16>
    %c0_11 = arith.constant 0 : index
    %c0_12 = arith.constant 0 : index
    %c0_13 = arith.constant 0 : index
    %11 = vector.load %arg4[%c0_11, %c0_12, %c0_13] : memref<1x128x384xbf16, #tpu.memory_space<vmem>>, vector<1x128x384xbf16>
    %12 = vector.shape_cast %11 : vector<1x128x384xbf16> to vector<128x384xbf16>
    %cst = arith.constant dense<0.000000e+00> : vector<16x384xf32>
    %13 = tpu.matmul %10, %12, %cst {dimension_numbers = #tpu.dot_dimension_numbers<[1], [0], [0], [1], [0, 0, 1, 1], [], []>} : vector<16x128xbf16>, vector<128x384xbf16>, vector<16x384xf32> -> vector<16x384xf32>
    %c0_14 = arith.constant 0 : index
    %c0_15 = arith.constant 0 : index
    %c0_16 = arith.constant 0 : index
    %14 = vector.load %arg5[%c0_14, %c0_15, %c0_16] : memref<1x1x384xf32, #tpu.memory_space<vmem>>, vector<1x1x384xf32>
    %15 = vector.shape_cast %14 : vector<1x1x384xf32> to vector<1x384xf32>
    %16 = vector.broadcast %15 : vector<1x384xf32> to vector<16x384xf32>
    %17 = arith.addf %13, %16 : vector<16x384xf32>
    %18 = vector.extract_strided_slice %17 {offsets = [0, 0], sizes = [16, 128], strides = [1, 1]} : vector<16x384xf32> to vector<16x128xf32>
    %19 = vector.extract_strided_slice %17 {offsets = [0, 128], sizes = [16, 128], strides = [1, 1]} : vector<16x384xf32> to vector<16x128xf32>
    %20 = vector.extract_strided_slice %17 {offsets = [0, 256], sizes = [16, 128], strides = [1, 1]} : vector<16x384xf32> to vector<16x128xf32>
    %21 = vector.extract_strided_slice %18 {offsets = [0, 0], sizes = [16, 32], strides = [1, 1]} : vector<16x128xf32> to vector<16x32xf32>
    %22 = vector.extract_strided_slice %18 {offsets = [0, 32], sizes = [16, 32], strides = [1, 1]} : vector<16x128xf32> to vector<16x32xf32>
    %23 = vector.extract_strided_slice %18 {offsets = [0, 64], sizes = [16, 32], strides = [1, 1]} : vector<16x128xf32> to vector<16x32xf32>
    %24 = vector.extract_strided_slice %18 {offsets = [0, 96], sizes = [16, 32], strides = [1, 1]} : vector<16x128xf32> to vector<16x32xf32>
    %25 = tpu.concatenate %21, %22, %23, %24 in 0 : vector<16x32xf32>, vector<16x32xf32>, vector<16x32xf32>, vector<16x32xf32> -> vector<64x32xf32>
    %26 = vector.shape_cast %25 : vector<64x32xf32> to vector<8x8x32xf32>
    %27 = arith.truncf %26 : vector<8x8x32xf32> to vector<8x8x32xbf16>
    %28 = vector.extract_strided_slice %19 {offsets = [0, 0], sizes = [16, 32], strides = [1, 1]} : vector<16x128xf32> to vector<16x32xf32>
    %29 = vector.extract_strided_slice %19 {offsets = [0, 32], sizes = [16, 32], strides = [1, 1]} : vector<16x128xf32> to vector<16x32xf32>
    %30 = vector.extract_strided_slice %19 {offsets = [0, 64], sizes = [16, 32], strides = [1, 1]} : vector<16x128xf32> to vector<16x32xf32>
    %31 = vector.extract_strided_slice %19 {offsets = [0, 96], sizes = [16, 32], strides = [1, 1]} : vector<16x128xf32> to vector<16x32xf32>
    %32 = tpu.concatenate %28, %29, %30, %31 in 0 : vector<16x32xf32>, vector<16x32xf32>, vector<16x32xf32>, vector<16x32xf32> -> vector<64x32xf32>
    %33 = vector.shape_cast %32 : vector<64x32xf32> to vector<8x8x32xf32>
    %34 = arith.truncf %33 : vector<8x8x32xf32> to vector<8x8x32xbf16>
    %35 = vector.extract_strided_slice %20 {offsets = [0, 0], sizes = [16, 32], strides = [1, 1]} : vector<16x128xf32> to vector<16x32xf32>
    %36 = vector.extract_strided_slice %20 {offsets = [0, 32], sizes = [16, 32], strides = [1, 1]} : vector<16x128xf32> to vector<16x32xf32>
    %37 = vector.extract_strided_slice %20 {offsets = [0, 64], sizes = [16, 32], strides = [1, 1]} : vector<16x128xf32> to vector<16x32xf32>
    %38 = vector.extract_strided_slice %20 {offsets = [0, 96], sizes = [16, 32], strides = [1, 1]} : vector<16x128xf32> to vector<16x32xf32>
    %39 = tpu.concatenate %35, %36, %37, %38 in 0 : vector<16x32xf32>, vector<16x32xf32>, vector<16x32xf32>, vector<16x32xf32> -> vector<64x32xf32>
    %40 = vector.shape_cast %39 : vector<64x32xf32> to vector<8x8x32xf32>
    %41 = arith.truncf %40 : vector<8x8x32xf32> to vector<8x8x32xbf16>
    "tpu.trace_start"() <{level = 10 : i32, message = "bqd,bkd->bqk"}> : () -> ()
    %cst_17 = arith.constant dense<0.000000e+00> : vector<8x8x8xf32>
    %42 = tpu.matmul %27, %34, %cst_17 {dimension_numbers = #tpu.dot_dimension_numbers<[2], [2], [1], [1], [0, 0, 0, 1, 1, 1], [0], [0]>} : vector<8x8x32xbf16>, vector<8x8x32xbf16>, vector<8x8x8xf32> -> vector<8x8x8xf32>
    "tpu.trace_stop"() : () -> ()
    %cst_18 = arith.constant dense<0xFF800000> : vector<8x8xf32>
    %43 = vector.multi_reduction <maximumf>, %42, %cst_18 [2] : vector<8x8x8xf32> to vector<8x8xf32>
    %44 = vector.shape_cast %43 : vector<8x8xf32> to vector<8x8x1xf32>
    %45 = vector.broadcast %44 : vector<8x8x1xf32> to vector<8x8x8xf32>
    %46 = arith.subf %42, %45 : vector<8x8x8xf32>
    %47 = math.exp %46 : vector<8x8x8xf32>
    %cst_19 = arith.constant dense<0.000000e+00> : vector<8x8xf32>
    %48 = vector.multi_reduction <add>, %47, %cst_19 [2] : vector<8x8x8xf32> to vector<8x8xf32>
    %49 = vector.shape_cast %48 : vector<8x8xf32> to vector<8x8x1xf32>
    %50 = tpu.reciprocal %49 {approx = true} : vector<8x8x1xf32> -> vector<8x8x1xf32>
    %51 = vector.broadcast %50 : vector<8x8x1xf32> to vector<8x8x8xf32>
    %52 = arith.mulf %47, %51 : vector<8x8x8xf32>
    %53 = arith.truncf %52 : vector<8x8x8xf32> to vector<8x8x8xbf16>
    "tpu.trace_start"() <{level = 10 : i32, message = "bqk,bkd->bqd"}> : () -> ()
    %cst_20 = arith.constant dense<0.000000e+00> : vector<8x8x32xf32>
    %54 = tpu.matmul %53, %41, %cst_20 {dimension_numbers = #tpu.dot_dimension_numbers<[2], [1], [1], [2], [0, 0, 0, 1, 1, 2], [0], [0]>} : vector<8x8x8xbf16>, vector<8x8x32xbf16>, vector<8x8x32xf32> -> vector<8x8x32xf32>
    "tpu.trace_stop"() : () -> ()
    %55 = vector.shape_cast %54 : vector<8x8x32xf32> to vector<4x16x32xf32>
    %56 = vector.extract_strided_slice %55 {offsets = [0, 0, 0], sizes = [1, 16, 32], strides = [1, 1, 1]} : vector<4x16x32xf32> to vector<1x16x32xf32>
    %57 = vector.shape_cast %56 : vector<1x16x32xf32> to vector<16x32xf32>
    %58 = vector.extract_strided_slice %55 {offsets = [1, 0, 0], sizes = [1, 16, 32], strides = [1, 1, 1]} : vector<4x16x32xf32> to vector<1x16x32xf32>
    %59 = vector.shape_cast %58 : vector<1x16x32xf32> to vector<16x32xf32>
    %60 = vector.extract_strided_slice %55 {offsets = [2, 0, 0], sizes = [1, 16, 32], strides = [1, 1, 1]} : vector<4x16x32xf32> to vector<1x16x32xf32>
    %61 = vector.shape_cast %60 : vector<1x16x32xf32> to vector<16x32xf32>
    %62 = vector.extract_strided_slice %55 {offsets = [3, 0, 0], sizes = [1, 16, 32], strides = [1, 1, 1]} : vector<4x16x32xf32> to vector<1x16x32xf32>
    %63 = vector.shape_cast %62 : vector<1x16x32xf32> to vector<16x32xf32>
    %64 = tpu.concatenate %57, %59, %61, %63 in 1 : vector<16x32xf32>, vector<16x32xf32>, vector<16x32xf32>, vector<16x32xf32> -> vector<16x128xf32>
    %65 = arith.truncf %64 : vector<16x128xf32> to vector<16x128xbf16>
    %c0_21 = arith.constant 0 : index
    %c0_22 = arith.constant 0 : index
    %c0_23 = arith.constant 0 : index
    %66 = vector.load %arg6[%c0_21, %c0_22, %c0_23] : memref<1x128x128xbf16, #tpu.memory_space<vmem>>, vector<1x128x128xbf16>
    %67 = vector.shape_cast %66 : vector<1x128x128xbf16> to vector<128x128xbf16>
    %cst_24 = arith.constant dense<0.000000e+00> : vector<16x128xf32>
    %68 = tpu.matmul %65, %67, %cst_24 {dimension_numbers = #tpu.dot_dimension_numbers<[1], [0], [0], [1], [0, 0, 1, 1], [], []>} : vector<16x128xbf16>, vector<128x128xbf16>, vector<16x128xf32> -> vector<16x128xf32>
    %c0_25 = arith.constant 0 : index
    %c0_26 = arith.constant 0 : index
    %c0_27 = arith.constant 0 : index
    %69 = vector.load %arg7[%c0_25, %c0_26, %c0_27] : memref<1x1x128xf32, #tpu.memory_space<vmem>>, vector<1x1x128xf32>
    %70 = vector.shape_cast %69 : vector<1x1x128xf32> to vector<1x128xf32>
    %71 = vector.broadcast %70 : vector<1x128xf32> to vector<16x128xf32>
    %72 = arith.addf %68, %71 : vector<16x128xf32>
    %73 = arith.addf %3, %72 : vector<16x128xf32>
    %74 = vector.extract_strided_slice %7 {offsets = [0, 0], sizes = [1, 128], strides = [1, 1]} : vector<3x128xf32> to vector<1x128xf32>
    %75 = vector.extract_strided_slice %9 {offsets = [0, 0], sizes = [1, 128], strides = [1, 1]} : vector<3x128xf32> to vector<1x128xf32>
    %cst_28 = arith.constant dense<0.000000e+00> : vector<16xf32>
    %76 = vector.multi_reduction <add>, %73, %cst_28 [1] : vector<16x128xf32> to vector<16xf32>
    %77 = vector.shape_cast %76 : vector<16xf32> to vector<16x1xf32>
    %cst_29 = arith.constant 1.280000e+02 : f32
    %78 = vector.broadcast %cst_29 : f32 to vector<16x1xf32>
    %79 = arith.divf %77, %78 : vector<16x1xf32>
    %80 = vector.broadcast %79 : vector<16x1xf32> to vector<16x128xf32>
    %81 = arith.subf %73, %80 : vector<16x128xf32>
    %82 = arith.mulf %81, %81 : vector<16x128xf32>
    %cst_30 = arith.constant dense<0.000000e+00> : vector<16xf32>
    %83 = vector.multi_reduction <add>, %82, %cst_30 [1] : vector<16x128xf32> to vector<16xf32>
    %84 = vector.shape_cast %83 : vector<16xf32> to vector<16x1xf32>
    %cst_31 = arith.constant 1.280000e+02 : f32
    %85 = vector.broadcast %cst_31 : f32 to vector<16x1xf32>
    %86 = arith.divf %84, %85 : vector<16x1xf32>
    %87 = vector.broadcast %79 : vector<16x1xf32> to vector<16x128xf32>
    %88 = arith.subf %73, %87 : vector<16x128xf32>
    %cst_32 = arith.constant 9.99999974E-6 : f32
    %89 = vector.broadcast %cst_32 : f32 to vector<16x1xf32>
    %90 = arith.addf %86, %89 : vector<16x1xf32>
    %91 = math.rsqrt %90 : vector<16x1xf32>
    %92 = vector.broadcast %91 : vector<16x1xf32> to vector<16x128xf32>
    %93 = arith.mulf %88, %92 : vector<16x128xf32>
    %94 = vector.broadcast %74 : vector<1x128xf32> to vector<16x128xf32>
    %95 = arith.mulf %93, %94 : vector<16x128xf32>
    %96 = vector.broadcast %75 : vector<1x128xf32> to vector<16x128xf32>
    %97 = arith.addf %95, %96 : vector<16x128xf32>
    %98 = arith.truncf %97 : vector<16x128xf32> to vector<16x128xbf16>
    %c0_33 = arith.constant 0 : index
    %c0_34 = arith.constant 0 : index
    %c0_35 = arith.constant 0 : index
    %99 = vector.load %arg8[%c0_33, %c0_34, %c0_35] : memref<1x128x128xbf16, #tpu.memory_space<vmem>>, vector<1x128x128xbf16>
    %100 = vector.shape_cast %99 : vector<1x128x128xbf16> to vector<128x128xbf16>
    %cst_36 = arith.constant dense<0.000000e+00> : vector<16x128xf32>
    %101 = tpu.matmul %98, %100, %cst_36 {dimension_numbers = #tpu.dot_dimension_numbers<[1], [0], [0], [1], [0, 0, 1, 1], [], []>} : vector<16x128xbf16>, vector<128x128xbf16>, vector<16x128xf32> -> vector<16x128xf32>
    %c0_37 = arith.constant 0 : index
    %c0_38 = arith.constant 0 : index
    %c0_39 = arith.constant 0 : index
    %102 = vector.load %arg9[%c0_37, %c0_38, %c0_39] : memref<1x1x128xf32, #tpu.memory_space<vmem>>, vector<1x1x128xf32>
    %103 = vector.shape_cast %102 : vector<1x1x128xf32> to vector<1x128xf32>
    %104 = vector.broadcast %103 : vector<1x128xf32> to vector<16x128xf32>
    %105 = arith.addf %101, %104 : vector<16x128xf32>
    %c0_40 = arith.constant 0 : index
    %c0_41 = arith.constant 0 : index
    %c0_42 = arith.constant 0 : index
    %106 = vector.load %arg10[%c0_40, %c0_41, %c0_42] : memref<1x128x256xbf16, #tpu.memory_space<vmem>>, vector<1x128x256xbf16>
    %107 = vector.shape_cast %106 : vector<1x128x256xbf16> to vector<128x256xbf16>
    %cst_43 = arith.constant dense<0.000000e+00> : vector<16x256xf32>
    %108 = tpu.matmul %5, %107, %cst_43 {dimension_numbers = #tpu.dot_dimension_numbers<[1], [0], [0], [1], [0, 0, 1, 1], [], []>} : vector<16x128xbf16>, vector<128x256xbf16>, vector<16x256xf32> -> vector<16x256xf32>
    %c0_44 = arith.constant 0 : index
    %c0_45 = arith.constant 0 : index
    %c0_46 = arith.constant 0 : index
    %109 = vector.load %arg11[%c0_44, %c0_45, %c0_46] : memref<1x1x256xf32, #tpu.memory_space<vmem>>, vector<1x1x256xf32>
    %110 = vector.shape_cast %109 : vector<1x1x256xf32> to vector<1x256xf32>
    %111 = vector.broadcast %110 : vector<1x256xf32> to vector<16x256xf32>
    %112 = arith.addf %108, %111 : vector<16x256xf32>
    %113 = vector.extract_strided_slice %112 {offsets = [0, 0], sizes = [16, 128], strides = [1, 1]} : vector<16x256xf32> to vector<16x128xf32>
    %114 = vector.extract_strided_slice %112 {offsets = [0, 128], sizes = [16, 128], strides = [1, 1]} : vector<16x256xf32> to vector<16x128xf32>
    %115 = vector.extract_strided_slice %105 {offsets = [0, 0], sizes = [16, 32], strides = [1, 1]} : vector<16x128xf32> to vector<16x32xf32>
    %116 = vector.extract_strided_slice %105 {offsets = [0, 32], sizes = [16, 32], strides = [1, 1]} : vector<16x128xf32> to vector<16x32xf32>
    %117 = vector.extract_strided_slice %105 {offsets = [0, 64], sizes = [16, 32], strides = [1, 1]} : vector<16x128xf32> to vector<16x32xf32>
    %118 = vector.extract_strided_slice %105 {offsets = [0, 96], sizes = [16, 32], strides = [1, 1]} : vector<16x128xf32> to vector<16x32xf32>
    %119 = tpu.concatenate %115, %116, %117, %118 in 0 : vector<16x32xf32>, vector<16x32xf32>, vector<16x32xf32>, vector<16x32xf32> -> vector<64x32xf32>
    %120 = vector.shape_cast %119 : vector<64x32xf32> to vector<8x8x32xf32>
    %121 = arith.truncf %120 : vector<8x8x32xf32> to vector<8x8x32xbf16>
    %122 = vector.extract_strided_slice %113 {offsets = [0, 0], sizes = [16, 32], strides = [1, 1]} : vector<16x128xf32> to vector<16x32xf32>
    %123 = vector.extract_strided_slice %113 {offsets = [0, 32], sizes = [16, 32], strides = [1, 1]} : vector<16x128xf32> to vector<16x32xf32>
    %124 = vector.extract_strided_slice %113 {offsets = [0, 64], sizes = [16, 32], strides = [1, 1]} : vector<16x128xf32> to vector<16x32xf32>
    %125 = vector.extract_strided_slice %113 {offsets = [0, 96], sizes = [16, 32], strides = [1, 1]} : vector<16x128xf32> to vector<16x32xf32>
    %126 = tpu.concatenate %122, %123, %124, %125 in 0 : vector<16x32xf32>, vector<16x32xf32>, vector<16x32xf32>, vector<16x32xf32> -> vector<64x32xf32>
    %127 = vector.shape_cast %126 : vector<64x32xf32> to vector<8x8x32xf32>
    %128 = arith.truncf %127 : vector<8x8x32xf32> to vector<8x8x32xbf16>
    %129 = vector.extract_strided_slice %114 {offsets = [0, 0], sizes = [16, 32], strides = [1, 1]} : vector<16x128xf32> to vector<16x32xf32>
    %130 = vector.extract_strided_slice %114 {offsets = [0, 32], sizes = [16, 32], strides = [1, 1]} : vector<16x128xf32> to vector<16x32xf32>
    %131 = vector.extract_strided_slice %114 {offsets = [0, 64], sizes = [16, 32], strides = [1, 1]} : vector<16x128xf32> to vector<16x32xf32>
    %132 = vector.extract_strided_slice %114 {offsets = [0, 96], sizes = [16, 32], strides = [1, 1]} : vector<16x128xf32> to vector<16x32xf32>
    %133 = tpu.concatenate %129, %130, %131, %132 in 0 : vector<16x32xf32>, vector<16x32xf32>, vector<16x32xf32>, vector<16x32xf32> -> vector<64x32xf32>
    %134 = vector.shape_cast %133 : vector<64x32xf32> to vector<8x8x32xf32>
    %135 = arith.truncf %134 : vector<8x8x32xf32> to vector<8x8x32xbf16>
    "tpu.trace_start"() <{level = 10 : i32, message = "bqd,bkd->bqk"}> : () -> ()
    %cst_47 = arith.constant dense<0.000000e+00> : vector<8x8x8xf32>
    %136 = tpu.matmul %121, %128, %cst_47 {dimension_numbers = #tpu.dot_dimension_numbers<[2], [2], [1], [1], [0, 0, 0, 1, 1, 1], [0], [0]>} : vector<8x8x32xbf16>, vector<8x8x32xbf16>, vector<8x8x8xf32> -> vector<8x8x8xf32>
    "tpu.trace_stop"() : () -> ()
    %cst_48 = arith.constant dense<0xFF800000> : vector<8x8xf32>
    %137 = vector.multi_reduction <maximumf>, %136, %cst_48 [2] : vector<8x8x8xf32> to vector<8x8xf32>
    %138 = vector.shape_cast %137 : vector<8x8xf32> to vector<8x8x1xf32>
    %139 = vector.broadcast %138 : vector<8x8x1xf32> to vector<8x8x8xf32>
    %140 = arith.subf %136, %139 : vector<8x8x8xf32>
    %141 = math.exp %140 : vector<8x8x8xf32>
    %cst_49 = arith.constant dense<0.000000e+00> : vector<8x8xf32>
    %142 = vector.multi_reduction <add>, %141, %cst_49 [2] : vector<8x8x8xf32> to vector<8x8xf32>
    %143 = vector.shape_cast %142 : vector<8x8xf32> to vector<8x8x1xf32>
    %144 = tpu.reciprocal %143 {approx = true} : vector<8x8x1xf32> -> vector<8x8x1xf32>
    %145 = vector.broadcast %144 : vector<8x8x1xf32> to vector<8x8x8xf32>
    %146 = arith.mulf %141, %145 : vector<8x8x8xf32>
    %147 = arith.truncf %146 : vector<8x8x8xf32> to vector<8x8x8xbf16>
    "tpu.trace_start"() <{level = 10 : i32, message = "bqk,bkd->bqd"}> : () -> ()
    %cst_50 = arith.constant dense<0.000000e+00> : vector<8x8x32xf32>
    %148 = tpu.matmul %147, %135, %cst_50 {dimension_numbers = #tpu.dot_dimension_numbers<[2], [1], [1], [2], [0, 0, 0, 1, 1, 2], [0], [0]>} : vector<8x8x8xbf16>, vector<8x8x32xbf16>, vector<8x8x32xf32> -> vector<8x8x32xf32>
    "tpu.trace_stop"() : () -> ()
    %149 = vector.shape_cast %148 : vector<8x8x32xf32> to vector<4x16x32xf32>
    %150 = vector.extract_strided_slice %149 {offsets = [0, 0, 0], sizes = [1, 16, 32], strides = [1, 1, 1]} : vector<4x16x32xf32> to vector<1x16x32xf32>
    %151 = vector.shape_cast %150 : vector<1x16x32xf32> to vector<16x32xf32>
    %152 = vector.extract_strided_slice %149 {offsets = [1, 0, 0], sizes = [1, 16, 32], strides = [1, 1, 1]} : vector<4x16x32xf32> to vector<1x16x32xf32>
    %153 = vector.shape_cast %152 : vector<1x16x32xf32> to vector<16x32xf32>
    %154 = vector.extract_strided_slice %149 {offsets = [2, 0, 0], sizes = [1, 16, 32], strides = [1, 1, 1]} : vector<4x16x32xf32> to vector<1x16x32xf32>
    %155 = vector.shape_cast %154 : vector<1x16x32xf32> to vector<16x32xf32>
    %156 = vector.extract_strided_slice %149 {offsets = [3, 0, 0], sizes = [1, 16, 32], strides = [1, 1, 1]} : vector<4x16x32xf32> to vector<1x16x32xf32>
    %157 = vector.shape_cast %156 : vector<1x16x32xf32> to vector<16x32xf32>
    %158 = tpu.concatenate %151, %153, %155, %157 in 1 : vector<16x32xf32>, vector<16x32xf32>, vector<16x32xf32>, vector<16x32xf32> -> vector<16x128xf32>
    %159 = arith.truncf %158 : vector<16x128xf32> to vector<16x128xbf16>
    %c0_51 = arith.constant 0 : index
    %c0_52 = arith.constant 0 : index
    %c0_53 = arith.constant 0 : index
    %160 = vector.load %arg12[%c0_51, %c0_52, %c0_53] : memref<1x128x128xbf16, #tpu.memory_space<vmem>>, vector<1x128x128xbf16>
    %161 = vector.shape_cast %160 : vector<1x128x128xbf16> to vector<128x128xbf16>
    %cst_54 = arith.constant dense<0.000000e+00> : vector<16x128xf32>
    %162 = tpu.matmul %159, %161, %cst_54 {dimension_numbers = #tpu.dot_dimension_numbers<[1], [0], [0], [1], [0, 0, 1, 1], [], []>} : vector<16x128xbf16>, vector<128x128xbf16>, vector<16x128xf32> -> vector<16x128xf32>
    %c0_55 = arith.constant 0 : index
    %c0_56 = arith.constant 0 : index
    %c0_57 = arith.constant 0 : index
    %163 = vector.load %arg13[%c0_55, %c0_56, %c0_57] : memref<1x1x128xf32, #tpu.memory_space<vmem>>, vector<1x1x128xf32>
    %164 = vector.shape_cast %163 : vector<1x1x128xf32> to vector<1x128xf32>
    %165 = vector.broadcast %164 : vector<1x128xf32> to vector<16x128xf32>
    %166 = arith.addf %162, %165 : vector<16x128xf32>
    %167 = arith.addf %97, %166 : vector<16x128xf32>
    %168 = vector.extract_strided_slice %7 {offsets = [1, 0], sizes = [1, 128], strides = [1, 1]} : vector<3x128xf32> to vector<1x128xf32>
    %169 = vector.extract_strided_slice %9 {offsets = [1, 0], sizes = [1, 128], strides = [1, 1]} : vector<3x128xf32> to vector<1x128xf32>
    %cst_58 = arith.constant dense<0.000000e+00> : vector<16xf32>
    %170 = vector.multi_reduction <add>, %167, %cst_58 [1] : vector<16x128xf32> to vector<16xf32>
    %171 = vector.shape_cast %170 : vector<16xf32> to vector<16x1xf32>
    %cst_59 = arith.constant 1.280000e+02 : f32
    %172 = vector.broadcast %cst_59 : f32 to vector<16x1xf32>
    %173 = arith.divf %171, %172 : vector<16x1xf32>
    %174 = vector.broadcast %173 : vector<16x1xf32> to vector<16x128xf32>
    %175 = arith.subf %167, %174 : vector<16x128xf32>
    %176 = arith.mulf %175, %175 : vector<16x128xf32>
    %cst_60 = arith.constant dense<0.000000e+00> : vector<16xf32>
    %177 = vector.multi_reduction <add>, %176, %cst_60 [1] : vector<16x128xf32> to vector<16xf32>
    %178 = vector.shape_cast %177 : vector<16xf32> to vector<16x1xf32>
    %cst_61 = arith.constant 1.280000e+02 : f32
    %179 = vector.broadcast %cst_61 : f32 to vector<16x1xf32>
    %180 = arith.divf %178, %179 : vector<16x1xf32>
    %181 = vector.broadcast %173 : vector<16x1xf32> to vector<16x128xf32>
    %182 = arith.subf %167, %181 : vector<16x128xf32>
    %cst_62 = arith.constant 9.99999974E-6 : f32
    %183 = vector.broadcast %cst_62 : f32 to vector<16x1xf32>
    %184 = arith.addf %180, %183 : vector<16x1xf32>
    %185 = math.rsqrt %184 : vector<16x1xf32>
    %186 = vector.broadcast %185 : vector<16x1xf32> to vector<16x128xf32>
    %187 = arith.mulf %182, %186 : vector<16x128xf32>
    %188 = vector.broadcast %168 : vector<1x128xf32> to vector<16x128xf32>
    %189 = arith.mulf %187, %188 : vector<16x128xf32>
    %190 = vector.broadcast %169 : vector<1x128xf32> to vector<16x128xf32>
    %191 = arith.addf %189, %190 : vector<16x128xf32>
    %192 = arith.truncf %191 : vector<16x128xf32> to vector<16x128xbf16>
    %c0_63 = arith.constant 0 : index
    %c0_64 = arith.constant 0 : index
    %c0_65 = arith.constant 0 : index
    %193 = vector.load %arg16[%c0_63, %c0_64, %c0_65] : memref<1x128x256xbf16, #tpu.memory_space<vmem>>, vector<1x128x256xbf16>
    %194 = vector.shape_cast %193 : vector<1x128x256xbf16> to vector<128x256xbf16>
    %cst_66 = arith.constant dense<0.000000e+00> : vector<16x256xf32>
    %195 = tpu.matmul %192, %194, %cst_66 {dimension_numbers = #tpu.dot_dimension_numbers<[1], [0], [0], [1], [0, 0, 1, 1], [], []>} : vector<16x128xbf16>, vector<128x256xbf16>, vector<16x256xf32> -> vector<16x256xf32>
    %c0_67 = arith.constant 0 : index
    %c0_68 = arith.constant 0 : index
    %c0_69 = arith.constant 0 : index
    %196 = vector.load %arg17[%c0_67, %c0_68, %c0_69] : memref<1x1x256xf32, #tpu.memory_space<vmem>>, vector<1x1x256xf32>
    %197 = vector.shape_cast %196 : vector<1x1x256xf32> to vector<1x256xf32>
    %198 = vector.broadcast %197 : vector<1x256xf32> to vector<16x256xf32>
    %199 = arith.addf %195, %198 : vector<16x256xf32>
    %cst_70 = arith.constant 0.000000e+00 : f32
    %200 = vector.broadcast %cst_70 : f32 to vector<16x256xf32>
    %201 = arith.maximumf %199, %200 : vector<16x256xf32>
    %202 = arith.truncf %201 : vector<16x256xf32> to vector<16x256xbf16>
    %c0_71 = arith.constant 0 : index
    %c0_72 = arith.constant 0 : index
    %c0_73 = arith.constant 0 : index
    %203 = vector.load %arg18[%c0_71, %c0_72, %c0_73] : memref<1x256x128xbf16, #tpu.memory_space<vmem>>, vector<1x256x128xbf16>
    %204 = vector.shape_cast %203 : vector<1x256x128xbf16> to vector<256x128xbf16>
    %cst_74 = arith.constant dense<0.000000e+00> : vector<16x128xf32>
    %205 = tpu.matmul %202, %204, %cst_74 {dimension_numbers = #tpu.dot_dimension_numbers<[1], [0], [0], [1], [0, 0, 1, 1], [], []>} : vector<16x256xbf16>, vector<256x128xbf16>, vector<16x128xf32> -> vector<16x128xf32>
    %c0_75 = arith.constant 0 : index
    %c0_76 = arith.constant 0 : index
    %c0_77 = arith.constant 0 : index
    %206 = vector.load %arg19[%c0_75, %c0_76, %c0_77] : memref<1x1x128xf32, #tpu.memory_space<vmem>>, vector<1x1x128xf32>
    %207 = vector.shape_cast %206 : vector<1x1x128xf32> to vector<1x128xf32>
    %208 = vector.broadcast %207 : vector<1x128xf32> to vector<16x128xf32>
    %209 = arith.addf %205, %208 : vector<16x128xf32>
    %210 = arith.addf %191, %209 : vector<16x128xf32>
    %211 = vector.extract_strided_slice %7 {offsets = [2, 0], sizes = [1, 128], strides = [1, 1]} : vector<3x128xf32> to vector<1x128xf32>
    %212 = vector.extract_strided_slice %9 {offsets = [2, 0], sizes = [1, 128], strides = [1, 1]} : vector<3x128xf32> to vector<1x128xf32>
    %cst_78 = arith.constant dense<0.000000e+00> : vector<16xf32>
    %213 = vector.multi_reduction <add>, %210, %cst_78 [1] : vector<16x128xf32> to vector<16xf32>
    %214 = vector.shape_cast %213 : vector<16xf32> to vector<16x1xf32>
    %cst_79 = arith.constant 1.280000e+02 : f32
    %215 = vector.broadcast %cst_79 : f32 to vector<16x1xf32>
    %216 = arith.divf %214, %215 : vector<16x1xf32>
    %217 = vector.broadcast %216 : vector<16x1xf32> to vector<16x128xf32>
    %218 = arith.subf %210, %217 : vector<16x128xf32>
    %219 = arith.mulf %218, %218 : vector<16x128xf32>
    %cst_80 = arith.constant dense<0.000000e+00> : vector<16xf32>
    %220 = vector.multi_reduction <add>, %219, %cst_80 [1] : vector<16x128xf32> to vector<16xf32>
    %221 = vector.shape_cast %220 : vector<16xf32> to vector<16x1xf32>
    %cst_81 = arith.constant 1.280000e+02 : f32
    %222 = vector.broadcast %cst_81 : f32 to vector<16x1xf32>
    %223 = arith.divf %221, %222 : vector<16x1xf32>
    %224 = vector.broadcast %216 : vector<16x1xf32> to vector<16x128xf32>
    %225 = arith.subf %210, %224 : vector<16x128xf32>
    %cst_82 = arith.constant 9.99999974E-6 : f32
    %226 = vector.broadcast %cst_82 : f32 to vector<16x1xf32>
    %227 = arith.addf %223, %226 : vector<16x1xf32>
    %228 = math.rsqrt %227 : vector<16x1xf32>
    %229 = vector.broadcast %228 : vector<16x1xf32> to vector<16x128xf32>
    %230 = arith.mulf %225, %229 : vector<16x128xf32>
    %231 = vector.broadcast %211 : vector<1x128xf32> to vector<16x128xf32>
    %232 = arith.mulf %230, %231 : vector<16x128xf32>
    %233 = vector.broadcast %212 : vector<1x128xf32> to vector<16x128xf32>
    %234 = arith.addf %232, %233 : vector<16x128xf32>
    %c0_83 = arith.constant 0 : index
    %c0_84 = arith.constant 0 : index
    %235 = vector.load %arg21[%c0_83, %c0_84] : memref<16x128xf32, #tpu.memory_space<vmem>>, vector<16x128xf32>
    tpu.vector_store %arg21[%c0_83, %c0_84], %234 {strides = array<i32>} : memref<16x128xf32, #tpu.memory_space<vmem>>, vector<16x128xf32>,
    %c1_i32 = arith.constant 1 : i32
    %236 = arith.cmpi eq, %arg1, %c1_i32 : i32
    %237 = arith.extui %236 : i1 to i32
    %c0_i32_85 = arith.constant 0 : i32
    %238 = arith.cmpi ne, %237, %c0_i32_85 : i32
    scf.if %238 {
      %239 = vector.shape_cast %234 : vector<16x128xf32> to vector<2x8x128xf32>
      %c0_86 = arith.constant 0 : index
      %c0_87 = arith.constant 0 : index
      %c0_88 = arith.constant 0 : index
      %240 = vector.load %arg20[%c0_86, %c0_87, %c0_88] : memref<2x8x128xf32, #tpu.memory_space<vmem>>, vector<2x8x128xf32>
      tpu.vector_store %arg20[%c0_86, %c0_87, %c0_88], %239 {strides = array<i32>} : memref<2x8x128xf32, #tpu.memory_space<vmem>>, vector<2x8x128xf32>,
    } else {
    }
    return
  }
  func.func @transform_0(%arg0: i32, %arg1: i32) -> (i32, i32, i32) {
    %c0_i32 = arith.constant 0 : i32
    %c0_i32_0 = arith.constant 0 : i32
    %c0_i32_1 = arith.constant 0 : i32
    return %arg0, %c0_i32, %c0_i32_0 : i32, i32, i32
  }
  func.func @transform_1(%arg0: i32, %arg1: i32) -> (i32, i32, i32) {
    %c0_i32 = arith.constant 0 : i32
    %c0_i32_0 = arith.constant 0 : i32
    %c0_i32_1 = arith.constant 0 : i32
    return %arg0, %c0_i32, %c0_i32_0 : i32, i32, i32
  }
  func.func @transform_2(%arg0: i32, %arg1: i32) -> (i32, i32, i32) {
    %c0_i32 = arith.constant 0 : i32
    %c0_i32_0 = arith.constant 0 : i32
    %c0_i32_1 = arith.constant 0 : i32
    return %arg1, %c0_i32, %c0_i32_0 : i32, i32, i32
  }
  func.func @transform_3(%arg0: i32, %arg1: i32) -> (i32, i32, i32) {
    %c0_i32 = arith.constant 0 : i32
    %c0_i32_0 = arith.constant 0 : i32
    %c0_i32_1 = arith.constant 0 : i32
    return %arg1, %c0_i32, %c0_i32_0 : i32, i32, i32
  }
  func.func @transform_4(%arg0: i32, %arg1: i32) -> (i32, i32, i32) {
    %c0_i32 = arith.constant 0 : i32
    %c0_i32_0 = arith.constant 0 : i32
    %c0_i32_1 = arith.constant 0 : i32
    return %arg1, %c0_i32, %c0_i32_0 : i32, i32, i32
  }
  func.func @transform_5(%arg0: i32, %arg1: i32) -> (i32, i32, i32) {
    %c0_i32 = arith.constant 0 : i32
    %c0_i32_0 = arith.constant 0 : i32
    %c0_i32_1 = arith.constant 0 : i32
    return %arg1, %c0_i32, %c0_i32_0 : i32, i32, i32
  }
  func.func @transform_6(%arg0: i32, %arg1: i32) -> (i32, i32, i32) {
    %c0_i32 = arith.constant 0 : i32
    %c0_i32_0 = arith.constant 0 : i32
    %c0_i32_1 = arith.constant 0 : i32
    return %arg1, %c0_i32, %c0_i32_0 : i32, i32, i32
  }
  func.func @transform_7(%arg0: i32, %arg1: i32) -> (i32, i32, i32) {
    %c0_i32 = arith.constant 0 : i32
    %c0_i32_0 = arith.constant 0 : i32
    %c0_i32_1 = arith.constant 0 : i32
    return %arg1, %c0_i32, %c0_i32_0 : i32, i32, i32
  }
  func.func @transform_8(%arg0: i32, %arg1: i32) -> (i32, i32, i32) {
    %c0_i32 = arith.constant 0 : i32
    %c0_i32_0 = arith.constant 0 : i32
    %c0_i32_1 = arith.constant 0 : i32
    return %arg1, %c0_i32, %c0_i32_0 : i32, i32, i32
  }
  func.func @transform_9(%arg0: i32, %arg1: i32) -> (i32, i32, i32) {
    %c0_i32 = arith.constant 0 : i32
    %c0_i32_0 = arith.constant 0 : i32
    %c0_i32_1 = arith.constant 0 : i32
    return %arg1, %c0_i32, %c0_i32_0 : i32, i32, i32
  }
  func.func @transform_10(%arg0: i32, %arg1: i32) -> (i32, i32, i32) {
    %c0_i32 = arith.constant 0 : i32
    %c0_i32_0 = arith.constant 0 : i32
    %c0_i32_1 = arith.constant 0 : i32
    return %arg1, %c0_i32, %c0_i32_0 : i32, i32, i32
  }
  func.func @transform_11(%arg0: i32, %arg1: i32) -> (i32, i32, i32) {
    %c0_i32 = arith.constant 0 : i32
    %c0_i32_0 = arith.constant 0 : i32
    %c0_i32_1 = arith.constant 0 : i32
    return %arg1, %c0_i32, %c0_i32_0 : i32, i32, i32
  }
  func.func @transform_12(%arg0: i32, %arg1: i32) -> (i32, i32, i32) {
    %c0_i32 = arith.constant 0 : i32
    %c0_i32_0 = arith.constant 0 : i32
    %c0_i32_1 = arith.constant 0 : i32
    return %arg1, %c0_i32, %c0_i32_0 : i32, i32, i32
  }
  func.func @transform_13(%arg0: i32, %arg1: i32) -> (i32, i32, i32) {
    %c0_i32 = arith.constant 0 : i32
    %c0_i32_0 = arith.constant 0 : i32
    %c0_i32_1 = arith.constant 0 : i32
    return %arg1, %c0_i32, %c0_i32_0 : i32, i32, i32
  }
  func.func @transform_14(%arg0: i32, %arg1: i32) -> (i32, i32, i32) {
    %c0_i32 = arith.constant 0 : i32
    %c0_i32_0 = arith.constant 0 : i32
    %c0_i32_1 = arith.constant 0 : i32
    return %arg1, %c0_i32, %c0_i32_0 : i32, i32, i32
  }
  func.func @transform_15(%arg0: i32, %arg1: i32) -> (i32, i32, i32) {
    %c0_i32 = arith.constant 0 : i32
    %c0_i32_0 = arith.constant 0 : i32
    %c0_i32_1 = arith.constant 0 : i32
    return %arg1, %c0_i32, %c0_i32_0 : i32, i32, i32
  }
  func.func @transform_16(%arg0: i32, %arg1: i32) -> (i32, i32, i32) {
    %c0_i32 = arith.constant 0 : i32
    %c0_i32_0 = arith.constant 0 : i32
    %c0_i32_1 = arith.constant 0 : i32
    return %arg1, %c0_i32, %c0_i32_0 : i32, i32, i32
  }
  func.func @transform_17(%arg0: i32, %arg1: i32) -> (i32, i32, i32) {
    %c0_i32 = arith.constant 0 : i32
    %c0_i32_0 = arith.constant 0 : i32
    %c0_i32_1 = arith.constant 0 : i32
    return %arg1, %c0_i32, %c0_i32_0 : i32, i32, i32
  }
  func.func @transform_18(%arg0: i32, %arg1: i32) -> (i32, i32, i32) {
    %c0_i32 = arith.constant 0 : i32
    %c0_i32_0 = arith.constant 0 : i32
    %c0_i32_1 = arith.constant 0 : i32
    return %arg0, %c0_i32, %c0_i32_0 : i32, i32, i32
  }
}

</mosaic_0001>

<bundles_post_ra>
// kernel: tpu_custom_call.1
= control target key start
LH: loop header
LB: loop body
LE: loop exit
PB: predicated region body
PF: predicated region fallthrough
CT: control target
= control target key end

     0   :  { %s6855_s0 = inlined_call_operand.vmem [shape: bf16[2,8,128], index: 0, kind: input, shape index: {}]   ;;  %s6856_s1 = inlined_call_operand.vmem [shape: bf16[2,8,128], index: 1, kind: input, shape index: {}]   ;;  %s6857_s2 = inlined_call_operand.hbm [shape: bf16[2,128,384], index: 2, kind: input, shape index: {}]   ;;  %s6858_s3 = inlined_call_operand.vmem [shape: f32[2,1,384], index: 3, kind: input, shape index: {}]   ;;  %s6859_s4 = inlined_call_operand.hbm [shape: bf16[2,128,128], index: 4, kind: input, shape index: {}]   ;;  %s6860_s5 = inlined_call_operand.hbm [shape: f32[2,1,128], index: 5, kind: input, shape index: {}]   ;;  %s6861_s6 = inlined_call_operand.hbm [shape: bf16[2,128,128], index: 6, kind: input, shape index: {}]   ;;  %s6862_s7 = inlined_call_operand.hbm [shape: f32[2,1,128], index: 7, kind: input, shape index: {}]   ;;  %s6863_s8 = inlined_call_operand.hbm [shape: bf16[2,128,256], index: 8, kind: input, shape index: {}]   ;;  %s6864_s9 = inlined_call_operand.vmem [shape: f32[2,1,256], index: 9, kind: input, shape index: {}]   ;;  %s6865_s10 = inlined_call_operand.hbm [shape: bf16[2,128,128], index: 10, kind: input, shape index: {}]   ;;  %s6866_s11 = inlined_call_operand.vmem [shape: f32[2,1,128], index: 11, kind: input, shape index: {}]   ;;  %s6867_s12 = inlined_call_operand.vmem [shape: f32[2,3,128], index: 12, kind: input, shape index: {}]   ;;  %s6868_s13 = inlined_call_operand.vmem [shape: f32[2,3,128], index: 13, kind: input, shape index: {}]   ;;  %s6869_s14 = inlined_call_operand.hbm [shape: bf16[2,128,256], index: 14, kind: input, shape index: {}]   ;;  %s6870_s15 = inlined_call_operand.vmem [shape: f32[2,1,256], index: 15, kind: input, shape index: {}]   ;;  %s6871_s16 = inlined_call_operand.hbm [shape: bf16[2,256,128], index: 16, kind: input, shape index: {}]   ;;  %s6872_s17 = inlined_call_operand.vmem [shape: f32[2,1,128], index: 17, kind: input, shape index: {}]   ;;  %s6873_s18 = inlined_call_operand.hbm [shape: f32[2,8,128], index: 18, kind: output, shape index: {}]  }
   0x1   :  { %6893 = sst [smem:[#allocation36_spill]] %s6855_s0 }
   0x2   :  { %6894 = sst [smem:[#allocation37_spill]] %s6856_s1 }
   0x3   :  { %6895 = sst [smem:[#allocation38_spill]] %s6857_s2 }
   0x4   :  { %6896 = sst [smem:[#allocation39_spill]] %s6858_s3 }
   0x5   :  { %6897 = sst [smem:[#allocation40_spill]] %s6859_s4 }
   0x6   :  { %6898 = sst [smem:[#allocation41_spill]] %s6860_s5 }
   0x7   :  { %6899 = sst [smem:[#allocation42_spill]] %s6861_s6 }
   0x8   :  { %6900 = sst [smem:[#allocation43_spill]] %s6862_s7 }
   0x9   :  { %6901 = sst [smem:[#allocation44_spill]] %s6863_s8 }
   0xa   :  { %6902 = sst [smem:[#allocation45_spill]] %s6864_s9 }
   0xb   :  { %6903 = sst [smem:[#allocation46_spill]] %s6865_s10 }
   0xc   :  { %6904 = sst [smem:[#allocation47_spill]] %s6866_s11 }
   0xd   :  { %6905 = sst [smem:[#allocation48_spill]] %s6867_s12 }
   0xe   :  { %6906 = sst [smem:[#allocation49_spill]] %s6868_s13 }
   0xf   :  { %6907 = sst [smem:[#allocation50_spill]] %s6869_s14 }
  0x10   :  { %6908 = sst [smem:[#allocation51_spill]] %s6870_s15 }
  0x11   :  { %6909 = sst [smem:[#allocation52_spill]] %s6871_s16 }
  0x12   :  { %6910 = sst [smem:[#allocation53_spill]] %s6872_s17 }
  0x13   :  { %6911 = sst [smem:[#allocation54_spill]] %s6873_s18 }
  0x14   :  { %23 = vsyncpa [#allocation4], 0 }
  0x15   :  { %25 = vsyncpa [#allocation4 + $0x1], 0 }
  0x16   :  { %26 = vsyncpa [#allocation7], 0 }
  0x17   :  { %28 = vsyncpa [#allocation7 + $0x1], 0 }
  0x18   :  { %29 = vsyncpa [#allocation10], 0 }
  0x19   :  { %31 = vsyncpa [#allocation10 + $0x1], 0 }
  0x1a   :  { %32 = vsyncpa [#allocation13], 0 }
  0x1b   :  { %34 = vsyncpa [#allocation13 + $0x1], 0 }
  0x1c   :  { %35 = vsyncpa [#allocation16], 0 }
  0x1d   :  { %37 = vsyncpa [#allocation16 + $0x1], 0 }
  0x1e   :  { %38 = vsyncpa [#allocation5], 0  ;;  %s6001_s27 = smov 0   ;;  %s6003_s28 = smov 0  }
  0x1f   :  { %s6005_s29 = smov 0   ;;  %s6007_s30 = smov 0  }
  0x20   :  { %s6009_s0 = smov 0   ;;  %s6011_s19 = smov 0  }
  0x21 LB: > { %6912 = sst [smem:[#allocation25_spill]] %s5864_s28  ;;  %s6030_s1 = sadd.s32 4294967295, %s5880_s19   ;;  %s5880_s19 = sphi %s6011_s19, %s44_s19   ;;  %s5876_s0 = sphi %s6009_s0, %s6968_s0   ;;  %s5872_s30 = sphi %s6007_s30, %s6967_s30   ;;  %s5868_s29 = sphi %s6005_s29, %s6966_s29   ;;  %s5864_s28 = sphi %s6003_s28, %s6965_s28   ;;  %s5860_s27 = sphi %s6001_s27, %s6964_s27  }
  0x22   : > { %6913 = sst [smem:[#allocation26_spill]] %s5868_s29  ;;  %s53_s20 = sadd.s32 1, %s5876_s0 }
  0x23   : > { %6914 = sst [smem:[#allocation27_spill]] %s5872_s30  ;;  %p54_p0 = scmp.ge.s32.totalorder %s53_s20, 2 }
  0x24   : > { %6915 = sst [smem:[#allocation28_spill]] %s5876_s0  ;;  %s115_s21 = sadd.s32 1, %s5868_s29 }
  0x25   : > { %6916 = sst [smem:[#allocation29_spill]] %s5880_s19  ;;  %p122_p1 = scmp.ne.s32.totalorder %s5868_s29, %s5864_s28 }
  0x26   : > { %6917 = sst [smem:[#allocation30_spill]] %s6030_s1  ;;  %p123_p2 = scmp.eq.s32.totalorder %s5880_s19, 0 }
  0x27   : > { %s6970_s20 = smov (%p54_p0, %s53_s20), 0  ;;  %p128_p4 = scmp.ne.s32.totalorder %s5864_s28, %s5860_s27 }
  0x28   : > { %6918 = sst [smem:[#allocation31_spill]] %s6970_s20  ;;  %p124_p3 = por %p123_p2, %p122_p1 }
  0x29   : > { %s112_s22 = ssub.s32 %s5876_s0, %s6970_s20  ;;  %p129_p5 = scmp.eq.s32.totalorder %s6030_s1, 0 }
  0x2a   : > { %p113_p6 = scmp.eq.s32.totalorder %s112_s22, 0  ;;  %p5157_p8 = scmp.lt.s32.totalorder %s5880_s19, 2 }
  0x2b   : > { %p6043_p7 = por %p129_p5, %p128_p4  ;;  %s6052_s24 = sand.u32 1, %s5868_s29  }
  0x2c   : > { %s6049_s23 = scalar_select %p113_p6, %s5868_s29, %s115_s21  }
  0x2d   : > { %s6919_s2 = scalar_select %p6043_p7, 1, 0 }
  0x2e   : > { %6921 = sst [smem:[#allocation33_spill]] %s6049_s23  ;;  %p6054_p9 = pnand %p5157_p8, %p124_p3 }
  0x2f   : > { %6920 = sst [smem:[#allocation32_spill]] %s6919_s2  ;;  %s6059_s26 = sand.u32 1, %s5880_s19  }
  0x30   : > { %s6062_s27 = sshll.u32 %s6052_s24, 6  ;;  %s6065_s22 = sshll.u32 %s5876_s0, 10 }
  0x31   : > { %s6923_s4 = sld [smem:[#allocation40_spill]]  ;;  %s618_s29 = scalar_lea.vmem [#allocation6], %s6062_s27 }
  0x32   : > { %s625_s18 = sshll.u32 %s618_s29, 4  ;;  %p4549_p10 = scmp.ge.s32.totalorder %s5880_s19, 1  ;;  %s626_s18 = int_to_ptr.vmem [resolvable:$true] %s625_s18 }
  0x33   : > { %s6877_s17 = scalar_lea.sflag [#allocation7], %s6059_s26  ;;  %p6076_p11 = pneg %p6054_p9 }
  0x34   : > { %s5547_s13 = scalar_lea.vmem %s626_s18, 1024  ;;  %s5882_s12 = smov [#allocation6]  }
  0x35   : > { %p5548_p12 = scmp.ne.s32.totalorder %s626_s18, %s5547_s13  ;;  %s5552_s3 = sshll.u32 %s5882_s12, 4  ;;  %s5553_s3 = int_to_ptr.vmem [resolvable:$false] %s5552_s3 }
  0x36   : > { %s5554_s20 = scalar_lea.vmem %s5553_s3, 2048  ;;  %p5555_p1 = scmp.lt.s32.totalorder %s626_s18, %s5553_s3 }
  0x37   : > { %s624_s23 = scalar_lea.hbm %s6923_s4, %s6065_s22  ;;  %p5550_p13 = pnand %p5548_p12, %p6076_p11 }
  0x38   : > { %p5556_p2 = scmp.lt.s32.totalorder %s5554_s20, %s5547_s13 }
  0x39   : > { %p5551_p0 = pneg %p5550_p13 }
  0x3a   : > { %p5557_p3 = por %p5556_p2, %p5555_p1 }
  0x3c   : > { %p5558_p4 = pnand %p5557_p3, %p5551_p0 }
  0x3e   : > { %5561 = shalt.err (!%p5558_p4)
}
  0x3f   : > { %s6879_s29 = smov 64   ;;  %s6881_s21 = smov 4  }
  0x40   : > { %5135 = dma.hbm_to_vmem [thread:$0]  (!%p6054_p9), %s624_s23, 1024, %s626_s18, %s6877_s17, %s6879_s29, %s6879_s29, %s6881_s21  }
  0x41   : > { %p812_p5 = scmp.lt.s32.totalorder %s5880_s19, 3  ;;  %s6925_s6 = sld [smem:[#allocation42_spill]] }
  0x42   : > { %s656_s4 = scalar_lea.vmem [#allocation9], %s6062_s27  ;;  %s6883_s9 = scalar_lea.sflag [#allocation10], %s6059_s26 }
  0x43   : > { %p6096_p6 = pnand %p4549_p10, %p812_p5  ;;  %s663_s11 = sshll.u32 %s656_s4, 4  ;;  %s664_s11 = int_to_ptr.vmem [resolvable:$true] %s663_s11 }
  0x44   : > { %s5575_s30 = scalar_lea.vmem %s664_s11, 1024  ;;  %s5885_s18 = smov [#allocation9]  }
  0x45   : > { %s6926_s20 = scalar_select %p6096_p6, 1, 0 }
  0x46   : > { %p5576_p8 = scmp.ne.s32.totalorder %s664_s11, %s5575_s30  ;;  %s5580_s23 = sshll.u32 %s5885_s18, 4  ;;  %s5581_s23 = int_to_ptr.vmem [resolvable:$false] %s5580_s23 }
  0x47   : > { %s662_s13 = scalar_lea.hbm %s6925_s6, %s6065_s22  ;;  %6927 = sst [smem:[#allocation34_spill]] %s6926_s20 }
  0x48   : > { %p5578_p12 = pnand %p5576_p8, %p6076_p11  ;;  %s5582_s17 = scalar_lea.vmem %s5581_s23, 2048 }
  0x49   : > { %p5583_p0 = scmp.lt.s32.totalorder %s664_s11, %s5581_s23  ;;  %p5584_p1 = scmp.lt.s32.totalorder %s5582_s17, %s5575_s30 }
  0x4a   : > { %p5579_p13 = pneg %p5578_p12 }
  0x4b   : > { %p5585_p2 = por %p5584_p1, %p5583_p0 }
  0x4d   : > { %p5586_p10 = pnand %p5585_p2, %p5579_p13 }
  0x4f   : > { %5589 = shalt.err (!%p5586_p10)
}
  0x50   : > { %5141 = dma.hbm_to_vmem [thread:$0]  (!%p6054_p9), %s662_s13, 1024, %s664_s11, %s6883_s9, %s6879_s29, %s6879_s29, %s6881_s21  }
  0x51   : > { %s6112_s4 = sshll.u32 %s6052_s24, 7  ;;  %s6115_s3 = sshll.u32 %s5876_s0, 11 }
  0x52   : > { %s6928_s8 = sld [smem:[#allocation44_spill]]  ;;  %s694_s18 = scalar_lea.vmem [#allocation12], %s6112_s4 }
  0x53   : > { %s701_s23 = sshll.u32 %s694_s18, 4  ;;  %s6888_s6 = scalar_lea.sflag [#allocation13], %s6059_s26  ;;  %s702_s23 = int_to_ptr.vmem [resolvable:$true] %s701_s23 }
  0x54   : > { %s5603_s19 = scalar_lea.vmem %s702_s23, 2048  ;;  %s5886_s11 = smov [#allocation12]  }
  0x55   : > { %p5604_p3 = scmp.ne.s32.totalorder %s702_s23, %s5603_s19  ;;  %s5608_s13 = sshll.u32 %s5886_s11, 4  ;;  %s5609_s13 = int_to_ptr.vmem [resolvable:$false] %s5608_s13 }
  0x56   : > { %s5610_s29 = scalar_lea.vmem %s5609_s13, 4096  ;;  %p5611_p8 = scmp.lt.s32.totalorder %s702_s23, %s5609_s13 }
  0x57   : > { %p5606_p4 = pnand %p5604_p3, %p6076_p11  ;;  %p5612_p12 = scmp.lt.s32.totalorder %s5610_s29, %s5603_s19 }
  0x58   : > { %s700_s12 = scalar_lea.hbm %s6928_s8, %s6115_s3 }
  0x59   : > { %p5607_p5 = pneg %p5606_p4  ;;  %p5613_p13 = por %p5612_p12, %p5611_p8 }
  0x5b   : > { %p5614_p0 = pnand %p5613_p13, %p5607_p5 }
  0x5d   : > { %5617 = shalt.err (!%p5614_p0)
}
  0x5e   : > { %s5887_s17 = smov 128   ;;  %s5888_s30 = smov 8  }
  0x5f   : > { %5147 = dma.hbm_to_vmem [thread:$0]  (!%p6054_p9), %s700_s12, 2048, %s702_s23, %s6888_s6, %s5887_s17, %s5887_s17, %s5888_s30  }
  0x60   : > { %s6929_s14 = sld [smem:[#allocation50_spill]]  ;;  %s763_s13 = scalar_lea.vmem [#allocation15], %s6112_s4 }
  0x61   : > { %s770_s19 = sshll.u32 %s763_s13, 4  ;;  %s760_s29 = scalar_lea.sflag [#allocation16], %s6059_s26  ;;  %s771_s19 = int_to_ptr.vmem [resolvable:$true] %s770_s19 }
  0x62   : > { %s5631_s9 = scalar_lea.vmem %s771_s19, 2048  ;;  %s5889_s8 = smov [#allocation15]  }
  0x63   : > { %p5632_p1 = scmp.ne.s32.totalorder %s771_s19, %s5631_s9  ;;  %s5636_s1 = sshll.u32 %s5889_s8, 4  ;;  %s5637_s1 = int_to_ptr.vmem [resolvable:$false] %s5636_s1 }
  0x64   : > { %s5638_s2 = scalar_lea.vmem %s5637_s1, 4096  ;;  %p5639_p3 = scmp.lt.s32.totalorder %s771_s19, %s5637_s1 }
  0x65   : > { %p5634_p2 = pnand %p5632_p1, %p6076_p11  ;;  %p5640_p4 = scmp.lt.s32.totalorder %s5638_s2, %s5631_s9 }
  0x66   : > { %s769_s21 = scalar_lea.hbm %s6929_s14, %s6115_s3 }
  0x67   : > { %p5635_p10 = pneg %p5634_p2  ;;  %p5641_p5 = por %p5640_p4, %p5639_p3 }
  0x69   : > { %p5642_p8 = pnand %p5641_p5, %p5635_p10 }
  0x6b   : > { %5645 = shalt.err (!%p5642_p8)
}
  0x6c   : > { %5153 = dma.hbm_to_vmem [thread:$0]  (!%p6054_p9), %s769_s21, 2048, %s771_s19, %s760_s29, %s5887_s17, %s5887_s17, %s5888_s30  }
  0x6d   : > { %s5103_s12 = smul.u32 192, %s6052_s24  ;;  %s6930_s11 = sld [smem:[#allocation38_spill]] }
  0x6e   : > { %s5104_s23 = smul.u32 3072, %s5876_s0  ;;  %s4532_s13 = sshll.u32 %s5876_s0, 4 }
  0x6f   : > { %s590_s9 = scalar_lea.vmem [#allocation3], %s5103_s12  ;;  %s587_s6 = scalar_lea.sflag [#allocation4], %s6052_s24 }
  0x70   : > { %s597_s2 = sshll.u32 %s590_s9, 4  ;;  %s5890_s28 = smov [#allocation3]   ;;  %s598_s2 = int_to_ptr.vmem [resolvable:$true] %s597_s2 }
  0x71   : > { %s5659_s14 = scalar_lea.vmem %s598_s2, 3072  ;;  %s5664_s20 = sshll.u32 %s5890_s28, 4  ;;  %s5665_s20 = int_to_ptr.vmem [resolvable:$false] %s5664_s20 }
  0x72   : > { %p5660_p12 = scmp.ne.s32.totalorder %s598_s2, %s5659_s14  ;;  %s5666_s21 = scalar_lea.vmem %s5665_s20, 6144 }
  0x73   : > { %s596_s1 = scalar_lea.hbm %s6930_s11, %s5104_s23  ;;  %p5667_p1 = scmp.lt.s32.totalorder %s598_s2, %s5665_s20 }
  0x74   : > { %p5662_p13 = pnand %p5660_p12, %p6076_p11  ;;  %p5668_p2 = scmp.lt.s32.totalorder %s5666_s21, %s5659_s14 }
  0x76   : > { %p5663_p0 = pneg %p5662_p13  ;;  %p5669_p10 = por %p5668_p2, %p5667_p1 }
  0x78   : > { %p5670_p3 = pnand %p5669_p10, %p5663_p0 }
  0x7a   : > { %5673 = shalt.err (!%p5670_p3)
}
  0x7b   : > { %s5891_s17 = smov 192   ;;  %s5892_s30 = smov 12  }
  0x7c   : > { %5132 = dma.hbm_to_vmem [thread:$0]  (!%p6054_p9), %s596_s1, 3072, %s598_s2, %s587_s6, %s5891_s17, %s5891_s17, %s5892_s30  }
  0x7d   : > { %s6931_s5 = sld [smem:[#allocation41_spill]]  ;;  %s638_s23 = scalar_lea.vmem [#allocation8], %s6052_s24 }
  0x7e   : > { %s645_s8 = sshll.u32 %s638_s23, 4  ;;  %s5893_s20 = smov [#allocation8]   ;;  %s646_s8 = int_to_ptr.vmem [resolvable:$true] %s645_s8 }
  0x7f   : > { %s5687_s14 = scalar_lea.vmem %s646_s8, 16  ;;  %s5692_s18 = sshll.u32 %s5893_s20, 4  ;;  %s5693_s18 = int_to_ptr.vmem [resolvable:$false] %s5692_s18 }
  0x80   : > { %p5688_p4 = scmp.ne.s32.totalorder %s646_s8, %s5687_s14  ;;  %s5694_s11 = scalar_lea.vmem %s5693_s18, 32 }
  0x81   : > { %p5695_p12 = scmp.lt.s32.totalorder %s646_s8, %s5693_s18  ;;  %p5696_p13 = scmp.lt.s32.totalorder %s5694_s11, %s5687_s14 }
  0x82   : > { %p5690_p5 = pnand %p5688_p4, %p6076_p11 }
  0x83   : > { %s643_s28 = scalar_lea.hbm %s6931_s5, %s4532_s13  ;;  %p5697_p0 = por %p5696_p13, %p5695_p12 }
  0x84   : > { %p5691_p8 = pneg %p5690_p5 }
  0x86   : > { %p5698_p1 = pnand %p5697_p0, %p5691_p8 }
  0x88   : > { %5701 = shalt.err (!%p5698_p1)
}
  0x89   : > { %s6932_s6 = scalar_lea.sflag [#allocation7], %s6059_s26  ;;  %s6933_s7 = sld [smem:[#allocation43_spill]] }
  0x8a   : > { %5138 = dma.hbm_to_vmem [thread:$0]  (!%p6054_p9), %s643_s28, 16, %s646_s8, %s6932_s6  }
  0x8b   : > { %s676_s21 = scalar_lea.vmem [#allocation11], %s6052_s24  ;;  %s5894_s19 = smov [#allocation11]  }
  0x8c   : > { %s683_s17 = sshll.u32 %s676_s21, 4  ;;  %s5720_s12 = sshll.u32 %s5894_s19, 4  ;;  %s684_s17 = int_to_ptr.vmem [resolvable:$true] %s683_s17  ;;  %s5721_s12 = int_to_ptr.vmem [resolvable:$false] %s5720_s12 }
  0x8d   : > { %s5715_s30 = scalar_lea.vmem %s684_s17, 16  ;;  %s5722_s23 = scalar_lea.vmem %s5721_s12, 32 }
  0x8e   : > { %p5716_p2 = scmp.ne.s32.totalorder %s684_s17, %s5715_s30  ;;  %p5723_p4 = scmp.lt.s32.totalorder %s684_s17, %s5721_s12 }
  0x8f   : > { %s681_s2 = scalar_lea.hbm %s6933_s7, %s4532_s13  ;;  %p5724_p5 = scmp.lt.s32.totalorder %s5722_s23, %s5715_s30 }
  0x90   : > { %p5718_p10 = pnand %p5716_p2, %p6076_p11 }
  0x91   : > { %p5725_p8 = por %p5724_p5, %p5723_p4 }
  0x92   : > { %p5719_p3 = pneg %p5718_p10 }
  0x94   : > { %p5726_p12 = pnand %p5725_p8, %p5719_p3 }
  0x96   : > { %5729 = shalt.err (!%p5726_p12)
}
  0x97   : > { %s6934_s24 = scalar_lea.sflag [#allocation10], %s6059_s26  ;;  %s6935_s10 = sld [smem:[#allocation46_spill]] }
  0x98   : > { %5144 = dma.hbm_to_vmem [thread:$0]  (!%p6054_p9), %s681_s2, 16, %s684_s17, %s6934_s24  }
  0x99   : > { %s722_s14 = scalar_lea.vmem [#allocation14], %s6062_s27  ;;  %s5895_s11 = smov [#allocation14]  }
  0x9a   : > { %s729_s20 = sshll.u32 %s722_s14, 4  ;;  %s5748_s6 = sshll.u32 %s5895_s11, 4  ;;  %s730_s20 = int_to_ptr.vmem [resolvable:$true] %s729_s20  ;;  %s5749_s6 = int_to_ptr.vmem [resolvable:$false] %s5748_s6 }
  0x9b   : > { %s5743_s18 = scalar_lea.vmem %s730_s20, 1024  ;;  %s5750_s1 = scalar_lea.vmem %s5749_s6, 2048 }
  0x9c   : > { %p5744_p13 = scmp.ne.s32.totalorder %s730_s20, %s5743_s18  ;;  %p5751_p2 = scmp.lt.s32.totalorder %s730_s20, %s5749_s6 }
  0x9d   : > { %s728_s8 = scalar_lea.hbm %s6935_s10, %s6065_s22  ;;  %p5752_p10 = scmp.lt.s32.totalorder %s5750_s1, %s5743_s18 }
  0x9e   : > { %p5746_p0 = pnand %p5744_p13, %p6076_p11 }
  0x9f   : > { %p5753_p3 = por %p5752_p10, %p5751_p2 }
  0xa0   : > { %p5747_p1 = pneg %p5746_p0 }
  0xa2   : > { %p5754_p4 = pnand %p5753_p3, %p5747_p1 }
  0xa4   : > { %5757 = shalt.err (!%p5754_p4)
}
  0xa5   : > { %s6936_s22 = smov 4   ;;  %s6937_s27 = smov 64  }
  0xa6   : > { %s6938_s9 = scalar_lea.sflag [#allocation13], %s6059_s26  ;;  %s6939_s16 = sld [smem:[#allocation52_spill]] }
  0xa7   : > { %5150 = dma.hbm_to_vmem [thread:$0]  (!%p6054_p9), %s728_s8, 1024, %s730_s20, %s6938_s9, %s6937_s27, %s6937_s27, %s6936_s22  }
  0xa8   : > { %s791_s30 = scalar_lea.vmem [#allocation17], %s6112_s4  ;;  %s5896_s23 = smov [#allocation17]  }
  0xa9   : > { %s798_s19 = sshll.u32 %s791_s30, 4  ;;  %s5776_s24 = sshll.u32 %s5896_s23, 4  ;;  %s799_s19 = int_to_ptr.vmem [resolvable:$true] %s798_s19  ;;  %s5777_s24 = int_to_ptr.vmem [resolvable:$false] %s5776_s24 }
  0xaa   : > { %s5771_s12 = scalar_lea.vmem %s799_s19, 2048  ;;  %s5778_s13 = scalar_lea.vmem %s5777_s24, 4096 }
  0xab   : > { %p5772_p5 = scmp.ne.s32.totalorder %s799_s19, %s5771_s12  ;;  %p5779_p13 = scmp.lt.s32.totalorder %s799_s19, %s5777_s24 }
  0xac   : > { %s797_s17 = scalar_lea.hbm %s6939_s16, %s6115_s3  ;;  %p5780_p0 = scmp.lt.s32.totalorder %s5778_s13, %s5771_s12 }
  0xad   : > { %p5774_p8 = pnand %p5772_p5, %p6076_p11 }
  0xae   : > { %p5781_p1 = por %p5780_p0, %p5779_p13 }
  0xaf   : > { %p5775_p12 = pneg %p5774_p8 }
  0xb1   : > { %p5782_p2 = pnand %p5781_p1, %p5775_p12 }
  0xb3   : > { %5785 = shalt.err (!%p5782_p2)
}
  0xb4   : > { %5156 = dma.hbm_to_vmem [thread:$0]  (!%p6054_p9), %s797_s17, 2048, %s799_s19, %s760_s29, %s6937_s27, %s6937_s27, %s6936_s22  }
  0xb5   : > { %816 = sbr.rel (%p6096_p6) target bundleno = 4413 (0x113d), region = 92 }
  0xba   : > { %s6941_s4 = sld [smem:[#allocation25_spill]] }
  0xc0   : > { %s6207_s28 = sand.u32 1, %s6941_s4  }
  0xc1   : > { %s5105_s8 = smul.u32 192, %s6207_s28  ;;  %s819_s14 = scalar_lea.sflag [#allocation4], %s6207_s28 }
  0xc3   : > { %s6211_s20 = scalar_lea.vmem [#allocation3], %s5105_s8 }
  0xc4   : > { %5835 = dma.done.wait (%p6043_p7), %s819_s14, 3072  }
  0xc5   : > { %5837 = vsyncadd (%p6043_p7), %s819_s14, 4294964224  ;;  %s6943_s25 = sld [smem:[#allocation30_spill]]  ;;  %s4550_s29 = sshll.u32 %s6207_s28, 6 }
  0xc6   : > { %s6219_s11 = scalar_lea.vmem [#allocation6], %s4550_s29 }
  0xcb   : > { %s827_s26 = sand.u32 1, %s6943_s25  }
  0xcc   : > { %s828_s18 = scalar_lea.sflag [#allocation7], %s827_s26 }
  0xcd   : > { %5839 = dma.done.wait (%p6043_p7), %s828_s18, 1040  }
  0xce   : > { %5841 = vsyncadd (%p6043_p7), %s828_s18, 4294966256  ;;  %s845_s1 = scalar_lea.sflag [#allocation10], %s827_s26  ;;  %s6226_s22 = scalar_lea.vmem [#allocation9], %s4550_s29 }
  0xcf   : > { %5843 = dma.done.wait (%p6043_p7), %s845_s1, 1040  }
  0xd0   : > { %5845 = vsyncadd (%p6043_p7), %s845_s1, 4294966256  ;;  %s4552_s27 = sshll.u32 %s6207_s28, 7  ;;  %s862_s2 = scalar_lea.sflag [#allocation13], %s827_s26 }
  0xd1   : > { %s6234_s21 = scalar_lea.vmem [#allocation12], %s4552_s27 }
  0xd2   : > { %5847 = dma.done.wait (%p6043_p7), %s862_s2, 3072  }
  0xd3   : > { %5849 = vsyncadd (%p6043_p7), %s862_s2, 4294964224  ;;  %s6240_s17 = scalar_lea.vmem [#allocation14], %s4550_s29  ;;  %s880_s30 = scalar_lea.sflag [#allocation16], %s827_s26 }
  0xd4   : > { %s6242_s19 = scalar_lea.vmem [#allocation15], %s4552_s27 }
  0xd5   : > { %6944 = sst [smem:[#allocation35_spill]] %s6242_s19 }
  0xd6   : > { %5851 = dma.done.wait (%p6043_p7), %s880_s30, 4096  }
  0xd7   : > { %5853 = vsyncadd (%p6043_p7), %s880_s30, 4294963200  ;;  %s6945_s12 = sld [smem:[#allocation27_spill]] }
  0xd8   : > { %s6946_s8 = sld [smem:[#allocation45_spill]] }
  0xd9   : > { %s6947_s26 = sld [smem:[#allocation47_spill]] }
  0xda   : > { %s6948_s2 = sld [smem:[#allocation39_spill]] }
  0xdb   : > { %s6949_s7 = sld [smem:[#allocation48_spill]] }
  0xdc   : > { %s6950_s15 = sld [smem:[#allocation49_spill]] }
  0xdd   : > { %p1026_p9 = scmp.lt.s32.totalorder %s6945_s12, 1  ;;  %s6951_s25 = sld [smem:[#allocation51_spill]] }
  0xde   : > { %p4560_p7 = scmp.ne.s32.totalorder %s6945_s12, 0 }
  0xdf   : > { %s6250_s23 = scalar_select %p1026_p9, %s6945_s12, 1 }
  0xe0   : > { %s6953_s6 = sld [smem:[#allocation36_spill]] (!%p4560_p7) }
  0xe1   : > { %s5106_s24 = smul.u32 3, %s6250_s23  ;;  %s4556_s13 = sshll.u32 %s6250_s23, 1 }
  0xe2   : > { %s6257_s14 = scalar_lea.vmem %s6946_s8, %s4556_s13  ;;  %s1036_s29 = scalar_lea.vmem %s6947_s26, %s6250_s23 }
  0xe3   : > { %s6266_s30 = scalar_lea.vmem %s6948_s2, %s5106_s24  ;;  %s4557_s9 = sshll.u32 %s6250_s23, 2 }
  0xe4   : > { %s6272_s10 = scalar_lea.vmem %s6949_s7, %s4557_s9  ;;  %s6277_s4 = scalar_lea.vmem %s6950_s15, %s4557_s9 }
  0xe5   : > { %s6282_s3 = scalar_lea.vmem %s6951_s25, %s4556_s13  ;;  %s6952_s24 = sld [smem:[#allocation53_spill]] }
  0xe6   : > { %s6288_s2 = scalar_lea.vmem [#allocation17], %s4552_s27 }
  0xe7   : > { %1057 = sbr.rel (%p4560_p7) target bundleno = 240 (0xf0), region = 132 }
  0xeb   : > { %s1051_s1 = scalar_lea.vmem %s6952_s24, %s6250_s23 }
  0xec   : > { %v4706_v0 = vld [vmem:[%s6953_s6] sm:$0xff]  }
  0xed   : > { %v4707_v1 = vunpack.c.l.bf16 %v4706_v0  ;;  %v4708_v2 = vunpack.c.h.bf16 %v4706_v0 }
  0xef   : > { %1062 = vst [vmem:[#allocation2] sm:$0xff] %v4707_v1  ;;  %1063 = vst [vmem:[#allocation2 + $0x8] sm:$0xff] %v4708_v2 }
  0xf0 PF: > { %v5333_v3 = vld [vmem:[%s6211_s20 + $0xac] ss:$12 sps:$4 sm:$0xff]   ;;  %v5335_v4 = vld [vmem:[%s6211_s20 + $0xa8] ss:$12 sps:$4 sm:$0xff]   ;;  %v5897_v5 = vmov 0   ;;  %v5898_v6 = vmov 0.0   ;;  %v1105_v32 = vlaneseq }
  0xf1   : > { %1280 = vmatprep.mubr.bf16.mxu0 %v5897_v5  ;;  %4831 = vmatprep.subr.bf16.mxu1 %v5898_v6  ;;  %v5336_v7 = vld [vmem:[%s6211_s20 + $0x94] ss:$12 sps:$4 sm:$0xff]   ;;  %v5338_v8 = vld [vmem:[%s6211_s20 + $0x90] ss:$12 sps:$4 sm:$0xff]   ;;  %v5341_v10 = vld [vmem:[%s6211_s20 + $0x78] ss:$12 sps:$4 sm:$0xff]  }
  0xf2   : > { %1248 = vmatprep.subr.bf16.mxu0 %v5333_v3  ;;  %v5339_v9 = vld [vmem:[%s6211_s20 + $0x7c] ss:$12 sps:$4 sm:$0xff]   ;;  %v5342_v11 = vld [vmem:[%s6211_s20 + $0x64] ss:$12 sps:$4 sm:$0xff]   ;;  %v5344_v12 = vld [vmem:[%s6211_s20 + $0x60] ss:$12 sps:$4 sm:$0xff]  }
  0xf3   : > { %1249 = vmatpush1.bf16.msra.mxu0 %v5335_v4  ;;  %v5345_v13 = vld [vmem:[%s6211_s20 + $0x4c] ss:$12 sps:$4 sm:$0xff]   ;;  %v5357_v14 = vld [vmem:[%s6211_s20 + $0xb0] ss:$12 sps:$4 sm:$0xff]   ;;  %v5347_v16 = vld [vmem:[%s6211_s20 + $0x48] ss:$12 sps:$4 sm:$0xff]  }
  0xf4   : > { %1250 = vmatprep.subr.bf16.mxu0 %v5336_v7  ;;  %4832 = vmatpush3.bf16.msra.mxu1 %v5357_v14  ;;  %v5358_v15 = vld [vmem:[%s6211_s20 + $0x98] ss:$12 sps:$4 sm:$0xff]   ;;  %v5348_v17 = vld [vmem:[%s6211_s20 + $0x34] ss:$12 sps:$4 sm:$0xff]   ;;  %v5350_v18 = vld [vmem:[%s6211_s20 + $0x30] ss:$12 sps:$4 sm:$0xff]  }
  0xf5   : > { %4833 = vmatprep.subr.bf16.mxu1 %v5898_v6  ;;  %v5359_v19 = vld [vmem:[%s6211_s20 + $0x80] ss:$12 sps:$4 sm:$0xff]   ;;  %v5351_v20 = vld [vmem:[%s6211_s20 + $0x1c] ss:$12 sps:$4 sm:$0xff]   ;;  %v5353_v22 = vld [vmem:[%s6211_s20 + $0x18] ss:$12 sps:$4 sm:$0xff]  }
  0xf6   : > { %v5360_v21 = vld [vmem:[%s6211_s20 + $0x68] ss:$12 sps:$4 sm:$0xff]   ;;  %v5354_v23 = vld [vmem:[%s6211_s20 + $0x4] ss:$12 sps:$4 sm:$0xff]   ;;  %v5356_v25 = vld [vmem:[%s6211_s20] ss:$12 sps:$4 sm:$0xff]  }
  0xf7   : > { %1251 = vmatpush1.bf16.msra.mxu0 %v5338_v8  ;;  %v5361_v24 = vld [vmem:[%s6211_s20 + $0x50] ss:$12 sps:$4 sm:$0xff]   ;;  %v5362_v28 = vld [vmem:[%s6211_s20 + $0x38] ss:$12 sps:$4 sm:$0xff]   ;;  %v5363_v30 = vld [vmem:[%s6211_s20 + $0x20] ss:$12 sps:$4 sm:$0xff]  }
  0xf8   : > { %1252 = vmatprep.subr.bf16.mxu0 %v5339_v9  ;;  %4834 = vmatpush3.bf16.msra.mxu1 %v5358_v15  ;;  %v1064_v26 = vld [vmem:[#allocation2] sm:$0xff]  ;;  %v1065_v27 = vld [vmem:[#allocation2 + $0x8] sm:$0xff]  ;;  %vm5899_vm0 = vmmov 0   ;;  %v6335_v33 = vshrl.u32 %v1105_v32, 7  ;;  %vm1416_vm1 = vcmask 261120   ;;  %s5900_s16 = smov 96  }
  0xf9   : > { %4835 = vmatprep.subr.bf16.mxu1 %v5898_v6  ;;  %v1070_v29 = vpack.c.bf16 %v1065_v27, %v1064_v26  ;;  %v5364_v31 = vld [vmem:[%s6211_s20 + $0x8] ss:$12 sps:$4 sm:$0xff]   ;;  %4847 = vmatprep.mubr.msk.bf16.mxu1 %vm5899_vm0, %v5898_v6  ;;  %v6341_v35 = vld [vmem:[%s6266_s30] sm:$0x7]  ;;  %s5901_s0 = smov 64   ;;  %s5902_s20 = smov 32  }
  0xfa   : > { %v6338_v34 = vsub.s32 1, %v6335_v33  ;;  %v6344_v36 = vsub.s32 0, %v6335_v33  ;;  %v6375_v15 = vsub.s32 2, %v6335_v33  ;;  %vm1885_vm2 = vcmask 1043456   ;;  %s6955_s19 = sld [smem:[#allocation37_spill]] }
  0xfb   : > { %1253 = vmatpush1.bf16.msra.mxu0 %v5341_v10  ;;  %vm1785_vm3 = vcmask 64512   ;;  %vm2277_vm4 = vcmask 523264   ;;  %vm2280_vm5 = vcmask 785408   ;;  %s6960_s23 = sld [smem:[#allocation27_spill]] }
  0xfc   : > { %1254 = vmatprep.subr.bf16.mxu0 %v5342_v11  ;;  %4836 = vmatpush3.bf16.msra.mxu1 %v5359_v19  ;;  %v1112_v37 = vrot.slane %v6341_v35, %v6338_v34  ;;  %v1108_v40 = vrot.slane %v6341_v35, %v6344_v36  ;;  %v1116_v19 = vrot.slane %v6341_v35, %v6375_v15 }
  0xfd   : > { %4837 = vmatprep.subr.bf16.mxu1 %v5898_v6 }
  0xff   : > { %1255 = vmatpush1.bf16.msra.mxu0 %v5344_v12 }
 0x100   : > { %1256 = vmatprep.subr.bf16.mxu0 %v5345_v13  ;;  %4838 = vmatpush3.bf16.msra.mxu1 %v5360_v21 }
 0x101   : > { %4839 = vmatprep.subr.bf16.mxu1 %v5898_v6  ;;  %p4694_p11 = scmp.ne.s32.totalorder %s6960_s23, 1 }
 0x103   : > { %1257 = vmatpush1.bf16.msra.mxu0 %v5347_v16 }
 0x104   : > { %1258 = vmatprep.subr.bf16.mxu0 %v5348_v17  ;;  %4840 = vmatpush3.bf16.msra.mxu1 %v5361_v24 }
 0x105   : > { %4841 = vmatprep.subr.bf16.mxu1 %v5898_v6 }
 0x107   : > { %1259 = vmatpush1.bf16.msra.mxu0 %v5350_v18 }
 0x108   : > { %1260 = vmatprep.subr.bf16.mxu0 %v5351_v20  ;;  %4842 = vmatpush3.bf16.msra.mxu1 %v5362_v28 }
 0x109   : > { %4843 = vmatprep.subr.bf16.mxu1 %v5898_v6 }
 0x10b   : > { %1261 = vmatpush1.bf16.msra.mxu0 %v5353_v22 }
 0x10c   : > { %1262 = vmatprep.subr.bf16.mxu0 %v5354_v23  ;;  %4844 = vmatpush3.bf16.msra.mxu1 %v5363_v30 }
 0x10d   : > { %4845 = vmatprep.subr.bf16.mxu1 %v5898_v6 }
 0x10f   : > { %1263 = vmatpush1.bf16.msra.mxu0 %v5356_v25 }
 0x110   : > { %4875 = vmatprep.subr.bf16.mxu0 %v5898_v6  ;;  %4846 = vmatpush3.bf16.msra.mxu1 %v5364_v31 }
 0x111   : > { %4851 = vmatprep.subr.bf16.mxu1 %v5898_v6 }
 0x112   : > { %1281 = vmatmul.mubr.bf16.vlgmr.msra.gmra.mxu0 %v1070_v29 }
 0x113   : > { %4877 = vmatprep.mubr.msk.bf16.mxu0 %vm5899_vm0, %v5898_v6  ;;  %4848 = vmatmul.mubr.bf16.vlgmr.msra.gmra.mxu1 %v1070_v29 }
 0x114   : > { %4853 = vmatprep.mubr.msk.bf16.mxu1 %vm5899_vm0, %v5898_v6 }
 0x1d2   : > { %v1282_v38 = vpop.f32.mrf.mxu0 }
 0x1d3   : > { %v1283_v46 = vadd.f32 %v1282_v38, %v1108_v40  ;;  %v1325_v56 = vpop.f32.mrf.mxu1 }
 0x1d4   : > { %v1284_v39 = vpop.f32.mrf.mxu0  ;;  %v6383_v26 = vadd.f32 %v1325_v56, %v1116_v19 }
 0x1d5   : > { %v1285_v41 = vadd.f32 %v1284_v39, %v1112_v37  ;;  %v1352_v53 = vpack.c.bf16 %v1283_v46, %v1283_v46  ;;  %v4849_v57 = vpop.f32.mrf.mxu1 }
 0x1d6   : > { %v1286_v42 = vpop.f32.mrf.mxu0  ;;  %v1408_v31 = vpack.c.bf16 %v6383_v26, %v6383_v26 }
 0x1d7   : > { %v1287_v43 = vadd.f32 %v1286_v42, %v1108_v40  ;;  %1362 = vrot.lane.b32.xlu0 %v1285_v41, %s5900_s16  ;;  %v1380_v44 = vpack.c.bf16 %v1285_v41, %v1285_v41  ;;  %v1328_v58 = vpop.f32.mrf.mxu1 }
 0x1d8   : > { %v1288_v45 = vpop.f32.mrf.mxu0  ;;  %v6395_v33 = vadd.f32 %v1328_v58, %v1116_v19  ;;  %v1887_v38 = vsel %vm1885_vm2, %v1408_v31, 0 }
 0x1d9   : > { %v1289_v47 = vadd.f32 %v1288_v45, %v1112_v37  ;;  %1336 = vrot.lane.b32.xlu1 %v1287_v43, %s5900_s16  ;;  %v1421_v48 = vsel %vm1416_vm1, %v1380_v44, 0  ;;  %v5233_v52 = vpack.i.bf16 %v1287_v43, %v1283_v46  ;;  %v1353_v55 = vpack.c.bf16 %v1287_v43, %v1287_v43  ;;  %v4850_v59 = vpop.f32.mrf.mxu1 }
 0x1da   : > { %4852 = vmatpush3.bf16.xpose.msra.mxu1 %v1421_v48  ;;  %v1409_v40 = vpack.c.bf16 %v6395_v33, %v6395_v33 }
 0x1db   : > { %v5228_v49 = vpack.i.bf16 %v1289_v47, %v1285_v41  ;;  %v5223_v50 = vpack.i.bf16 %v1289_v47, %v1283_v46  ;;  %4857 = vmatprep.subr.bf16.mxu1 %v5898_v6  ;;  %v1381_v51 = vpack.c.bf16 %v1289_v47, %v1289_v47 }
 0x1dc   : > { %v1933_v42 = vsel %vm1885_vm2, %v1409_v40, 0 }
 0x1dd   : > { %5229 = vrot.lane.b32.xlu1 %v5228_v49, %s5901_s0  ;;  %5224 = vrot.lane.b32.xlu0 %v5223_v50, %s5900_s16  ;;  %v1467_v54 = vsel %vm1416_vm1, %v1381_v51, 0 }
 0x1e1   : > { %5239 = vrot.lane.b32.xlu1 %v5228_v49, %s5902_s20  ;;  %5234 = vrot.lane.b32.xlu0 %v5233_v52, %s5901_s0 }
 0x1e2   : > { %4854 = vmatmul.mubr.msk.bf16.vlgmr.msra.gmra.mxu1 %vm1416_vm1, %v1352_v53 }
 0x1e3   : > { %4858 = vmatpush3.bf16.xpose.msra.mxu1 %v1467_v54  ;;  %4859 = vmatprep.mubr.msk.bf16.mxu1 %vm5899_vm0, %v5898_v6 }
 0x1e4   : > { %4863 = vmatprep.subr.bf16.mxu1 %v5898_v6 }
 0x1e5   : > { %5244 = vrot.lane.b32.xlu0 %v5233_v52, %s5902_s20 }
 0x1ea   : > { %4860 = vmatmul.mubr.msk.bf16.vlgmr.msra.gmra.mxu1 %vm1416_vm1, %v1353_v55 }
 0x1eb   : > { %4865 = vmatprep.mubr.msk.bf16.mxu1 %vm5899_vm0, %v5898_v6 }
 0x249   : > { %v1363_v60 = vpop.permute.xlu0 %1362 }
 0x24a   : > { %v1382_v61 = vpack.c.bf16 %v1363_v60, %v1363_v60 }
 0x24b   : > { %v1337_v62 = vpop.permute.xlu1 %1336 }
 0x24c   : > { %v1513_v63 = vsel %vm1416_vm1, %v1382_v61, 0  ;;  %v1355_v21 = vpack.c.bf16 %v1337_v62, %v1337_v62 }
 0x24d   : > { %4864 = vmatpush3.bf16.xpose.msra.mxu1 %v1513_v63 }
 0x24e   : > { %4869 = vmatprep.subr.bf16.mxu1 %v5898_v6 }
 0x24f   : > { %v5230_v0 = vpop.permute.xlu1 %5229  ;;  %v5225_v1 = vpop.permute.xlu0 %5224 }
 0x250   : > { %v5231_v2 = vunpack.i.l.bf16 %v5230_v0  ;;  %v5227_v3 = vunpack.i.h.bf16 %v5225_v1  ;;  %v5226_v4 = vunpack.i.l.bf16 %v5225_v1  ;;  %v5232_v11 = vunpack.i.h.bf16 %v5230_v0 }
 0x252   : > { %v1384_v7 = vpack.c.bf16 %v5231_v2, %v5231_v2  ;;  %v1383_v8 = vpack.c.bf16 %v5227_v3, %v5227_v3  ;;  %v1354_v9 = vpack.c.bf16 %v5226_v4, %v5226_v4  ;;  %v1385_v18 = vpack.c.bf16 %v5232_v11, %v5232_v11 }
 0x253   : > { %v5240_v10 = vpop.permute.xlu1 %5239  ;;  %v5235_v12 = vpop.permute.xlu0 %5234 }
 0x254   : > { %4866 = vmatmul.mubr.msk.bf16.vlgmr.msra.gmra.mxu1 %vm1416_vm1, %v1354_v9  ;;  %v1559_v13 = vsel %vm1416_vm1, %v1383_v8, 0  ;;  %v1605_v14 = vsel %vm1416_vm1, %v1384_v7, 0  ;;  %v5241_v16 = vunpack.i.l.bf16 %v5240_v10  ;;  %v5236_v17 = vunpack.i.l.bf16 %v5235_v12 }
 0x255   : > { %4871 = vmatprep.mubr.msk.bf16.mxu1 %vm5899_vm0, %v5898_v6  ;;  %4870 = vmatpush3.bf16.xpose.msra.mxu1 %v1559_v13  ;;  %v5242_v23 = vunpack.i.h.bf16 %v5240_v10  ;;  %v1651_v25 = vsel %vm1416_vm1, %v1385_v18, 0  ;;  %v5237_v28 = vunpack.i.h.bf16 %v5235_v12 }
 0x256   : > { %4876 = vmatpush3.bf16.xpose.msra.mxu0 %v1605_v14  ;;  %4881 = vmatprep.subr.bf16.mxu1 %v5898_v6  ;;  %v1386_v20 = vpack.c.bf16 %v5241_v16, %v5241_v16  ;;  %v1356_v22 = vpack.c.bf16 %v5236_v17, %v5236_v17 }
 0x257   : > { %4887 = vmatprep.subr.bf16.mxu0 %v5898_v6  ;;  %v5245_v24 = vpop.permute.xlu0 %5244  ;;  %v1387_v30 = vpack.c.bf16 %v5242_v23, %v5242_v23  ;;  %v1357_v32 = vpack.c.bf16 %v5237_v28, %v5237_v28 }
 0x258   : > { %v1697_v27 = vsel %vm1416_vm1, %v1386_v20, 0  ;;  %v5246_v29 = vunpack.i.l.bf16 %v5245_v24  ;;  %v5247_v39 = vunpack.i.h.bf16 %v5245_v24 }
 0x259   : > { %v1743_v37 = vsel %vm1416_vm1, %v1387_v30, 0 }
 0x25a   : > { %v1358_v35 = vpack.c.bf16 %v5246_v29, %v5246_v29  ;;  %v1359_v41 = vpack.c.bf16 %v5247_v39, %v5247_v39 }
 0x25c   : > { %4872 = vmatmul.mubr.msk.bf16.vlgmr.msra.gmra.mxu1 %vm1416_vm1, %v1355_v21 }
 0x25d   : > { %4878 = vmatmul.mubr.msk.bf16.vlgmr.msra.gmra.mxu0 %vm1416_vm1, %v1356_v22  ;;  %4882 = vmatpush3.bf16.xpose.msra.mxu1 %v1651_v25 }
 0x25e   : > { %4888 = vmatpush3.bf16.xpose.msra.mxu0 %v1697_v27  ;;  %4883 = vmatprep.mubr.msk.bf16.mxu1 %vm5899_vm0, %v5898_v6 }
 0x25f   : > { %4889 = vmatprep.mubr.msk.bf16.mxu0 %vm5899_vm0, %v5898_v6  ;;  %4893 = vmatprep.subr.bf16.mxu1 %v5898_v6 }
 0x260   : > { %4899 = vmatprep.subr.bf16.mxu0 %v5898_v6 }
 0x264   : > { %4884 = vmatmul.mubr.msk.bf16.vlgmr.msra.gmra.mxu1 %vm1416_vm1, %v1357_v32 }
 0x265   : > { %4890 = vmatmul.mubr.msk.bf16.vlgmr.msra.gmra.mxu0 %vm1416_vm1, %v1358_v35  ;;  %4894 = vmatpush3.bf16.xpose.msra.mxu1 %v1743_v37 }
 0x266   : > { %4895 = vmatprep.mubr.msk.bf16.mxu1 %vm5899_vm0, %v5898_v6  ;;  %4905 = vmatprep.subr.bf16.mxu1 %v5898_v6 }
 0x267   : > { %4900 = vmatpush3.bf16.msra.mxu0 %v1887_v38  ;;  %4901 = vmatprep.mubr.msk.bf16.mxu0 %vm5899_vm0, %v5898_v6 }
 0x268   : > { %4911 = vmatprep.subr.bf16.mxu0 %v5898_v6 }
 0x26c   : > { %4896 = vmatmul.mubr.msk.bf16.vlgmr.msra.gmra.mxu1 %vm1416_vm1, %v1359_v41 }
 0x26d   : > { %4906 = vmatpush3.bf16.msra.mxu1 %v1933_v42  ;;  %4907 = vmatprep.mubr.msk.bf16.mxu1 %vm5899_vm0, %v5898_v6 }
 0x26e   : > { %4917 = vmatprep.subr.bf16.mxu1 %v5898_v6 }
 0x2a2   : > { %v1457_v43 = vpop.f32.mrf.mxu1 }
 0x2a3   : > { %v1786_v44 = vsel %vm1785_vm3, %v1457_v43, -inf }
 0x2a4   : > { %1787 = vmax.xlane.f32.xlu1 %v1786_v44  ;;  %v4855_v45 = vpop.f32.mrf.mxu1 }
 0x2a6   : > { %v1460_v46 = vpop.f32.mrf.mxu1 }
 0x2a8   : > { %v4856_v47 = vpop.f32.mrf.mxu1 }
 0x2aa   : > { %v1503_v48 = vpop.f32.mrf.mxu1 }
 0x2ab   : > { %v1789_v49 = vsel %vm1785_vm3, %v1503_v48, -inf }
 0x2ac   : > { %1790 = vmax.xlane.f32.xlu0 %v1789_v49  ;;  %v4861_v50 = vpop.f32.mrf.mxu1 }
 0x2ae   : > { %v1506_v51 = vpop.f32.mrf.mxu1 }
 0x2b0   : > { %v4862_v52 = vpop.f32.mrf.mxu1 }
 0x314   : > { %v1549_v53 = vpop.f32.mrf.mxu1 }
 0x315   : > { %v1792_v54 = vsel %vm1785_vm3, %v1549_v53, -inf }
 0x316   : > { %1793 = vmax.xlane.f32.xlu0 %v1792_v54  ;;  %v4867_v55 = vpop.f32.mrf.mxu1 }
 0x318   : > { %v1552_v56 = vpop.f32.mrf.mxu1 }
 0x31a   : > { %v4868_v57 = vpop.f32.mrf.mxu1 }
 0x31c   : > { %v1595_v58 = vpop.f32.mrf.mxu1 }
 0x31d   : > { %v1641_v59 = vpop.f32.mrf.mxu0  ;;  %v1795_v60 = vsel %vm1785_vm3, %v1595_v58, -inf }
 0x31e   : > { %v1798_v61 = vsel %vm1785_vm3, %v1641_v59, -inf  ;;  %1796 = vmax.xlane.f32.xlu1 %v1795_v60  ;;  %v4873_v62 = vpop.f32.mrf.mxu1 }
 0x31f   : > { %v4879_v63 = vpop.f32.mrf.mxu0  ;;  %1799 = vmax.xlane.f32.xlu0 %v1798_v61 }
 0x320   : > { %v1598_v0 = vpop.f32.mrf.mxu1 }
 0x321   : > { %v1644_v1 = vpop.f32.mrf.mxu0 }
 0x322   : > { %v4874_v2 = vpop.f32.mrf.mxu1 }
 0x323   : > { %v4880_v3 = vpop.f32.mrf.mxu0 }
 0x324   : > { %v6419_v4 = vpop.f32.mrf.mxu1 }
 0x325   : > { %v1733_v7 = vpop.f32.mrf.mxu0  ;;  %v1801_v8 = vsel %vm1785_vm3, %v6419_v4, -inf }
 0x326   : > { %v1804_v9 = vsel %vm1785_vm3, %v1733_v7, -inf  ;;  %1802 = vmax.xlane.f32.xlu1 %v1801_v8  ;;  %v4885_v10 = vpop.f32.mrf.mxu1 }
 0x327   : > { %v4891_v11 = vpop.f32.mrf.mxu0  ;;  %1805 = vmax.xlane.f32.xlu0 %v1804_v9 }
 0x328   : > { %v1690_v12 = vpop.f32.mrf.mxu1 }
 0x329   : > { %v1736_v13 = vpop.f32.mrf.mxu0 }
 0x32a   : > { %v4886_v14 = vpop.f32.mrf.mxu1 }
 0x32b   : > { %v4892_v16 = vpop.f32.mrf.mxu0 }
 0x32c   : > { %v6424_v18 = vpop.f32.mrf.mxu1 }
 0x32d   : > { %v1788_v17 = vpop.xlane.xlu1 %1787  ;;  %v1807_v20 = vsel %vm1785_vm3, %v6424_v18, -inf }
 0x32e   : > { %v1810_v19 = vsub.f32 %v1457_v43, %v1788_v17  ;;  %1808 = vmax.xlane.f32.xlu1 %v1807_v20  ;;  %v4897_v21 = vpop.f32.mrf.mxu1 }
 0x330   : > { %v1818_v22 = vmul.f32 1.442695, %v1810_v19  ;;  %v1782_v23 = vpop.f32.mrf.mxu1 }
 0x332   : > { %5454 = vpow2.f32 %v1818_v22  ;;  %v4898_v24 = vpop.f32.mrf.mxu1 }
 0x335   : > { %v1791_v25 = vpop.xlane.xlu0 %1790 }
 0x336   : > { %v1811_v27 = vsub.f32 %v1503_v48, %v1791_v25 }
 0x338   : > { %v1820_v28 = vmul.f32 1.442695, %v1811_v27 }
 0x33a   : > { %5456 = vpow2.f32 %v1820_v28 }
 0x33f   : > { %v5455_v29 = vpop.eup %5454 }
 0x340   : > { %v1834_v30 = vsel %vm1785_vm3, %v5455_v29, 0.0 }
 0x341   : > { %1835 = vadd.xlane.f32.xlu0 %v1834_v30 }
 0x347   : > { %v5457_v31 = vpop.eup %5456 }
 0x348   : > { %v1837_v32 = vsel %vm1785_vm3, %v5457_v31, 0.0 }
 0x349   : > { %1838 = vadd.xlane.f32.xlu1 %v1837_v32 }
 0x39f   : > { %v1794_v35 = vpop.xlane.xlu0 %1793 }
 0x3a0   : > { %v1812_v37 = vsub.f32 %v1549_v53, %v1794_v35 }
 0x3a2   : > { %v1822_v38 = vmul.f32 1.442695, %v1812_v37 }
 0x3a4   : > { %5458 = vpow2.f32 %v1822_v38 }
 0x3a7   : > { %v1797_v39 = vpop.xlane.xlu1 %1796 }
 0x3a8   : > { %v1800_v40 = vpop.xlane.xlu0 %1799  ;;  %v1813_v41 = vsub.f32 %v1595_v58, %v1797_v39  ;;  %v5253_v58 = vpack.i.bf16 %v6395_v33, %v6383_v26 }
 0x3a9   : > { %v1814_v42 = vsub.f32 %v1641_v59, %v1800_v40 }
 0x3aa   : > { %v1824_v43 = vmul.f32 1.442695, %v1813_v41 }
 0x3ab   : > { %v1826_v44 = vmul.f32 1.442695, %v1814_v42 }
 0x3ac   : > { %5460 = vpow2.f32 %v1824_v43 }
 0x3ad   : > { %5462 = vpow2.f32 %v1826_v44 }
 0x3af   : > { %v1803_v56 = vpop.xlane.xlu1 %1802 }
 0x3b0   : > { %v1806_v46 = vpop.xlane.xlu0 %1805  ;;  %v1815_v62 = vsub.f32 %v6419_v4, %v1803_v56 }
 0x3b1   : > { %v6430_v45 = vpop.eup %5458  ;;  %v1816_v47 = vsub.f32 %v1733_v7, %v1806_v46 }
 0x3b2   : > { %v1840_v48 = vsel %vm1785_vm3, %v6430_v45, 0.0  ;;  %v1828_v1 = vmul.f32 1.442695, %v1815_v62 }
 0x3b3   : > { %1841 = vadd.xlane.f32.xlu0 %v1840_v48  ;;  %v1830_v49 = vmul.f32 1.442695, %v1816_v47 }
 0x3b5   : > { %5464 = vpow2.f32 %v1830_v49 }
 0x3b7   : > { %v1809_v59 = vpop.xlane.xlu1 %1808 }
 0x3b8   : > { %v1817_v2 = vsub.f32 %v6424_v18, %v1809_v59 }
 0x3b9   : > { %v5461_v50 = vpop.eup %5460 }
 0x3ba   : > { %v6434_v51 = vpop.eup %5462  ;;  %v1843_v52 = vsel %vm1785_vm3, %v5461_v50, 0.0  ;;  %v1832_v33 = vmul.f32 1.442695, %v1817_v2 }
 0x3bb   : > { %v1846_v53 = vsel %vm1785_vm3, %v6434_v51, 0.0  ;;  %1844 = vadd.xlane.f32.xlu1 %v1843_v52 }
 0x3bc   : > { %1847 = vadd.xlane.f32.xlu0 %v1846_v53 }
 0x3c2   : > { %v6439_v54 = vpop.eup %5464 }
 0x3c3   : > { %v1852_v55 = vsel %vm1785_vm3, %v6439_v54, 0.0 }
 0x3c4   : > { %1853 = vadd.xlane.f32.xlu0 %v1852_v55 }
 0x3ca   : > { %v1836_v57 = vpop.xlane.xlu0 %1835 }
 0x3cb   : > { %5466 = vrcp.f32 %v1836_v57 }
 0x3cc   : > { %5254 = vrot.lane.b32.xlu1 %v5253_v58, %s5901_s0 }
 0x3d2   : > { %v1839_v60 = vpop.xlane.xlu1 %1838 }
 0x3d3   : > { %5468 = vrcp.f32 %v1839_v60 }
 0x3d4   : > { %5470 = vpow2.f32 %v1828_v1 }
 0x3d5   : > { %5472 = vpow2.f32 %v1832_v33 }
 0x3d8   : > { %v5467_v61 = vpop.eup %5466 }
 0x3d9   : > { %v1866_v63 = vmul.f32 %v5467_v61, %v5455_v29 }
 0x3da   : > { %5249 = vrot.lane.b32.xlu0 %v5253_v58, %s5900_s16 }
 0x3db   : > { %v1874_v0 = vpack.c.bf16 %v1866_v63, %v1866_v63 }
 0x3dd   : > { %4902 = vmatmul.mubr.msk.bf16.vlgmr.msra.gmra.mxu0 %vm1785_vm3, %v1874_v0 }
 0x3de   : > { %4913 = vmatprep.mubr.msk.bf16.mxu0 %vm5899_vm0, %v5898_v6 }
 0x3e0   : > { %v5469_v26 = vpop.eup %5468 }
 0x3e1   : > { %v1867_v3 = vmul.f32 %v5469_v26, %v5457_v31  ;;  %v6455_v4 = vpop.eup %5470 }
 0x3e2   : > { %v1849_v8 = vsel %vm1785_vm3, %v6455_v4, 0.0  ;;  %v6459_v9 = vpop.eup %5472 }
 0x3e3   : > { %v1875_v7 = vpack.c.bf16 %v1867_v3, %v1867_v3  ;;  %v1855_v10 = vsel %vm1785_vm3, %v6459_v9, 0.0  ;;  %v5365_v3 = vld [vmem:[%s6219_s11 + $0x38] sm:$0xff]  }
 0x3e5   : > { %4908 = vmatmul.mubr.msk.bf16.vlgmr.msra.gmra.mxu1 %vm1785_vm3, %v1875_v7  ;;  %v5366_v7 = vld [vmem:[%s6219_s11 + $0x30] sm:$0xff]  }
 0x3e6   : > { %4919 = vmatprep.mubr.msk.bf16.mxu1 %vm5899_vm0, %v5898_v6 }
 0x3f0   : > { %1850 = vadd.xlane.f32.xlu1 %v1849_v8 }
 0x3f4   : > { %1856 = vadd.xlane.f32.xlu1 %v1855_v10 }
 0x405   : > { %5259 = vrot.lane.b32.xlu1 %v5253_v58, %s5902_s20 }
 0x43c   : > { %v1842_v11 = vpop.xlane.xlu0 %1841 }
 0x43d   : > { %5474 = vrcp.f32 %v1842_v11 }
 0x444   : > { %v1845_v12 = vpop.xlane.xlu1 %1844 }
 0x445   : > { %5476 = vrcp.f32 %v1845_v12  ;;  %v1848_v13 = vpop.xlane.xlu0 %1847 }
 0x446   : > { %5478 = vrcp.f32 %v1848_v13  ;;  %v5368_v13 = vld [vmem:[%s6219_s11 + $0x20] sm:$0xff]  }
 0x448   : > { %v5255_v16 = vpop.permute.xlu1 %5254 }
 0x449   : > { %v5257_v20 = vunpack.i.h.bf16 %v5255_v16  ;;  %v5256_v21 = vunpack.i.l.bf16 %v5255_v16 }
 0x44a   : > { %v5475_v17 = vpop.eup %5474 }
 0x44b   : > { %v1868_v27 = vmul.f32 %v5475_v17, %v6430_v45  ;;  %v1413_v29 = vpack.c.bf16 %v5257_v20, %v5257_v20  ;;  %v1412_v30 = vpack.c.bf16 %v5256_v21, %v5256_v21 }
 0x44d   : > { %v1854_v14 = vpop.xlane.xlu0 %1853  ;;  %v1876_v35 = vpack.c.bf16 %v1868_v27, %v1868_v27  ;;  %v2071_v39 = vsel %vm1885_vm2, %v1412_v30, 0  ;;  %v2117_v40 = vsel %vm1885_vm2, %v1413_v29, 0 }
 0x44e   : > { %5480 = vrcp.f32 %v1854_v14 }
 0x451   : > { %v5250_v18 = vpop.permute.xlu0 %5249 }
 0x452   : > { %v5477_v19 = vpop.eup %5476  ;;  %v5252_v22 = vunpack.i.h.bf16 %v5250_v18  ;;  %v5251_v23 = vunpack.i.l.bf16 %v5250_v18 }
 0x453   : > { %v1869_v28 = vmul.f32 %v5477_v19, %v5461_v50  ;;  %v5479_v38 = vpop.eup %5478  ;;  %v5369_v19 = vld [vmem:[%s6219_s11 + $0x18] sm:$0xff]  }
 0x454   : > { %v1411_v24 = vpack.c.bf16 %v5252_v22, %v5252_v22  ;;  %v1410_v25 = vpack.c.bf16 %v5251_v23, %v5251_v23  ;;  %v1870_v41 = vmul.f32 %v5479_v38, %v6434_v51 }
 0x455   : > { %v1877_v37 = vpack.c.bf16 %v1869_v28, %v1869_v28  ;;  %v5372_v28 = vld [vmem:[%s6219_s11] sm:$0xff]  }
 0x456   : > { %v1979_v31 = vsel %vm1885_vm2, %v1410_v25, 0  ;;  %v2025_v32 = vsel %vm1885_vm2, %v1411_v24, 0  ;;  %v1878_v42 = vpack.c.bf16 %v1870_v41, %v1870_v41  ;;  %v5370_v24 = vld [vmem:[%s6219_s11 + $0x10] sm:$0xff]   ;;  %v5371_v25 = vld [vmem:[%s6219_s11 + $0x8] sm:$0xff]  }
 0x457   : > { %4912 = vmatpush3.bf16.msra.mxu0 %v1979_v31  ;;  %4918 = vmatpush3.bf16.msra.mxu1 %v2025_v32 }
 0x458   : > { %4923 = vmatprep.subr.bf16.mxu0 %v5898_v6  ;;  %4929 = vmatprep.subr.bf16.mxu1 %v5898_v6 }
 0x45a   : > { %4914 = vmatmul.mubr.msk.bf16.vlgmr.msra.gmra.mxu0 %vm1785_vm3, %v1876_v35  ;;  %4920 = vmatmul.mubr.msk.bf16.vlgmr.msra.gmra.mxu1 %vm1785_vm3, %v1877_v37 }
 0x45b   : > { %4924 = vmatpush3.bf16.msra.mxu0 %v2071_v39  ;;  %4930 = vmatpush3.bf16.msra.mxu1 %v2117_v40  ;;  %v5481_v45 = vpop.eup %5480 }
 0x45c   : > { %4925 = vmatprep.mubr.msk.bf16.mxu0 %vm5899_vm0, %v5898_v6  ;;  %4935 = vmatprep.subr.bf16.mxu0 %v5898_v6  ;;  %v1872_v50 = vmul.f32 %v5481_v45, %v6439_v54 }
 0x45d   : > { %4931 = vmatprep.mubr.msk.bf16.mxu1 %vm5899_vm0, %v5898_v6  ;;  %4941 = vmatprep.subr.bf16.mxu1 %v5898_v6 }
 0x45e   : > { %v1880_v55 = vpack.c.bf16 %v1872_v50, %v1872_v50 }
 0x462   : > { %4926 = vmatmul.mubr.msk.bf16.vlgmr.msra.gmra.mxu0 %vm1785_vm3, %v1878_v42 }
 0x463   : > { %4937 = vmatprep.mubr.msk.bf16.mxu0 %vm5899_vm0, %v5898_v6 }
 0x479   : > { %v1851_v43 = vpop.xlane.xlu1 %1850 }
 0x47a   : > { %5482 = vrcp.f32 %v1851_v43 }
 0x47d   : > { %v1857_v44 = vpop.xlane.xlu1 %1856 }
 0x47e   : > { %5484 = vrcp.f32 %v1857_v44 }
 0x481   : > { %v5260_v46 = vpop.permute.xlu1 %5259 }
 0x482   : > { %v5261_v47 = vunpack.i.l.bf16 %v5260_v46  ;;  %v5262_v48 = vunpack.i.h.bf16 %v5260_v46 }
 0x484   : > { %v1414_v49 = vpack.c.bf16 %v5261_v47, %v5261_v47  ;;  %v1415_v53 = vpack.c.bf16 %v5262_v48, %v5262_v48 }
 0x486   : > { %v2163_v51 = vsel %vm1885_vm2, %v1414_v49, 0  ;;  %v2209_v54 = vsel %vm1885_vm2, %v1415_v53, 0 }
 0x487   : > { %v5483_v52 = vpop.eup %5482  ;;  %4936 = vmatpush3.bf16.msra.mxu0 %v2163_v51 }
 0x488   : > { %v1871_v56 = vmul.f32 %v5483_v52, %v6455_v4  ;;  %4947 = vmatprep.subr.bf16.mxu0 %v5898_v6  ;;  %v5367_v4 = vld [vmem:[%s6219_s11 + $0x28] sm:$0xff]   ;;  %s6954_s11 = scalar_lea.vmem [#allocation8], %s6207_s28 }
 0x48a   : > { %4938 = vmatmul.mubr.msk.bf16.vlgmr.msra.gmra.mxu0 %vm1785_vm3, %v1880_v55  ;;  %v1879_v57 = vpack.c.bf16 %v1871_v56, %v1871_v56 }
 0x48b   : > { %v5485_v58 = vpop.eup %5484  ;;  %4963 = vmatprep.mubr.msk.bf16.mxu0 %vm5899_vm0, %v5898_v6  ;;  %4948 = vmatpush3.bf16.msra.mxu0 %v5365_v3 }
 0x48c   : > { %4932 = vmatmul.mubr.msk.bf16.vlgmr.msra.gmra.mxu1 %vm1785_vm3, %v1879_v57  ;;  %v1873_v59 = vmul.f32 %v5485_v58, %v6459_v9  ;;  %4949 = vmatprep.subr.bf16.mxu0 %v5898_v6 }
 0x48d   : > { %4942 = vmatpush3.bf16.msra.mxu1 %v2209_v54  ;;  %4943 = vmatprep.mubr.msk.bf16.mxu1 %vm5899_vm0, %v5898_v6 }
 0x48e   : > { %4967 = vmatprep.subr.bf16.mxu1 %v5898_v6  ;;  %v1881_v60 = vpack.c.bf16 %v1873_v59, %v1873_v59 }
 0x48f   : > { %4950 = vmatpush3.bf16.msra.mxu0 %v5366_v7  ;;  %v5531_v7 = vld [vmem:[#allocation2 + $0x8] sm:$0xff] }
 0x490   : > { %4951 = vmatprep.subr.bf16.mxu0 %v5898_v6 }
 0x493   : > { %4952 = vmatpush3.bf16.msra.mxu0 %v5367_v4 }
 0x494   : > { %4944 = vmatmul.mubr.msk.bf16.vlgmr.msra.gmra.mxu1 %vm1785_vm3, %v1881_v60  ;;  %4953 = vmatprep.subr.bf16.mxu0 %v5898_v6 }
 0x495   : > { %4983 = vmatprep.mubr.msk.bf16.mxu1 %vm5899_vm0, %v5898_v6 }
 0x497   : > { %4954 = vmatpush3.bf16.msra.mxu0 %v5368_v13  ;;  %v5381_v13 = vld [vmem:[%s6234_s21 + $0x54] ss:$8 sps:$4 sm:$0xff]  }
 0x498   : > { %4955 = vmatprep.subr.bf16.mxu0 %v5898_v6 }
 0x49b   : > { %4956 = vmatpush3.bf16.msra.mxu0 %v5369_v19 }
 0x49c   : > { %4957 = vmatprep.subr.bf16.mxu0 %v5898_v6 }
 0x49d   : > { %v6499_v61 = vpop.f32.mrf.mxu0 }
 0x49f   : > { %v4903_v62 = vpop.f32.mrf.mxu0  ;;  %4958 = vmatpush3.bf16.msra.mxu0 %v5370_v24 }
 0x4a0   : > { %4959 = vmatprep.subr.bf16.mxu0 %v5898_v6  ;;  %v4601_v62 = vld [vmem:[%s6954_s11] ss:$0 sm:$0xff] }
 0x4a1   : > { %v1926_v63 = vpop.f32.mrf.mxu0 }
 0x4a3   : > { %v4904_v0 = vpop.f32.mrf.mxu0  ;;  %4960 = vmatpush3.bf16.msra.mxu0 %v5371_v25 }
 0x4a4   : > { %4961 = vmatprep.subr.bf16.mxu0 %v5898_v6 }
 0x4a5   : > { %v6501_v1 = vpop.f32.mrf.mxu1 }
 0x4a7   : > { %v4909_v2 = vpop.f32.mrf.mxu1  ;;  %4962 = vmatpush3.bf16.msra.mxu0 %v5372_v28  ;;  %v5386_v28 = vld [vmem:[%s6234_s21 + $0x30] ss:$8 sps:$4 sm:$0xff]  }
 0x4a9   : > { %v1972_v26 = vpop.f32.mrf.mxu1 }
 0x4ab   : > { %v4910_v33 = vpop.f32.mrf.mxu1 }
 0x51a   : > { %v2015_v8 = vpop.f32.mrf.mxu0  ;;  %v2061_v9 = vpop.f32.mrf.mxu1 }
 0x51b   : > { %v5263_v10 = vpack.i.bf16 %v2061_v9, %v2015_v8  ;;  %v5373_v8 = vld [vmem:[%s6234_s21 + $0x70] ss:$8 sps:$4 sm:$0xff]   ;;  %v5375_v9 = vld [vmem:[%s6234_s21 + $0x74] ss:$8 sps:$4 sm:$0xff]  }
 0x51c   : > { %v4915_v11 = vpop.f32.mrf.mxu0  ;;  %v4921_v12 = vpop.f32.mrf.mxu1  ;;  %2660 = vmatprep.subr.bf16.mxu0 %v5375_v9 }
 0x51d   : > { %5264 = vrot.lane.b32.xlu0 %v5263_v10, %s5902_s20  ;;  %v5378_v10 = vld [vmem:[%s6234_s21 + $0x64] ss:$8 sps:$4 sm:$0xff]   ;;  %v5385_v11 = vld [vmem:[%s6226_s22 + $0x38] sm:$0xff]   ;;  %v5376_v12 = vld [vmem:[%s6234_s21 + $0x60] ss:$8 sps:$4 sm:$0xff]  }
 0x51e   : > { %v2018_v14 = vpop.f32.mrf.mxu0  ;;  %v2064_v16 = vpop.f32.mrf.mxu1  ;;  %4968 = vmatpush3.bf16.msra.mxu1 %v5385_v11 }
 0x51f   : > { %4969 = vmatprep.subr.bf16.mxu1 %v5898_v6  ;;  %v5379_v14 = vld [vmem:[%s6234_s21 + $0x50] ss:$8 sps:$4 sm:$0xff]   ;;  %v5384_v16 = vld [vmem:[%s6234_s21 + $0x44] ss:$8 sps:$4 sm:$0xff]  }
 0x520   : > { %v4916_v17 = vpop.f32.mrf.mxu0  ;;  %v4922_v18 = vpop.f32.mrf.mxu1 }
 0x521   : > { %v5382_v17 = vld [vmem:[%s6234_s21 + $0x40] ss:$8 sps:$4 sm:$0xff]  }
 0x522   : > { %v2107_v20 = vpop.f32.mrf.mxu0 }
 0x524   : > { %v4927_v21 = vpop.f32.mrf.mxu0 }
 0x526   : > { %v2110_v22 = vpop.f32.mrf.mxu0 }
 0x528   : > { %v4928_v23 = vpop.f32.mrf.mxu0 }
 0x54a   : > { %v2199_v27 = vpop.f32.mrf.mxu0 }
 0x54c   : > { %v2153_v29 = vpop.f32.mrf.mxu1  ;;  %v4939_v30 = vpop.f32.mrf.mxu0 }
 0x54d   : > { %v5268_v31 = vpack.i.bf16 %v2153_v29, %v2107_v20  ;;  %v5389_v29 = vld [vmem:[%s6226_s22 + $0x30] sm:$0xff]  }
 0x54e   : > { %v4933_v32 = vpop.f32.mrf.mxu1  ;;  %v2202_v35 = vpop.f32.mrf.mxu0  ;;  %4970 = vmatpush3.bf16.msra.mxu1 %v5389_v29  ;;  %v5392_v30 = vld [vmem:[%s6234_s21 + $0x24] ss:$8 sps:$4 sm:$0xff]  }
 0x54f   : > { %5269 = vrot.lane.b32.xlu1 %v5268_v31, %s5901_s0  ;;  %4971 = vmatprep.subr.bf16.mxu1 %v5898_v6  ;;  %v5390_v31 = vld [vmem:[%s6234_s21 + $0x20] ss:$8 sps:$4 sm:$0xff]   ;;  %v5394_v35 = vld [vmem:[%s6234_s21 + $0x10] ss:$8 sps:$4 sm:$0xff]  }
 0x550   : > { %v2156_v37 = vpop.f32.mrf.mxu1  ;;  %v4940_v38 = vpop.f32.mrf.mxu0  ;;  %v5393_v32 = vld [vmem:[%s6226_s22 + $0x28] sm:$0xff]  }
 0x551   : > { %v5396_v37 = vld [vmem:[%s6234_s21 + $0x14] ss:$8 sps:$4 sm:$0xff]  }
 0x552   : > { %v4934_v39 = vpop.f32.mrf.mxu1  ;;  %4972 = vmatpush3.bf16.msra.mxu1 %v5393_v32  ;;  %v5397_v38 = vld [vmem:[%s6226_s22 + $0x20] sm:$0xff]  }
 0x553   : > { %4973 = vmatprep.subr.bf16.mxu1 %v5898_v6  ;;  %v5400_v39 = vld [vmem:[%s6234_s21 + $0x4] ss:$8 sps:$4 sm:$0xff]  }
 0x554   : > { %v2245_v40 = vpop.f32.mrf.mxu1 }
 0x555   : > { %v5273_v41 = vpack.i.bf16 %v2245_v40, %v2199_v27  ;;  %v5388_v27 = vld [vmem:[%s6234_s21 + $0x34] ss:$8 sps:$4 sm:$0xff]   ;;  %v5398_v40 = vld [vmem:[%s6234_s21] ss:$8 sps:$4 sm:$0xff]  }
 0x556   : > { %v4945_v42 = vpop.f32.mrf.mxu1  ;;  %4974 = vmatpush3.bf16.msra.mxu1 %v5397_v38 }
 0x557   : > { %5274 = vrot.lane.b32.xlu0 %v5273_v41, %s5900_s16  ;;  %v5401_v41 = vld [vmem:[%s6226_s22 + $0x18] sm:$0xff]   ;;  %4975 = vmatprep.subr.bf16.mxu1 %v5898_v6  ;;  %v5402_v42 = vld [vmem:[%s6955_s19] sm:$0xff]  }
 0x558   : > { %v2248_v43 = vpop.f32.mrf.mxu1 }
 0x559   : > { %v5403_v43 = vld [vmem:[%s6226_s22 + $0x10] sm:$0xff]  }
 0x55a   : > { %v4946_v44 = vpop.f32.mrf.mxu1  ;;  %4976 = vmatpush3.bf16.msra.mxu1 %v5401_v41 }
 0x55b   : > { %4977 = vmatprep.subr.bf16.mxu1 %v5898_v6  ;;  %v5404_v44 = vld [vmem:[%s6226_s22 + $0x8] sm:$0xff]  }
 0x55e   : > { %4978 = vmatpush3.bf16.msra.mxu1 %v5403_v43 }
 0x55f   : > { %4979 = vmatprep.subr.bf16.mxu1 %v5898_v6 }
 0x562   : > { %4980 = vmatpush3.bf16.msra.mxu1 %v5404_v44 }
 0x563   : > { %4981 = vmatprep.subr.bf16.mxu1 %v5898_v6 }
 0x58f   : > { %v5265_v45 = vpop.permute.xlu0 %5264 }
 0x590   : > { %v5267_v47 = vunpack.i.h.bf16 %v5265_v45  ;;  %v5266_v48 = vunpack.i.l.bf16 %v5265_v45  ;;  %v5405_v45 = vld [vmem:[%s6226_s22] sm:$0xff]   ;;  %s6956_s22 = scalar_lea.vmem [#allocation11], %s6207_s28  ;;  %s6957_s28 = sld [smem:[#allocation35_spill]] }
 0x591   : > { %4982 = vmatpush3.bf16.msra.mxu1 %v5405_v45 }
 0x592   : > { %v2276_v52 = vsel %vm1416_vm1, %v6501_v1, %v5267_v47  ;;  %v2275_v53 = vsel %vm1416_vm1, %v6499_v61, %v5266_v48  ;;  %v5530_v1 = vld [vmem:[#allocation2] sm:$0xff]  ;;  %4987 = vmatprep.subr.bf16.mxu1 %v5898_v6 }
 0x5c1   : > { %v5270_v46 = vpop.permute.xlu1 %5269 }
 0x5c2   : > { %v5272_v49 = vunpack.i.h.bf16 %v5270_v46  ;;  %v5271_v50 = vunpack.i.l.bf16 %v5270_v46 }
 0x5c4   : > { %v2279_v57 = vsel %vm2277_vm4, %v2276_v52, %v5272_v49  ;;  %v2278_v58 = vsel %vm2277_vm4, %v2275_v53, %v5271_v50  ;;  %v6571_v52 = vld [vmem:[%s6272_s10] sm:$0x7] }
 0x5c9   : > { %v5275_v51 = vpop.permute.xlu0 %5274 }
 0x5ca   : > { %v5277_v55 = vunpack.i.h.bf16 %v5275_v51  ;;  %v5276_v56 = vunpack.i.l.bf16 %v5275_v51 }
 0x5cc   : > { %v2282_v54 = vsel %vm2280_vm5, %v2279_v57, %v5277_v55  ;;  %v2281_v59 = vsel %vm2280_vm5, %v2278_v58, %v5276_v56  ;;  %v2424_v56 = vrot.slane %v6571_v52, %v6344_v36  ;;  %v6576_v57 = vld [vmem:[%s6277_s4] sm:$0x7] }
 0x5cd   : > { %v2283_v60 = vpack.c.bf16 %v2282_v54, %v2281_v59 }
 0x5cf   : > { %4964 = vmatmul.mubr.bf16.vlgmr.msra.gmra.mxu0 %v2283_v60  ;;  %v2430_v60 = vrot.slane %v6576_v57, %v6344_v36 }
 0x5d0   : > { %2692 = vmatprep.mubr.bf16.mxu0 %v5897_v5  ;;  %2661 = vmatpush1.bf16.msra.mxu0 %v5373_v8 }
 0x5d1   : > { %2662 = vmatprep.subr.bf16.mxu0 %v5378_v10 }
 0x5d4   : > { %2663 = vmatpush1.bf16.msra.mxu0 %v5376_v12 }
 0x5d5   : > { %2664 = vmatprep.subr.bf16.mxu0 %v5381_v13 }
 0x5d8   : > { %2665 = vmatpush1.bf16.msra.mxu0 %v5379_v14 }
 0x5d9   : > { %2666 = vmatprep.subr.bf16.mxu0 %v5384_v16 }
 0x5dc   : > { %2667 = vmatpush1.bf16.msra.mxu0 %v5382_v17 }
 0x5dd   : > { %2668 = vmatprep.subr.bf16.mxu0 %v5388_v27 }
 0x5e0   : > { %2669 = vmatpush1.bf16.msra.mxu0 %v5386_v28 }
 0x5e1   : > { %2670 = vmatprep.subr.bf16.mxu0 %v5392_v30 }
 0x5e4   : > { %2671 = vmatpush1.bf16.msra.mxu0 %v5390_v31 }
 0x5e5   : > { %2672 = vmatprep.subr.bf16.mxu0 %v5396_v37 }
 0x5e8   : > { %2673 = vmatpush1.bf16.msra.mxu0 %v5394_v35 }
 0x5e9   : > { %2674 = vmatprep.subr.bf16.mxu0 %v5400_v39 }
 0x5ec   : > { %2675 = vmatpush1.bf16.msra.mxu0 %v5398_v40 }
 0x5ed   : > { %5011 = vmatprep.subr.bf16.mxu0 %v5898_v6 }
 0x5ef   : > { %2693 = vmatmul.mubr.bf16.vlgmr.msra.gmra.mxu0 %v5402_v42 }
 0x5f0   : > { %5013 = vmatprep.mubr.msk.bf16.mxu0 %vm5899_vm0, %v5898_v6 }
 0x68f   : > { %v2389_v61 = vpop.f32.mrf.mxu0 }
 0x690   : > { %v2390_v63 = vadd.f32 %v4601_v62, %v2389_v61 }
 0x691   : > { %v4965_v0 = vpop.f32.mrf.mxu0 }
 0x692   : > { %v2396_v2 = vadd.f32 %v5530_v1, %v2390_v63  ;;  %v2562_v1 = vld [vmem:[%s6257_s14] sm:$0x3] }
 0x693   : > { %v2392_v26 = vpop.f32.mrf.mxu0 }
 0x694   : > { %v2393_v33 = vadd.f32 %v4601_v62, %v2392_v26  ;;  %2398 = vadd.xlane.f32.xlu1 %v2396_v2  ;;  %v2571_v26 = vrot.slane %v2562_v1, %v6338_v34 }
 0x695   : > { %v4966_v3 = vpop.f32.mrf.mxu0 }
 0x696   : > { %v2397_v4 = vadd.f32 %v5531_v7, %v2393_v33 }
 0x698   : > { %2400 = vadd.xlane.f32.xlu0 %v2397_v4 }
 0x6af   : > { %v2694_v33 = vpop.f32.mrf.mxu0 }
 0x6b1   : > { %v2696_v7 = vpop.f32.mrf.mxu0 }
 0x6b3   : > { %v2698_v9 = vpop.f32.mrf.mxu0 }
 0x6b5   : > { %v2700_v12 = vpop.f32.mrf.mxu0 }
 0x6b6   : > { %v6596_v14 = vadd.f32 %v2700_v12, %v2571_v26 }
 0x71d   : > { %v2399_v18 = vpop.xlane.xlu1 %2398 }
 0x71e   : > { %v2403_v19 = vmul.f32 0.0078125, %v2399_v18 }
 0x720   : > { %v2405_v20 = vsub.f32 %v2396_v2, %v2403_v19  ;;  %v2567_v2 = vrot.slane %v2562_v1, %v6344_v36 }
 0x721   : > { %v2401_v21 = vpop.xlane.xlu0 %2400 }
 0x722   : > { %v2404_v22 = vmul.f32 0.0078125, %v2401_v21  ;;  %v2407_v23 = vmul.f32 %v2405_v20, %v2405_v20  ;;  %v2695_v3 = vadd.f32 %v2694_v33, %v2567_v2  ;;  %v2699_v10 = vadd.f32 %v2698_v9, %v2567_v2 }
 0x724   : > { %v2406_v24 = vsub.f32 %v2397_v4, %v2404_v22  ;;  %2409 = vadd.xlane.f32.xlu0 %v2407_v23  ;;  %v6591_v4 = vadd.f32 %v2696_v7, %v2571_v26  ;;  %v2751_v8 = vpack.c.bf16 %v2695_v3, %v2695_v3  ;;  %v5283_v13 = vpack.i.bf16 %v2699_v10, %v2695_v3  ;;  %v4610_v22 = vld [vmem:[%s6956_s22] ss:$0 sm:$0xff] }
 0x726   : > { %v2408_v25 = vmul.f32 %v2406_v24, %v2406_v24  ;;  %v2791_v11 = vsel %vm1416_vm1, %v2751_v8, 0  ;;  %v6601_v16 = vpack.i.bf16 %v6596_v14, %v6591_v4  ;;  %v2779_v33 = vpack.c.bf16 %v6591_v4, %v6591_v4 }
 0x727   : > { %v2780_v4 = vpack.c.bf16 %v6596_v14, %v6596_v14 }
 0x728   : > { %2411 = vadd.xlane.f32.xlu1 %v2408_v25  ;;  %v2752_v25 = vpack.c.bf16 %v2699_v10, %v2699_v10  ;;  %v3255_v8 = vsel %vm1885_vm2, %v2779_v33, 0 }
 0x729   : > { %v3301_v12 = vsel %vm1885_vm2, %v2780_v4, 0 }
 0x72a   : > { %v2837_v31 = vsel %vm1416_vm1, %v2752_v25, 0 }
 0x73a   : > { %2733 = vrot.lane.b32.xlu0 %v2695_v3, %s5900_s16 }
 0x73e   : > { %5284 = vrot.lane.b32.xlu0 %v5283_v13, %s5901_s0 }
 0x742   : > { %5294 = vrot.lane.b32.xlu0 %v5283_v13, %s5902_s20 }
 0x7ad   : > { %v2410_v46 = vpop.xlane.xlu0 %2409 }
 0x7ae   : > { %v2413_v47 = vmul.f32 0.0078125, %v2410_v46 }
 0x7b0   : > { %v2415_v48 = vadd.f32 1e-05, %v2413_v47 }
 0x7b1   : > { %v2412_v49 = vpop.xlane.xlu1 %2411  ;;  %v2734_v17 = vpop.permute.xlu0 %2733 }
 0x7b2   : > { %5486 = vrsqrt.f32 %v2415_v48  ;;  %v2414_v50 = vmul.f32 0.0078125, %v2412_v49  ;;  %v2753_v37 = vpack.c.bf16 %v2734_v17, %v2734_v17 }
 0x7b4   : > { %v2416_v51 = vadd.f32 1e-05, %v2414_v50  ;;  %v2883_v40 = vsel %vm1416_vm1, %v2753_v37, 0 }
 0x7b5   : > { %v5285_v18 = vpop.permute.xlu0 %5284 }
 0x7b6   : > { %5488 = vrsqrt.f32 %v2416_v51  ;;  %v5286_v19 = vunpack.i.l.bf16 %v5285_v18  ;;  %v5287_v48 = vunpack.i.h.bf16 %v5285_v18 }
 0x7b9   : > { %v5295_v44 = vpop.permute.xlu0 %5294 }
 0x7ba   : > { %v5296_v49 = vunpack.i.l.bf16 %v5295_v44 }
 0x7bf   : > { %v5487_v53 = vpop.eup %5486 }
 0x7c0   : > { %v2419_v55 = vmul.f32 %v5487_v53, %v2405_v20  ;;  %v2755_v20 = vpack.c.bf16 %v5286_v19, %v5286_v19  ;;  %v2756_v53 = vpack.c.bf16 %v5287_v48, %v5287_v48 }
 0x7c2   : > { %v2425_v59 = vmul.f32 %v2424_v56, %v2419_v55  ;;  %v2975_v21 = vsel %vm1416_vm1, %v2755_v20, 0  ;;  %v2757_v55 = vpack.c.bf16 %v5296_v49, %v5296_v49 }
 0x7c3   : > { %v5489_v58 = vpop.eup %5488  ;;  %5012 = vmatpush3.bf16.xpose.msra.mxu0 %v2975_v21 }
 0x7c4   : > { %v2420_v54 = vmul.f32 %v5489_v58, %v2406_v24  ;;  %v6580_v61 = vadd.f32 %v2430_v60, %v2425_v59  ;;  %5023 = vmatprep.subr.bf16.mxu0 %v5898_v6 }
 0x7c6   : > { %v2426_v62 = vmul.f32 %v2424_v56, %v2420_v54 }
 0x7c8   : > { %v6582_v63 = vadd.f32 %v2430_v60, %v2426_v62  ;;  %v5297_v60 = vunpack.i.h.bf16 %v5295_v44  ;;  %v3067_v62 = vsel %vm1416_vm1, %v2757_v55, 0 }
 0x7ca   : > { %v2433_v0 = vpack.c.bf16 %v6582_v63, %v6580_v61  ;;  %v2758_v26 = vpack.c.bf16 %v5297_v60, %v5297_v60 }
 0x7cc   : > { %4984 = vmatmul.mubr.bf16.vlgmr.msra.gmra.mxu1 %v2433_v0  ;;  %v3021_v0 = vsel %vm1416_vm1, %v2756_v53, 0  ;;  %v3113_v9 = vsel %vm1416_vm1, %v2758_v26, 0 }
 0x7cd   : > { %4989 = vmatprep.mubr.msk.bf16.mxu1 %vm5899_vm0, %v5898_v6  ;;  %4988 = vmatpush3.bf16.xpose.msra.mxu1 %v2791_v11 }
 0x7ce   : > { %4993 = vmatprep.subr.bf16.mxu1 %v5898_v6 }
 0x88c   : > { %v2539_v23 = vpop.f32.mrf.mxu1 }
 0x88d   : > { %v2540_v24 = vadd.f32 %v4610_v22, %v2539_v23 }
 0x88e   : > { %v4985_v27 = vpop.f32.mrf.mxu1 }
 0x88f   : > { %v2723_v28 = vpack.c.bf16 %v2540_v24, %v2540_v24  ;;  %v5278_v29 = vpack.i.bf16 %v2699_v10, %v2540_v24 }
 0x890   : > { %v2542_v30 = vpop.f32.mrf.mxu1 }
 0x891   : > { %5279 = vrot.lane.b32.xlu1 %v5278_v29, %s5900_s16  ;;  %4990 = vmatmul.mubr.msk.bf16.vlgmr.msra.gmra.mxu1 %vm1416_vm1, %v2723_v28  ;;  %v2543_v35 = vadd.f32 %v4610_v22, %v2542_v30 }
 0x892   : > { %4994 = vmatpush3.bf16.xpose.msra.mxu1 %v2837_v31  ;;  %v4986_v32 = vpop.f32.mrf.mxu1  ;;  %4995 = vmatprep.mubr.msk.bf16.mxu1 %vm5899_vm0, %v5898_v6 }
 0x893   : > { %4999 = vmatprep.subr.bf16.mxu1 %v5898_v6  ;;  %v2724_v38 = vpack.c.bf16 %v2543_v35, %v2543_v35  ;;  %v5288_v39 = vpack.i.bf16 %v2543_v35, %v2540_v24 }
 0x895   : > { %2707 = vrot.lane.b32.xlu1 %v2543_v35, %s5900_s16 }
 0x899   : > { %5289 = vrot.lane.b32.xlu1 %v5288_v39, %s5901_s0  ;;  %4996 = vmatmul.mubr.msk.bf16.vlgmr.msra.gmra.mxu1 %vm1416_vm1, %v2724_v38 }
 0x89a   : > { %5000 = vmatpush3.bf16.xpose.msra.mxu1 %v2883_v40  ;;  %5001 = vmatprep.mubr.msk.bf16.mxu1 %vm5899_vm0, %v5898_v6 }
 0x89b   : > { %5005 = vmatprep.subr.bf16.mxu1 %v5898_v6 }
 0x89d   : > { %5299 = vrot.lane.b32.xlu1 %v5288_v39, %s5902_s20 }
 0x903   : > { %v5280_v41 = vpop.permute.xlu1 %5279 }
 0x904   : > { %v5282_v42 = vunpack.i.h.bf16 %v5280_v41  ;;  %v5281_v43 = vunpack.i.l.bf16 %v5280_v41 }
 0x906   : > { %v2754_v45 = vpack.c.bf16 %v5282_v42, %v5282_v42  ;;  %v2725_v46 = vpack.c.bf16 %v5281_v43, %v5281_v43 }
 0x907   : > { %v2708_v47 = vpop.permute.xlu1 %2707 }
 0x908   : > { %5002 = vmatmul.mubr.msk.bf16.vlgmr.msra.gmra.mxu1 %vm1416_vm1, %v2725_v46  ;;  %v2929_v50 = vsel %vm1416_vm1, %v2754_v45, 0  ;;  %v2726_v58 = vpack.c.bf16 %v2708_v47, %v2708_v47 }
 0x909   : > { %5006 = vmatpush3.bf16.xpose.msra.mxu1 %v2929_v50  ;;  %5007 = vmatprep.mubr.msk.bf16.mxu1 %vm5899_vm0, %v5898_v6 }
 0x90a   : > { %5017 = vmatprep.subr.bf16.mxu1 %v5898_v6 }
 0x90b   : > { %v5290_v51 = vpop.permute.xlu1 %5289 }
 0x90c   : > { %v5291_v56 = vunpack.i.l.bf16 %v5290_v51  ;;  %v5292_v1 = vunpack.i.h.bf16 %v5290_v51 }
 0x90e   : > { %v2727_v54 = vpack.c.bf16 %v5291_v56, %v5291_v56  ;;  %v2728_v3 = vpack.c.bf16 %v5292_v1, %v5292_v1 }
 0x90f   : > { %v5300_v59 = vpop.permute.xlu1 %5299 }
 0x910   : > { %5008 = vmatmul.mubr.msk.bf16.vlgmr.msra.gmra.mxu1 %vm1416_vm1, %v2726_v58  ;;  %5014 = vmatmul.mubr.msk.bf16.vlgmr.msra.gmra.mxu0 %vm1416_vm1, %v2727_v54  ;;  %v5301_v2 = vunpack.i.l.bf16 %v5300_v59  ;;  %v5302_v10 = vunpack.i.h.bf16 %v5300_v59 }
 0x911   : > { %5024 = vmatpush3.bf16.xpose.msra.mxu0 %v3067_v62  ;;  %5018 = vmatpush3.bf16.xpose.msra.mxu1 %v3021_v0 }
 0x912   : > { %5019 = vmatprep.mubr.msk.bf16.mxu1 %vm5899_vm0, %v5898_v6  ;;  %5025 = vmatprep.mubr.msk.bf16.mxu0 %vm5899_vm0, %v5898_v6  ;;  %v2729_v7 = vpack.c.bf16 %v5301_v2, %v5301_v2  ;;  %v2730_v11 = vpack.c.bf16 %v5302_v10, %v5302_v10 }
 0x913   : > { %5035 = vmatprep.subr.bf16.mxu0 %v5898_v6  ;;  %5029 = vmatprep.subr.bf16.mxu1 %v5898_v6 }
 0x918   : > { %5020 = vmatmul.mubr.msk.bf16.vlgmr.msra.gmra.mxu1 %vm1416_vm1, %v2728_v3  ;;  %5026 = vmatmul.mubr.msk.bf16.vlgmr.msra.gmra.mxu0 %vm1416_vm1, %v2729_v7 }
 0x919   : > { %5036 = vmatpush3.bf16.msra.mxu0 %v3255_v8  ;;  %5030 = vmatpush3.bf16.xpose.msra.mxu1 %v3113_v9 }
 0x91a   : > { %5031 = vmatprep.mubr.msk.bf16.mxu1 %vm5899_vm0, %v5898_v6  ;;  %5041 = vmatprep.subr.bf16.mxu1 %v5898_v6 }
 0x91b   : > { %5037 = vmatprep.mubr.msk.bf16.mxu0 %vm5899_vm0, %v5898_v6  ;;  %5047 = vmatprep.subr.bf16.mxu0 %v5898_v6 }
 0x920   : > { %5032 = vmatmul.mubr.msk.bf16.vlgmr.msra.gmra.mxu1 %vm1416_vm1, %v2730_v11 }
 0x921   : > { %5042 = vmatpush3.bf16.msra.mxu1 %v3301_v12  ;;  %5043 = vmatprep.mubr.msk.bf16.mxu1 %vm5899_vm0, %v5898_v6 }
 0x922   : > { %5053 = vmatprep.subr.bf16.mxu1 %v5898_v6 }
 0x951   : > { %v2827_v13 = vpop.f32.mrf.mxu1 }
 0x952   : > { %v3155_v17 = vsel %vm1785_vm3, %v2827_v13, -inf }
 0x953   : > { %3156 = vmax.xlane.f32.xlu0 %v3155_v17  ;;  %v4991_v18 = vpop.f32.mrf.mxu1 }
 0x955   : > { %v2830_v19 = vpop.f32.mrf.mxu1 }
 0x957   : > { %v4992_v20 = vpop.f32.mrf.mxu1 }
 0x959   : > { %v2873_v21 = vpop.f32.mrf.mxu1 }
 0x95a   : > { %v3158_v14 = vsel %vm1785_vm3, %v2873_v21, -inf }
 0x95b   : > { %3159 = vmax.xlane.f32.xlu1 %v3158_v14  ;;  %v4997_v22 = vpop.f32.mrf.mxu1 }
 0x95d   : > { %v2876_v23 = vpop.f32.mrf.mxu1 }
 0x95f   : > { %v4998_v24 = vpop.f32.mrf.mxu1 }
 0x9c8   : > { %v2919_v25 = vpop.f32.mrf.mxu1 }
 0x9c9   : > { %v3161_v27 = vsel %vm1785_vm3, %v2919_v25, -inf }
 0x9ca   : > { %3162 = vmax.xlane.f32.xlu0 %v3161_v27  ;;  %v5003_v28 = vpop.f32.mrf.mxu1 }
 0x9cc   : > { %v2922_v29 = vpop.f32.mrf.mxu1 }
 0x9ce   : > { %v5004_v30 = vpop.f32.mrf.mxu1 }
 0x9d0   : > { %v2965_v31 = vpop.f32.mrf.mxu1  ;;  %v3011_v32 = vpop.f32.mrf.mxu0 }
 0x9d1   : > { %v3167_v35 = vsel %vm1785_vm3, %v3011_v32, -inf  ;;  %v3164_v37 = vsel %vm1785_vm3, %v2965_v31, -inf }
 0x9d2   : > { %v5015_v38 = vpop.f32.mrf.mxu0  ;;  %3168 = vmax.xlane.f32.xlu1 %v3167_v35  ;;  %3165 = vmax.xlane.f32.xlu0 %v3164_v37  ;;  %v5009_v39 = vpop.f32.mrf.mxu1 }
 0x9d4   : > { %v2968_v40 = vpop.f32.mrf.mxu1  ;;  %v3014_v41 = vpop.f32.mrf.mxu0 }
 0x9d6   : > { %v5010_v42 = vpop.f32.mrf.mxu1  ;;  %v5016_v43 = vpop.f32.mrf.mxu0 }
 0x9d8   : > { %v3057_v44 = vpop.f32.mrf.mxu1  ;;  %v3103_v45 = vpop.f32.mrf.mxu0 }
 0x9d9   : > { %v3173_v46 = vsel %vm1785_vm3, %v3103_v45, -inf  ;;  %v3170_v47 = vsel %vm1785_vm3, %v3057_v44, -inf }
 0x9da   : > { %v5027_v48 = vpop.f32.mrf.mxu0  ;;  %3174 = vmax.xlane.f32.xlu1 %v3173_v46  ;;  %3171 = vmax.xlane.f32.xlu0 %v3170_v47  ;;  %v5021_v49 = vpop.f32.mrf.mxu1 }
 0x9dc   : > { %v3106_v50 = vpop.f32.mrf.mxu0  ;;  %v3060_v51 = vpop.f32.mrf.mxu1 }
 0x9dd   : > { %v3157_v2 = vpop.xlane.xlu0 %3156 }
 0x9de   : > { %v5028_v53 = vpop.f32.mrf.mxu0  ;;  %v5022_v55 = vpop.f32.mrf.mxu1  ;;  %v3179_v33 = vsub.f32 %v2827_v13, %v3157_v2 }
 0x9e0   : > { %v3149_v56 = vpop.f32.mrf.mxu1  ;;  %v3187_v7 = vmul.f32 1.442695, %v3179_v33 }
 0x9e1   : > { %v3176_v58 = vsel %vm1785_vm3, %v3149_v56, -inf }
 0x9e2   : > { %3177 = vmax.xlane.f32.xlu0 %v3176_v58  ;;  %v5033_v54 = vpop.f32.mrf.mxu1 }
 0x9e4   : > { %v3160_v59 = vpop.xlane.xlu1 %3159  ;;  %v3152_v62 = vpop.f32.mrf.mxu1 }
 0x9e5   : > { %v3180_v60 = vsub.f32 %v2873_v21, %v3160_v59 }
 0x9e6   : > { %v5034_v1 = vpop.f32.mrf.mxu1 }
 0x9e7   : > { %v3189_v0 = vmul.f32 1.442695, %v3180_v60 }
 0x9e9   : > { %5490 = vpow2.f32 %v3189_v0 }
 0x9ea   : > { %5492 = vpow2.f32 %v3187_v7 }
 0x9eb   : > { %5304 = vrot.lane.b32.xlu1 %v6601_v16, %s5900_s16 }
 0x9f6   : > { %v5491_v26 = vpop.eup %5490 }
 0x9f7   : > { %v3206_v3 = vsel %vm1785_vm3, %v5491_v26, 0.0  ;;  %v6667_v8 = vpop.eup %5492 }
 0x9f8   : > { %3207 = vadd.xlane.f32.xlu0 %v3206_v3  ;;  %v3203_v9 = vsel %vm1785_vm3, %v6667_v8, 0.0 }
 0xa0f   : > { %3204 = vadd.xlane.f32.xlu1 %v3203_v9 }
 0xa53   : > { %v3163_v10 = vpop.xlane.xlu0 %3162 }
 0xa54   : > { %v3181_v4 = vsub.f32 %v2919_v25, %v3163_v10 }
 0xa56   : > { %v3191_v11 = vmul.f32 1.442695, %v3181_v4 }
 0xa58   : > { %5494 = vpow2.f32 %v3191_v11 }
 0xa5b   : > { %v3169_v12 = vpop.xlane.xlu1 %3168  ;;  %v3166_v17 = vpop.xlane.xlu0 %3165 }
 0xa5c   : > { %v3183_v18 = vsub.f32 %v3011_v32, %v3169_v12  ;;  %v3182_v19 = vsub.f32 %v2965_v31, %v3166_v17 }
 0xa5e   : > { %v3195_v13 = vmul.f32 1.442695, %v3183_v18  ;;  %v3193_v20 = vmul.f32 1.442695, %v3182_v19 }
 0xa60   : > { %5496 = vpow2.f32 %v3195_v13 }
 0xa61   : > { %5498 = vpow2.f32 %v3193_v20 }
 0xa63   : > { %v3175_v21 = vpop.xlane.xlu1 %3174  ;;  %v3172_v14 = vpop.xlane.xlu0 %3171 }
 0xa64   : > { %v3185_v22 = vsub.f32 %v3103_v45, %v3175_v21  ;;  %v3184_v23 = vsub.f32 %v3057_v44, %v3172_v14 }
 0xa65   : > { %v5495_v24 = vpop.eup %5494 }
 0xa66   : > { %v3199_v27 = vmul.f32 1.442695, %v3185_v22  ;;  %v3197_v28 = vmul.f32 1.442695, %v3184_v23  ;;  %v3209_v29 = vsel %vm1785_vm3, %v5495_v24, 0.0 }
 0xa67   : > { %3210 = vadd.xlane.f32.xlu1 %v3209_v29  ;;  %v5305_v46 = vpop.permute.xlu1 %5304 }
 0xa68   : > { %5500 = vpow2.f32 %v3199_v27  ;;  %v5307_v47 = vunpack.i.h.bf16 %v5305_v46 }
 0xa69   : > { %5502 = vpow2.f32 %v3197_v28 }
 0xa6a   : > { %v2782_v49 = vpack.c.bf16 %v5307_v47, %v5307_v47  ;;  %v5406_v47 = vld [vmem:[%s6240_s17 + $0x38] sm:$0xff]  }
 0xa6b   : > { %v3178_v25 = vpop.xlane.xlu0 %3177 }
 0xa6c   : > { %v3186_v31 = vsub.f32 %v3149_v56, %v3178_v25  ;;  %v3393_v53 = vsel %vm1885_vm2, %v2782_v49, 0  ;;  %v5306_v56 = vunpack.i.l.bf16 %v5305_v46 }
 0xa6d   : > { %v6672_v30 = vpop.eup %5496 }
 0xa6e   : > { %v5499_v32 = vpop.eup %5498  ;;  %v3215_v35 = vsel %vm1785_vm3, %v6672_v30, 0.0  ;;  %v3201_v37 = vmul.f32 1.442695, %v3186_v31  ;;  %v2781_v54 = vpack.c.bf16 %v5306_v56, %v5306_v56  ;;  %v5409_v56 = vld [vmem:[%s6240_s17 + $0x20] sm:$0xff]  }
 0xa6f   : > { %3216 = vadd.xlane.f32.xlu1 %v3215_v35  ;;  %v3212_v38 = vsel %vm1785_vm3, %v5499_v32, 0.0 }
 0xa70   : > { %3213 = vadd.xlane.f32.xlu0 %v3212_v38  ;;  %5504 = vpow2.f32 %v3201_v37  ;;  %v3347_v62 = vsel %vm1885_vm2, %v2781_v54, 0  ;;  %v5410_v54 = vld [vmem:[%s6240_s17 + $0x18] sm:$0xff]  }
 0xa75   : > { %v6677_v39 = vpop.eup %5500 }
 0xa76   : > { %v6679_v40 = vpop.eup %5502  ;;  %v3221_v41 = vsel %vm1785_vm3, %v6677_v39, 0.0 }
 0xa77   : > { %3222 = vadd.xlane.f32.xlu1 %v3221_v41  ;;  %v3218_v42 = vsel %vm1785_vm3, %v6679_v40, 0.0 }
 0xa78   : > { %3219 = vadd.xlane.f32.xlu0 %v3218_v42 }
 0xa7d   : > { %v6685_v43 = vpop.eup %5504 }
 0xa7e   : > { %v3224_v44 = vsel %vm1785_vm3, %v6685_v43, 0.0 }
 0xa7f   : > { %3225 = vadd.xlane.f32.xlu0 %v3224_v44 }
 0xa81   : > { %v3208_v45 = vpop.xlane.xlu0 %3207 }
 0xa82   : > { %5506 = vrcp.f32 %v3208_v45 }
 0xa88   : > { %5314 = vrot.lane.b32.xlu1 %v6601_v16, %s5902_s20 }
 0xa8f   : > { %v5507_v48 = vpop.eup %5506 }
 0xa90   : > { %v3236_v50 = vmul.f32 %v5507_v48, %v5491_v26  ;;  %v5407_v48 = vld [vmem:[%s6240_s17 + $0x30] sm:$0xff]  }
 0xa92   : > { %v3244_v51 = vpack.c.bf16 %v3236_v50, %v3236_v50 }
 0xa94   : > { %5044 = vmatmul.mubr.msk.bf16.vlgmr.msra.gmra.mxu1 %vm1785_vm3, %v3244_v51 }
 0xa95   : > { %5054 = vmatpush3.bf16.msra.mxu1 %v3393_v53  ;;  %5055 = vmatprep.mubr.msk.bf16.mxu1 %vm5899_vm0, %v5898_v6  ;;  %v5408_v53 = vld [vmem:[%s6240_s17 + $0x28] sm:$0xff]  }
 0xa96   : > { %5309 = vrot.lane.b32.xlu0 %v6601_v16, %s5901_s0  ;;  %5065 = vmatprep.subr.bf16.mxu1 %v5898_v6 }
 0xa98   : > { %v3205_v55 = vpop.xlane.xlu1 %3204 }
 0xa99   : > { %5508 = vrcp.f32 %v3205_v55 }
 0xaa6   : > { %v5509_v58 = vpop.eup %5508 }
 0xaa7   : > { %v3235_v59 = vmul.f32 %v5509_v58, %v6667_v8 }
 0xaa9   : > { %v3243_v60 = vpack.c.bf16 %v3235_v59, %v3235_v59 }
 0xaab   : > { %5038 = vmatmul.mubr.msk.bf16.vlgmr.msra.gmra.mxu0 %vm1785_vm3, %v3243_v60 }
 0xaac   : > { %5048 = vmatpush3.bf16.msra.mxu0 %v3347_v62  ;;  %5049 = vmatprep.mubr.msk.bf16.mxu0 %vm5899_vm0, %v5898_v6 }
 0xaad   : > { %5059 = vmatprep.subr.bf16.mxu0 %v5898_v6 }
 0xaf0   : > { %v3211_v16 = vpop.xlane.xlu1 %3210 }
 0xaf1   : > { %5510 = vrcp.f32 %v3211_v16  ;;  %v5411_v16 = vld [vmem:[%s6240_s17 + $0x10] sm:$0xff]  }
 0xaf8   : > { %v3217_v1 = vpop.xlane.xlu1 %3216 }
 0xaf9   : > { %v3214_v0 = vpop.xlane.xlu0 %3213 }
 0xafa   : > { %5512 = vrcp.f32 %v3214_v0 }
 0xafb   : > { %5514 = vrcp.f32 %v3217_v1 }
 0xafe   : > { %v5511_v2 = vpop.eup %5510 }
 0xaff   : > { %v3237_v26 = vmul.f32 %v5511_v2, %v5495_v24  ;;  %v5412_v2 = vld [vmem:[%s6240_s17 + $0x8] sm:$0xff]  }
 0xb00   : > { %v3223_v7 = vpop.xlane.xlu1 %3222 }
 0xb01   : > { %v3220_v33 = vpop.xlane.xlu0 %3219  ;;  %v3245_v3 = vpack.c.bf16 %v3237_v26, %v3237_v26 }
 0xb02   : > { %5516 = vrcp.f32 %v3220_v33 }
 0xb03   : > { %5050 = vmatmul.mubr.msk.bf16.vlgmr.msra.gmra.mxu0 %vm1785_vm3, %v3245_v3  ;;  %5518 = vrcp.f32 %v3223_v7  ;;  %v5413_v3 = vld [vmem:[%s6240_s17] sm:$0xff]  }
 0xb04   : > { %5061 = vmatprep.mubr.msk.bf16.mxu0 %vm5899_vm0, %v5898_v6  ;;  %v5315_v11 = vpop.permute.xlu1 %5314 }
 0xb05   : > { %v5317_v18 = vunpack.i.h.bf16 %v5315_v11  ;;  %v5316_v19 = vunpack.i.l.bf16 %v5315_v11 }
 0xb07   : > { %v5513_v8 = vpop.eup %5512  ;;  %v2786_v27 = vpack.c.bf16 %v5317_v18, %v5317_v18  ;;  %v2785_v28 = vpack.c.bf16 %v5316_v19, %v5316_v19 }
 0xb08   : > { %v3238_v9 = vmul.f32 %v5513_v8, %v5499_v32  ;;  %v3226_v10 = vpop.xlane.xlu0 %3225  ;;  %v5515_v12 = vpop.eup %5514 }
 0xb09   : > { %5520 = vrcp.f32 %v3226_v10  ;;  %v3239_v23 = vmul.f32 %v5515_v12, %v6672_v30  ;;  %v3531_v30 = vsel %vm1885_vm2, %v2785_v28, 0  ;;  %v3577_v37 = vsel %vm1885_vm2, %v2786_v27, 0 }
 0xb0a   : > { %v3246_v4 = vpack.c.bf16 %v3238_v9, %v3238_v9 }
 0xb0b   : > { %v3247_v31 = vpack.c.bf16 %v3239_v23, %v3239_v23 }
 0xb0c   : > { %5056 = vmatmul.mubr.msk.bf16.vlgmr.msra.gmra.mxu1 %vm1785_vm3, %v3246_v4  ;;  %v5310_v17 = vpop.permute.xlu0 %5309 }
 0xb0d   : > { %5067 = vmatprep.mubr.msk.bf16.mxu1 %vm5899_vm0, %v5898_v6  ;;  %v5312_v13 = vunpack.i.h.bf16 %v5310_v17  ;;  %v5311_v20 = vunpack.i.l.bf16 %v5310_v17 }
 0xb0f   : > { %v5517_v21 = vpop.eup %5516  ;;  %v2784_v14 = vpack.c.bf16 %v5312_v13, %v5312_v13  ;;  %v2783_v22 = vpack.c.bf16 %v5311_v20, %v5311_v20 }
 0xb10   : > { %v3240_v24 = vmul.f32 %v5517_v21, %v6679_v40  ;;  %v5519_v35 = vpop.eup %5518 }
 0xb11   : > { %v3439_v29 = vsel %vm1885_vm2, %v2783_v22, 0  ;;  %v3485_v25 = vsel %vm1885_vm2, %v2784_v14, 0  ;;  %v3241_v40 = vmul.f32 %v5519_v35, %v6677_v39 }
 0xb12   : > { %5060 = vmatpush3.bf16.msra.mxu0 %v3439_v29  ;;  %5066 = vmatpush3.bf16.msra.mxu1 %v3485_v25  ;;  %v3248_v32 = vpack.c.bf16 %v3240_v24, %v3240_v24 }
 0xb13   : > { %5071 = vmatprep.subr.bf16.mxu0 %v5898_v6  ;;  %5077 = vmatprep.subr.bf16.mxu1 %v5898_v6  ;;  %v3249_v42 = vpack.c.bf16 %v3241_v40, %v3241_v40 }
 0xb15   : > { %5062 = vmatmul.mubr.msk.bf16.vlgmr.msra.gmra.mxu0 %vm1785_vm3, %v3247_v31  ;;  %5068 = vmatmul.mubr.msk.bf16.vlgmr.msra.gmra.mxu1 %vm1785_vm3, %v3248_v32 }
 0xb16   : > { %v5521_v38 = vpop.eup %5520  ;;  %5072 = vmatpush3.bf16.msra.mxu0 %v3531_v30  ;;  %5078 = vmatpush3.bf16.msra.mxu1 %v3577_v37 }
 0xb17   : > { %5073 = vmatprep.mubr.msk.bf16.mxu0 %vm5899_vm0, %v5898_v6  ;;  %5079 = vmatprep.mubr.msk.bf16.mxu1 %vm5899_vm0, %v5898_v6  ;;  %v3242_v41 = vmul.f32 %v5521_v38, %v6685_v43 }
 0xb18   : > { %5083 = vmatprep.subr.bf16.mxu0 %v5898_v6 }
 0xb19   : > { %v3250_v44 = vpack.c.bf16 %v3242_v41, %v3242_v41 }
 0xb1d   : > { %5074 = vmatmul.mubr.msk.bf16.vlgmr.msra.gmra.mxu0 %vm1785_vm3, %v3249_v42  ;;  %5080 = vmatmul.mubr.msk.bf16.vlgmr.msra.gmra.mxu1 %vm1785_vm3, %v3250_v44 }
 0xb1e   : > { %5099 = vmatprep.mubr.msk.bf16.mxu0 %vm5899_vm0, %v5898_v6  ;;  %3939 = vmatprep.mubr.bf16.mxu1 %v5897_v5 }
 0xb1f   : > { %5084 = vmatpush3.bf16.msra.mxu0 %v5406_v47 }
 0xb20   : > { %5085 = vmatprep.subr.bf16.mxu0 %v5898_v6 }
 0xb23   : > { %5086 = vmatpush3.bf16.msra.mxu0 %v5407_v48 }
 0xb24   : > { %5087 = vmatprep.subr.bf16.mxu0 %v5898_v6 }
 0xb27   : > { %5088 = vmatpush3.bf16.msra.mxu0 %v5408_v53 }
 0xb28   : > { %5089 = vmatprep.subr.bf16.mxu0 %v5898_v6 }
 0xb2b   : > { %5090 = vmatpush3.bf16.msra.mxu0 %v5409_v56  ;;  %v5416_v56 = vld [vmem:[%s6957_s28 + $0x74] ss:$8 sps:$4 sm:$0xff]  }
 0xb2c   : > { %5091 = vmatprep.subr.bf16.mxu0 %v5898_v6  ;;  %3907 = vmatprep.subr.bf16.mxu1 %v5416_v56 }
 0xb2f   : > { %5092 = vmatpush3.bf16.msra.mxu0 %v5410_v54 }
 0xb30   : > { %5093 = vmatprep.subr.bf16.mxu0 %v5898_v6 }
 0xb33   : > { %5094 = vmatpush3.bf16.msra.mxu0 %v5411_v16 }
 0xb34   : > { %5095 = vmatprep.subr.bf16.mxu0 %v5898_v6 }
 0xb37   : > { %5096 = vmatpush3.bf16.msra.mxu0 %v5412_v2  ;;  %v5422_v2 = vld [vmem:[%s6957_s28 + $0x54] ss:$8 sps:$4 sm:$0xff]  }
 0xb38   : > { %5097 = vmatprep.subr.bf16.mxu0 %v5898_v6 }
 0xb3b   : > { %5098 = vmatpush3.bf16.msra.mxu0 %v5413_v3  ;;  %v5425_v3 = vld [vmem:[%s6957_s28 + $0x44] ss:$8 sps:$4 sm:$0xff]  }
 0xb54   : > { %v6732_v45 = vpop.f32.mrf.mxu1 }
 0xb56   : > { %v5045_v46 = vpop.f32.mrf.mxu1 }
 0xb58   : > { %v3340_v39 = vpop.f32.mrf.mxu1 }
 0xb5a   : > { %v5046_v43 = vpop.f32.mrf.mxu1 }
 0xb6b   : > { %v3291_v49 = vpop.f32.mrf.mxu0 }
 0xb6d   : > { %v5039_v50 = vpop.f32.mrf.mxu0 }
 0xb6f   : > { %v3294_v51 = vpop.f32.mrf.mxu0 }
 0xb71   : > { %v5040_v5 = vpop.f32.mrf.mxu0 }
 0xbc3   : > { %v3383_v55 = vpop.f32.mrf.mxu0 }
 0xbc5   : > { %v5051_v58 = vpop.f32.mrf.mxu0 }
 0xbc7   : > { %v3386_v59 = vpop.f32.mrf.mxu0 }
 0xbc9   : > { %v5052_v60 = vpop.f32.mrf.mxu0 }
 0xbcc   : > { %v3429_v62 = vpop.f32.mrf.mxu1 }
 0xbcd   : > { %v5318_v0 = vpack.i.bf16 %v3429_v62, %v3383_v55  ;;  %v5414_v55 = vld [vmem:[%s6957_s28 + $0x70] ss:$8 sps:$4 sm:$0xff]  }
 0xbce   : > { %v5057_v1 = vpop.f32.mrf.mxu1  ;;  %3908 = vmatpush1.bf16.msra.mxu1 %v5414_v55 }
 0xbcf   : > { %5319 = vrot.lane.b32.xlu1 %v5318_v0, %s5902_s20  ;;  %v5419_v0 = vld [vmem:[%s6957_s28 + $0x64] ss:$8 sps:$4 sm:$0xff]   ;;  %v5417_v1 = vld [vmem:[%s6957_s28 + $0x60] ss:$8 sps:$4 sm:$0xff]  }
 0xbd0   : > { %v3432_v26 = vpop.f32.mrf.mxu1  ;;  %3909 = vmatprep.subr.bf16.mxu1 %v5419_v0 }
 0xbd1   : > { %v5420_v26 = vld [vmem:[%s6957_s28 + $0x50] ss:$8 sps:$4 sm:$0xff]  }
 0xbd2   : > { %v5058_v33 = vpop.f32.mrf.mxu1  ;;  %3910 = vmatpush1.bf16.msra.mxu1 %v5417_v1 }
 0xbd3   : > { %3911 = vmatprep.subr.bf16.mxu1 %v5422_v2  ;;  %v5423_v33 = vld [vmem:[%s6957_s28 + $0x40] ss:$8 sps:$4 sm:$0xff]  }
 0xbd5   : > { %v3475_v7 = vpop.f32.mrf.mxu0  ;;  %v3521_v8 = vpop.f32.mrf.mxu1 }
 0xbd6   : > { %v5323_v9 = vpack.i.bf16 %v3521_v8, %v3475_v7  ;;  %3912 = vmatpush1.bf16.msra.mxu1 %v5420_v26  ;;  %v5428_v7 = vld [vmem:[%s6957_s28 + $0x34] ss:$8 sps:$4 sm:$0xff]   ;;  %v5426_v8 = vld [vmem:[%s6957_s28 + $0x30] ss:$8 sps:$4 sm:$0xff]  }
 0xbd7   : > { %v5063_v10 = vpop.f32.mrf.mxu0  ;;  %v5069_v4 = vpop.f32.mrf.mxu1  ;;  %3913 = vmatprep.subr.bf16.mxu1 %v5425_v3 }
 0xbd8   : > { %5324 = vrot.lane.b32.xlu0 %v5323_v9, %s5901_s0  ;;  %v5431_v9 = vld [vmem:[%s6957_s28 + $0x24] ss:$8 sps:$4 sm:$0xff]   ;;  %v5429_v10 = vld [vmem:[%s6957_s28 + $0x20] ss:$8 sps:$4 sm:$0xff]   ;;  %v5434_v4 = vld [vmem:[%s6957_s28 + $0x14] ss:$8 sps:$4 sm:$0xff]  }
 0xbd9   : > { %v3478_v11 = vpop.f32.mrf.mxu0  ;;  %v3524_v12 = vpop.f32.mrf.mxu1 }
 0xbda   : > { %3914 = vmatpush1.bf16.msra.mxu1 %v5423_v33  ;;  %v5432_v11 = vld [vmem:[%s6957_s28 + $0x10] ss:$8 sps:$4 sm:$0xff]   ;;  %v5437_v12 = vld [vmem:[%s6957_s28 + $0x4] ss:$8 sps:$4 sm:$0xff]  }
 0xbdb   : > { %v5064_v17 = vpop.f32.mrf.mxu0  ;;  %v5070_v18 = vpop.f32.mrf.mxu1  ;;  %3915 = vmatprep.subr.bf16.mxu1 %v5428_v7 }
 0xbdc   : > { %v5435_v17 = vld [vmem:[%s6957_s28] ss:$8 sps:$4 sm:$0xff]   ;;  %v5438_v18 = vld [vmem:[%s6288_s2 + $0x78] sm:$0xff]  }
 0xbdd   : > { %v3567_v19 = vpop.f32.mrf.mxu0  ;;  %v3613_v13 = vpop.f32.mrf.mxu1  ;;  %4809 = vmatprep.subr.bf16.mxu0 %v5438_v18 }
 0xbde   : > { %v5328_v20 = vpack.i.bf16 %v3613_v13, %v3567_v19  ;;  %3916 = vmatpush1.bf16.msra.mxu1 %v5426_v8  ;;  %v5439_v19 = vld [vmem:[%s6288_s2 + $0x38] sm:$0xff]   ;;  %v5440_v13 = vld [vmem:[%s6288_s2 + $0x70] sm:$0xff]  }
 0xbdf   : > { %v5075_v21 = vpop.f32.mrf.mxu0  ;;  %v5081_v14 = vpop.f32.mrf.mxu1  ;;  %3917 = vmatprep.subr.bf16.mxu1 %v5431_v9 }
 0xbe0   : > { %5329 = vrot.lane.b32.xlu1 %v5328_v20, %s5900_s16  ;;  %v5441_v20 = vld [vmem:[%s6288_s2 + $0x30] sm:$0xff]   ;;  %v5442_v21 = vld [vmem:[%s6288_s2 + $0x68] sm:$0xff]  }
 0xbe1   : > { %v3570_v6 = vpop.f32.mrf.mxu0  ;;  %v3616_v22 = vpop.f32.mrf.mxu1  ;;  %v5443_v14 = vld [vmem:[%s6288_s2 + $0x28] sm:$0xff]  }
 0xbe2   : > { %3918 = vmatpush1.bf16.msra.mxu1 %v5429_v10  ;;  %v5444_v6 = vld [vmem:[%s6288_s2 + $0x60] sm:$0xff]  }
 0xbe3   : > { %v5076_v23 = vpop.f32.mrf.mxu0  ;;  %v5082_v24 = vpop.f32.mrf.mxu1  ;;  %3919 = vmatprep.subr.bf16.mxu1 %v5434_v4  ;;  %v5445_v22 = vld [vmem:[%s6288_s2 + $0x20] sm:$0xff]  }
 0xbe4   : > { %v5446_v23 = vld [vmem:[%s6288_s2 + $0x58] sm:$0xff]  }
 0xbe5   : > { %v5447_v24 = vld [vmem:[%s6288_s2 + $0x18] sm:$0xff]  }
 0xbe6   : > { %3920 = vmatpush1.bf16.msra.mxu1 %v5432_v11 }
 0xbe7   : > { %3921 = vmatprep.subr.bf16.mxu1 %v5437_v12 }
 0xbea   : > { %3922 = vmatpush1.bf16.msra.mxu1 %v5435_v17 }
 0xc41   : > { %v5320_v27 = vpop.permute.xlu1 %5319 }
 0xc42   : > { %v5322_v29 = vunpack.i.h.bf16 %v5320_v27  ;;  %v5321_v25 = vunpack.i.l.bf16 %v5320_v27 }
 0xc44   : > { %v3644_v30 = vsel %vm1416_vm1, %v6732_v45, %v5322_v29  ;;  %v3643_v37 = vsel %vm1416_vm1, %v3291_v49, %v5321_v25  ;;  %v4652_v45 = vld [vmem:[%s1036_s29] ss:$0 sm:$0xff] }
 0xc4a   : > { %v5325_v28 = vpop.permute.xlu0 %5324 }
 0xc4b   : > { %v5327_v31 = vunpack.i.h.bf16 %v5325_v28  ;;  %v5326_v32 = vunpack.i.l.bf16 %v5325_v28 }
 0xc4d   : > { %v3646_v41 = vsel %vm2277_vm4, %v3644_v30, %v5327_v31  ;;  %v3645_v42 = vsel %vm2277_vm4, %v3643_v37, %v5326_v32  ;;  %v3789_v37 = vrot.slane %v6571_v52, %v6338_v34  ;;  %v5450_v52 = vld [vmem:[%s6288_s2 + $0x48] sm:$0xff]  }
 0xc52   : > { %v5330_v35 = vpop.permute.xlu1 %5329 }
 0xc53   : > { %v5332_v38 = vunpack.i.h.bf16 %v5330_v35  ;;  %v5331_v40 = vunpack.i.l.bf16 %v5330_v35 }
 0xc55   : > { %v3648_v44 = vsel %vm2280_vm5, %v3646_v41, %v5332_v38  ;;  %v3647_v46 = vsel %vm2280_vm5, %v3645_v42, %v5331_v40  ;;  %v3795_v42 = vrot.slane %v6576_v57, %v6338_v34 }
 0xc56   : > { %v3649_v39 = vpack.c.bf16 %v3648_v44, %v3647_v46 }
 0xc58   : > { %5100 = vmatmul.mubr.bf16.vlgmr.msra.gmra.mxu0 %v3649_v39 }
 0xc59   : > { %4810 = vmatpush3.bf16.msra.mxu0 %v5439_v19 }
 0xc5a   : > { %4811 = vmatprep.subr.bf16.mxu0 %v5440_v13 }
 0xc5d   : > { %4812 = vmatpush3.bf16.msra.mxu0 %v5441_v20 }
 0xc5e   : > { %4813 = vmatprep.subr.bf16.mxu0 %v5442_v21 }
 0xc61   : > { %4814 = vmatpush3.bf16.msra.mxu0 %v5443_v14 }
 0xc62   : > { %4815 = vmatprep.subr.bf16.mxu0 %v5444_v6 }
 0xc65   : > { %4816 = vmatpush3.bf16.msra.mxu0 %v5445_v22 }
 0xc66   : > { %4817 = vmatprep.subr.bf16.mxu0 %v5446_v23 }
 0xc69   : > { %4818 = vmatpush3.bf16.msra.mxu0 %v5447_v24 }
 0xd18   : > { %v3755_v43 = vpop.f32.mrf.mxu0 }
 0xd19   : > { %v3756_v47 = vadd.f32 %v4652_v45, %v3755_v43  ;;  %v5448_v43 = vld [vmem:[%s6288_s2 + $0x50] sm:$0xff]  }
 0xd1a   : > { %v5101_v48 = vpop.f32.mrf.mxu0  ;;  %4819 = vmatprep.subr.bf16.mxu0 %v5448_v43 }
 0xd1b   : > { %v3762_v49 = vadd.f32 %v3756_v47, %v6580_v61  ;;  %v5449_v47 = vld [vmem:[%s6288_s2 + $0x10] sm:$0xff]   ;;  %v5451_v48 = vld [vmem:[%s6288_s2 + $0x8] sm:$0xff]  }
 0xd1c   : > { %v3758_v50 = vpop.f32.mrf.mxu0  ;;  %4820 = vmatpush3.bf16.msra.mxu0 %v5449_v47 }
 0xd1d   : > { %v3759_v51 = vadd.f32 %v4652_v45, %v3758_v50  ;;  %3764 = vadd.xlane.f32.xlu0 %v3762_v49  ;;  %4821 = vmatprep.subr.bf16.mxu0 %v5450_v52  ;;  %v5453_v50 = vld [vmem:[%s6288_s2] sm:$0xff]  }
 0xd1e   : > { %v5102_v5 = vpop.f32.mrf.mxu0 }
 0xd1f   : > { %v3763_v53 = vadd.f32 %v3759_v51, %v6582_v63  ;;  %v3815_v51 = vld [vmem:[%s6282_s3] sm:$0x3] }
 0xd20   : > { %4822 = vmatpush3.bf16.msra.mxu0 %v5451_v48  ;;  %v3824_v5 = vrot.slane %v3815_v51, %v6338_v34  ;;  %v4677_v34 = vld [vmem:[%s1051_s1] ss:$0 sm:$0xff] }
 0xd21   : > { %3766 = vadd.xlane.f32.xlu1 %v3763_v53 }
 0xda6   : > { %v3765_v58 = vpop.xlane.xlu0 %3764 }
 0xda7   : > { %v3768_v54 = vmul.f32 0.0078125, %v3765_v58 }
 0xda9   : > { %v6768_v59 = vsub.f32 %v3762_v49, %v3768_v54  ;;  %v5452_v49 = vld [vmem:[%s6288_s2 + $0x40] sm:$0xff]  }
 0xdaa   : > { %v3767_v61 = vpop.xlane.xlu1 %3766  ;;  %4823 = vmatprep.subr.bf16.mxu0 %v5452_v49 }
 0xdab   : > { %v3769_v60 = vmul.f32 0.0078125, %v3767_v61  ;;  %v3772_v63 = vmul.f32 %v6768_v59, %v6768_v59  ;;  %4824 = vmatpush3.bf16.msra.mxu0 %v5453_v50 }
 0xdad   : > { %v6772_v62 = vsub.f32 %v3763_v53, %v3769_v60  ;;  %3774 = vadd.xlane.f32.xlu0 %v3772_v63  ;;  %v3820_v53 = vrot.slane %v3815_v51, %v6344_v36 }
 0xdaf   : > { %v3773_v16 = vmul.f32 %v6772_v62, %v6772_v62 }
 0xdb1   : > { %3776 = vadd.xlane.f32.xlu0 %v3773_v16 }
 0xe36   : > { %v3775_v27 = vpop.xlane.xlu0 %3774 }
 0xe37   : > { %v3778_v28 = vmul.f32 0.0078125, %v3775_v27 }
 0xe39   : > { %v3780_v29 = vadd.f32 1e-05, %v3778_v28 }
 0xe3a   : > { %v3777_v25 = vpop.xlane.xlu0 %3776 }
 0xe3b   : > { %5522 = vrsqrt.f32 %v3780_v29  ;;  %v3779_v31 = vmul.f32 0.0078125, %v3777_v25  ;;  %v5532_v29 = vld [vmem:[%s6272_s10] sm:$0x7] }
 0xe3c   : > { %v4159_v25 = vrot.slane %v5532_v29, %v6375_v15 }
 0xe3d   : > { %v3781_v32 = vadd.f32 1e-05, %v3779_v31 }
 0xe3f   : > { %5524 = vrsqrt.f32 %v3781_v32  ;;  %v5533_v32 = vld [vmem:[%s6277_s4] sm:$0x7] }
 0xe48   : > { %v5523_v35 = vpop.eup %5522 }
 0xe49   : > { %v3784_v30 = vmul.f32 %v5523_v35, %v6768_v59  ;;  %v4165_v35 = vrot.slane %v5533_v32, %v6375_v15 }
 0xe4b   : > { %v3790_v41 = vmul.f32 %v3789_v37, %v3784_v30 }
 0xe4c   : > { %v5525_v38 = vpop.eup %5524 }
 0xe4d   : > { %v3785_v40 = vmul.f32 %v5525_v38, %v6772_v62  ;;  %v3796_v46 = vadd.f32 %v3795_v42, %v3790_v41 }
 0xe4f   : > { %v3791_v44 = vmul.f32 %v3789_v37, %v3785_v40 }
 0xe51   : > { %v3797_v39 = vadd.f32 %v3795_v42, %v3791_v44 }
 0xe53   : > { %v3798_v45 = vpack.c.bf16 %v3797_v39, %v3796_v46 }
 0xe55   : > { %3940 = vmatmul.mubr.bf16.vlgmr.msra.gmra.mxu1 %v3798_v45 }
 0xf15   : > { %v3941_v57 = vpop.f32.mrf.mxu1 }
 0xf16   : > { %v3942_v59 = vadd.f32 %v3941_v57, %v3820_v53 }
 0xf17   : > { %v3943_v55 = vpop.f32.mrf.mxu1 }
 0xf18   : > { %v3944_v58 = vadd.f32 %v3943_v55, %v3824_v5  ;;  %v3950_v0 = vmax.f32 %v3942_v59, 0.0 }
 0xf19   : > { %v3945_v56 = vpop.f32.mrf.mxu1 }
 0xf1a   : > { %v3946_v54 = vadd.f32 %v3945_v56, %v3820_v53  ;;  %v3951_v62 = vmax.f32 %v3944_v58, 0.0 }
 0xf1b   : > { %v3947_v61 = vpop.f32.mrf.mxu1 }
 0xf1c   : > { %v3948_v60 = vadd.f32 %v3947_v61, %v3824_v5  ;;  %v3952_v63 = vmax.f32 %v3946_v54, 0.0 }
 0xf1e   : > { %v3953_v16 = vmax.f32 %v3948_v60, 0.0  ;;  %v3954_v2 = vpack.c.bf16 %v3952_v63, %v3950_v0 }
 0xf20   : > { %v3955_v1 = vpack.c.bf16 %v3953_v16, %v3951_v62 }
 0xf22   : > { %4123 = vmatprep.mubr.bf16.mxu0 %v3955_v1 }
 0xf23   : > { %4124 = vmatmul.mubr.bf16.vlgmr.msra.gmra.mxu0 %v3954_v2 }
 0xfe3   : > { %v4825_v26 = vpop.f32.mrf.mxu0 }
 0xfe5   : > { %v4826_v36 = vpop.f32.mrf.mxu0 }
 0xfe6   : > { %v4827_v33 = vadd.f32 %v4826_v36, %v4825_v26 }
 0xfe7   : > { %v4828_v3 = vpop.f32.mrf.mxu0 }
 0xfe8   : > { %v4126_v7 = vadd.f32 %v4827_v33, %v4677_v34 }
 0xfe9   : > { %v4829_v8 = vpop.f32.mrf.mxu0 }
 0xfea   : > { %v4830_v9 = vadd.f32 %v4829_v8, %v4828_v3  ;;  %v4132_v10 = vadd.f32 %v4126_v7, %v3796_v46 }
 0xfec   : > { %v4129_v4 = vadd.f32 %v4830_v9, %v4677_v34  ;;  %4134 = vadd.xlane.f32.xlu1 %v4132_v10 }
 0xfee   : > { %v4133_v11 = vadd.f32 %v4129_v4, %v3797_v39 }
 0xff0   : > { %4136 = vadd.xlane.f32.xlu0 %v4133_v11 }
0x1075   : > { %v4135_v12 = vpop.xlane.xlu1 %4134 }
0x1076   : > { %v4138_v17 = vmul.f32 0.0078125, %v4135_v12 }
0x1078   : > { %v4140_v18 = vsub.f32 %v4132_v10, %v4138_v17 }
0x1079   : > { %v4137_v19 = vpop.xlane.xlu0 %4136 }
0x107a   : > { %v4139_v13 = vmul.f32 0.0078125, %v4137_v19  ;;  %v4142_v20 = vmul.f32 %v4140_v18, %v4140_v18 }
0x107c   : > { %v4141_v21 = vsub.f32 %v4133_v11, %v4139_v13  ;;  %4144 = vadd.xlane.f32.xlu1 %v4142_v20 }
0x107e   : > { %v4143_v14 = vmul.f32 %v4141_v21, %v4141_v21 }
0x1080   : > { %4146 = vadd.xlane.f32.xlu0 %v4143_v14 }
0x1105   : > { %v4145_v6 = vpop.xlane.xlu1 %4144 }
0x1106   : > { %v4148_v22 = vmul.f32 0.0078125, %v4145_v6 }
0x1108   : > { %v4150_v23 = vadd.f32 1e-05, %v4148_v22 }
0x1109   : > { %v4147_v24 = vpop.xlane.xlu0 %4146 }
0x110a   : > { %5526 = vrsqrt.f32 %v4150_v23  ;;  %v4149_v27 = vmul.f32 0.0078125, %v4147_v24 }
0x110c   : > { %v4151_v28 = vadd.f32 1e-05, %v4149_v27 }
0x110e   : > { %5528 = vrsqrt.f32 %v4151_v28 }
0x1117   : > { %v5527_v31 = vpop.eup %5526 }
0x1118   : > { %v4154_v30 = vmul.f32 %v5527_v31, %v4140_v18 }
0x111a   : > { %v4160_v37 = vmul.f32 %v4159_v25, %v4154_v30 }
0x111b   : > { %v5529_v38 = vpop.eup %5528 }
0x111c   : > { %v4166_v40 = vadd.f32 %v4165_v35, %v4160_v37  ;;  %v4155_v41 = vmul.f32 %v5529_v38, %v4141_v21 }
0x111e   : > { %4168 = vst [vmem:[#allocation2] sm:$0xff] %v4166_v40  ;;  %v4161_v42 = vmul.f32 %v4159_v25, %v4155_v41  ;;  %4173 = sbr.rel (%p4694_p11) target bundleno = 4388 (0x1124), region = 136 }
0x1120   : > { %v4167_v44 = vadd.f32 %v4165_v35, %v4161_v42 }
0x1122   : > { %4169 = vst [vmem:[#allocation2 + $0x8] sm:$0xff] %v4167_v44 }
0x1123   : > { %4174 = vst [vmem:[#allocation18] sm:$0xff] %v4166_v40  ;;  %4175 = vst [vmem:[#allocation18 + $0x8] sm:$0xff] %v4167_v44 }
0x1124 PF: > { %s6961_s10 = sld [smem:[#allocation30_spill]]  ;;  %s5903_s30 = smov [#allocation18]  }
0x1125   : > { %s4185_s15 = sshll.u32 %s5903_s30, 4  ;;  %s4186_s15 = int_to_ptr.vmem [resolvable:$true] %s4185_s15 }
0x1126   : > { %s5786_s4 = scalar_lea.vmem %s4186_s15, 256  ;;  %p5793_p5 = scmp.lt.s32.totalorder %s4186_s15, %s4186_s15 }
0x1127   : > { %p5787_p10 = scmp.ne.s32.totalorder %s4186_s15, %s5786_s4  ;;  %p5794_p8 = scmp.lt.s32.totalorder %s5786_s4, %s5786_s4 }
0x1129   : > { %p5795_p12 = por %p5794_p8, %p5793_p5 }
0x112a   : > { %p5158_p6 = scmp.eq.s32.totalorder %s6961_s10, 1 }
0x112c   : > { %p5788_p3 = pnand %p5787_p10, %p5158_p6 }
0x112e   : > { %p5789_p4 = pneg %p5788_p3 }
0x1130   : > { %p5796_p13 = pnand %p5795_p12, %p5789_p4 }
0x1132   : > { %5799 = shalt.err (!%p5796_p13)
}
0x1133   : > { %s5904_s8 = smov 128   ;;  %s5905_s25 = smov 8  }
0x1134   : > { %s6962_s18 = sld [smem:[#allocation54_spill]] }
0x113a   : > { %5126 = dma.vmem_to_hbm [thread:$0]  (%p5158_p6), %s4186_s15, 256, %s6962_s18, [#allocation5], %s5904_s8, %s5904_s8, %s5905_s25  }
0x113b   : > { %5855 = dma.done.wait (%p5158_p6), [#allocation5], 256  }
0x113c   : > { %5857 = vsyncadd (%p5158_p6), [#allocation5], 4294967040 }
0x113d PF: > { %s6963_s24 = sld [smem:[#allocation29_spill]] }
0x113e   : > { %s6964_s27 = sld [smem:[#allocation25_spill]] }
0x113f   : > { %s6965_s28 = sld [smem:[#allocation26_spill]] }
0x1140   : > { %s6966_s29 = sld [smem:[#allocation33_spill]] }
0x1141   : > { %s6967_s30 = sld [smem:[#allocation28_spill]] }
0x1142   : > { %s6968_s0 = sld [smem:[#allocation31_spill]] }
0x1143   : > { %s44_s19 = sadd.s32 1, %s6963_s24  }
0x1144   : > { %p41_p0 = scmp.ge.s32.totalorder %s44_s19, 4  }
0x1146   :  { %43 = sbr.rel (!%p41_p0) target bundleno = 33 (0x21), region = 261 }
0x114b   :  { %4201 = vsyncpa [#allocation4], 1 }
0x114c   :  { %4203 = vsyncpa [#allocation4 + $0x1], 1 }
0x114d   :  { %4204 = vsyncpa [#allocation7], 1 }
0x114e   :  { %4206 = vsyncpa [#allocation7 + $0x1], 1 }
0x114f   :  { %4207 = vsyncpa [#allocation10], 1 }
0x1150   :  { %4209 = vsyncpa [#allocation10 + $0x1], 1 }
0x1151   :  { %4210 = vsyncpa [#allocation13], 1 }
0x1152   :  { %4212 = vsyncpa [#allocation13 + $0x1], 1 }
0x1153   :  { %4213 = vsyncpa [#allocation16], 1 }
0x1154   :  { %4215 = vsyncpa [#allocation16 + $0x1], 1 }
0x1155   :  { %4216 = vsyncpa [#allocation5], 1 }
0x1156   :  { %4218 = vsyncpa [#allocation5 + $0x1], 1 }

</bundles_post_ra>
